<compile_context>
chip_gen: v6e
topology: v6e:2x2x1
jax: 0.10.0
libtpu: 0.0.40
codegen_flags: <defaults>
</compile_context>

<pallas_src>
import functools

import jax
import jax.numpy as jnp
from jax.experimental import pallas as pl
from jax.experimental.pallas import tpu as pltpu

LEAKY_SLOPE = 0.01          # nn.LeakyReLU() default negative_slope
MXU_DTYPE = jnp.bfloat16    # MXU-native operand dtype on v5e/v6e/v7x


def _pick_tm(m, cap=256):
    """Largest 8-aligned divisor of m that is <= cap; if that would leave a
    single grid step, split in two (keeps both v7x TensorCores busy).
    m here is always a multiple of 8 (B * Ho * Wo with Ho*Wo in {256,64,16})."""
    tm = min(m, cap)
    while tm > 8 and (m % tm != 0 or tm % 8 != 0):
        tm -= 8
    if tm == m and m >= 16 and (m // 2) % 8 == 0:
        tm = m // 2
    return tm


# -----------------------------------------------------------------------------
# Kernels: fused single-step matmul + bias + LeakyReLU (optionally + FC epilogue)
# -----------------------------------------------------------------------------
def _conv_bias_lrelu_kernel(a_ref, w_ref, b_ref, o_ref, *, negative_slope):
    y = jnp.dot(a_ref[...], w_ref[...], preferred_element_type=jnp.float32)
    y = y + b_ref[...]                                        # (tm,N) + (1,N)
    o_ref[...] = jnp.where(y > 0, y, negative_slope * y).astype(o_ref.dtype)


def _conv_bias_lrelu_fc_kernel(a_ref, w_ref, b_ref, wfc_ref, o_ref, *,
                               negative_slope):
    y = jnp.dot(a_ref[...], w_ref[...], preferred_element_type=jnp.float32)
    y = y + b_ref[...]
    y = jnp.where(y > 0, y, negative_slope * y)
    # Fused nn.Linear(4096, 1) epilogue: per output row (one row per
    # (batch, h, w) position) accumulate sum_c act_bf16[r, c] * wfc_bf16[r, c].
    y_bf = y.astype(MXU_DTYPE)                                # match ref rounding
    prod = y_bf.astype(jnp.float32) * wfc_ref[...].astype(jnp.float32)
    o_ref[...] = jnp.sum(prod, axis=-1, keepdims=True)        # (tm, 1) f32


# -----------------------------------------------------------------------------
# Pallas wrappers
# -----------------------------------------------------------------------------
def matmul_bias_lrelu(patches, w_mat, bias):
    """LeakyReLU(patches @ w_mat + bias). patches (M,K) bf16, w_mat (K,N) bf16,
    bias (N,) f32. Single-K-step tiled matmul, bf16 output."""
    M, K = patches.shape
    _, N = w_mat.shape
    tm = _pick_tm(M)
    kernel = functools.partial(_conv_bias_lrelu_kernel,
                               negative_slope=LEAKY_SLOPE)
    return pl.pallas_call(
        kernel,
        out_shape=jax.ShapeDtypeStruct((M, N), MXU_DTYPE),
        grid=(M // tm,),
        in_specs=[
            pl.BlockSpec((tm, K), lambda i: (i, 0)),
            pl.BlockSpec((K, N), lambda i: (0, 0)),
            pl.BlockSpec((1, N), lambda i: (0, 0)),
        ],
        out_specs=pl.BlockSpec((tm, N), lambda i: (i, 0)),
        compiler_params=pltpu.CompilerParams(
            dimension_semantics=("parallel",)),
    )(patches, w_mat, bias.reshape(1, N))


def matmul_bias_lrelu_fc(patches, w_mat, bias, wfc_rows):
    """Conv3 matmul + bias + LeakyReLU fused with the per-row part of the
    Linear(4096,1). Returns (M, 1) f32 per-row FC partial sums."""
    M, K = patches.shape
    _, N = w_mat.shape
    tm = _pick_tm(M)
    kernel = functools.partial(_conv_bias_lrelu_fc_kernel,
                               negative_slope=LEAKY_SLOPE)
    return pl.pallas_call(
        kernel,
        out_shape=jax.ShapeDtypeStruct((M, 1), jnp.float32),
        grid=(M // tm,),
        in_specs=[
            pl.BlockSpec((tm, K), lambda i: (i, 0)),
            pl.BlockSpec((K, N), lambda i: (0, 0)),
            pl.BlockSpec((1, N), lambda i: (0, 0)),
            pl.BlockSpec((tm, N), lambda i: (i, 0)),
        ],
        out_specs=pl.BlockSpec((tm, 1), lambda i: (i, 0)),
        compiler_params=pltpu.CompilerParams(
            dimension_semantics=("parallel",)),
    )(patches, w_mat, bias.reshape(1, N), wfc_rows)


# -----------------------------------------------------------------------------
# Layout helpers (plain-JAX wrapper work)
# -----------------------------------------------------------------------------
def _extract_patches_nhwc(x, kh=5, kw=5, stride=2, pad=2):
    """x: (B,H,W,C) -> (B*Ho*Wo, kh*kw*C); feature order (kh, kw, C),
    lane-contiguous in C (channels-last)."""
    # TODO(synk): move patch extraction into the kernel (input block in VMEM,
    # strided pl.ds row reads) to avoid materialising the patch matrix in HBM.
    B, H, W, C = x.shape
    xp = jnp.pad(x, ((0, 0), (pad, pad), (pad, pad), (0, 0)))
    Ho = (H + 2 * pad - kh) // stride + 1
    Wo = (W + 2 * pad - kw) // stride + 1
    cols = []
    for i in range(kh):
        for j in range(kw):
            cols.append(xp[:, i:i + stride * Ho:stride,
                              j:j + stride * Wo:stride, :])    # (B, Ho, Wo, C)
    patches = jnp.stack(cols, axis=3)                          # (B,Ho,Wo,25,C)
    return patches.reshape(B * Ho * Wo, kh * kw * C), Ho, Wo


def _conv_weight_matrix(w, *, in_pad=None, out_pad=None, k_pad=None):
    """PyTorch (out,in,kh,kw) weight -> (kh*kw*in[_pad], out[_pad]) bf16 matrix
    matching the channels-last (kh, kw, C) patch order."""
    out_ch, in_ch, kh, kw = w.shape
    wt = jnp.transpose(w, (2, 3, 1, 0))                        # (kh, kw, in, out)
    if in_pad is not None and in_pad > in_ch:
        wt = jnp.pad(wt, ((0, 0), (0, 0), (0, in_pad - in_ch), (0, 0)))
    if out_pad is not None and out_pad > out_ch:
        wt = jnp.pad(wt, ((0, 0), (0, 0), (0, 0), (0, out_pad - out_ch)))
    mat = wt.reshape(-1, wt.shape[-1])
    if k_pad is not None and k_pad > mat.shape[0]:
        mat = jnp.pad(mat, ((0, k_pad - mat.shape[0]), (0, 0)))
    return mat.astype(MXU_DTYPE)


# -----------------------------------------------------------------------------
# Full forward pass
# -----------------------------------------------------------------------------
def discriminator_svhn_forward(x, params):
    """Pallas forward pass matching DiscriminatorSVHN.forward (NCHW f32 input)."""
    # TODO(synk): the whole net (3 convs + FC, ~2 MiB bf16 weights) fits in
    # VMEM and could be fused into a single pallas_call over batch tiles.
    B = x.shape[0]
    CPAD = 128                                  # conv1 output-channel padding

    # ---- parameter layout prep (cheap, done once per call) -----------------
    w1 = _conv_weight_matrix(params["w1"], out_pad=CPAD, k_pad=128)   # (128,128)
    b1 = jnp.pad(params["b1"], (0, CPAD - params["b1"].shape[0])).astype(jnp.float32)
    w2 = _conv_weight_matrix(params["w2"], in_pad=CPAD)               # (3200,128)
    b2 = params["b2"].astype(jnp.float32)
    w3 = _conv_weight_matrix(params["w3"])                            # (3200,256)
    b3 = params["b3"].astype(jnp.float32)
    # fc weight reordered from NCHW flatten (c,h,w) to NHWC flatten (h,w,c)
    # and matched row-for-row to the conv3 output rows (one row per (b,h,w)).
    wfc_hw = params["wfc"].reshape(256, 4, 4).transpose(1, 2, 0).reshape(16, 256)
    wfc_rows = jnp.tile(wfc_hw, (B, 1)).astype(MXU_DTYPE)             # (B*16,256)

    # ---- conv1: 3 -> 64 (stored zero-padded to 128 ch), 32x32 -> 16x16 -----
    x_nhwc = jnp.transpose(x, (0, 2, 3, 1)).astype(MXU_DTYPE)
    p1, Ho, Wo = _extract_patches_nhwc(x_nhwc)                        # (B*256, 75)
    p1 = jnp.pad(p1, ((0, 0), (0, 128 - p1.shape[1])))                # K 75 -> 128
    y1 = matmul_bias_lrelu(p1, w1, b1).reshape(B, Ho, Wo, CPAD)

    # ---- conv2: 64(->128 padded) -> 128, 16x16 -> 8x8 ----------------------
    p2, Ho, Wo = _extract_patches_nhwc(y1)                            # (B*64, 3200)
    y2 = matmul_bias_lrelu(p2, w2, b2).reshape(B, Ho, Wo, 128)

    # ---- conv3: 128 -> 256, 8x8 -> 4x4, fused Linear(4096,1) epilogue ------
    p3, Ho, Wo = _extract_patches_nhwc(y2)                            # (B*16, 3200)
    fc_partials = matmul_bias_lrelu_fc(p3, w3, b3, wfc_rows)          # (B*16, 1)

    # final per-image 16-value reduction + fc bias (trivial wrapper work)
    logits = fc_partials.reshape(B, Ho * Wo).sum(axis=1, keepdims=True)
    return logits + params["bfc"].astype(jnp.float32)                 # (B, 1)


# -----------------------------------------------------------------------------
# Pure-JAX reference mirroring the PyTorch module (same bf16 MXU-operand
# rounding as the Pallas path, f32 accumulation) for a tight comparison.
# -----------------------------------------------------------------------------
def _reference_forward(x, params):
    def conv_lrelu(v, w, b):
        y = jax.lax.conv_general_dilated(
            v.astype(MXU_DTYPE), w.astype(MXU_DTYPE),
            window_strides=(2, 2), padding=((2, 2), (2, 2)),
            dimension_numbers=("NCHW", "OIHW", "NCHW"),
            preferred_element_type=jnp.float32)
        y = y + b[None, :, None, None]
        return jnp.where(y > 0, y, LEAKY_SLOPE * y).astype(MXU_DTYPE)

    y = conv_lrelu(x, params["w1"], params["b1"])
    y = conv_lrelu(y, params["w2"], params["b2"])
    y = conv_lrelu(y, params["w3"], params["b3"])
    flat = y.reshape(y.shape[0], -1)                                  # NCHW flatten
    return jnp.dot(flat, params["wfc"].astype(MXU_DTYPE).T,
                   preferred_element_type=jnp.float32) + params["bfc"]


if __name__ == "__main__":
    key = jax.random.PRNGKey(0)
    ks = jax.random.split(key, 9)
    B, n_channel = 2, 3                 # SVHN: 3 x 32 x 32 -> 256*4*4 = 4096
    x = jax.random.normal(ks[0], (B, n_channel, 32, 32), jnp.float32)
    params = {
        "w1": jax.random.normal(ks[1], (64, n_channel, 5, 5), jnp.float32) * 0.05,
        "b1": jax.random.normal(ks[2], (64,), jnp.float32) * 0.05,
        "w2": jax.random.normal(ks[3], (128, 64, 5, 5), jnp.float32) * 0.02,
        "b2": jax.random.normal(ks[4], (128,), jnp.float32) * 0.05,
        "w3": jax.random.normal(ks[5], (256, 128, 5, 5), jnp.float32) * 0.02,
        "b3": jax.random.normal(ks[6], (256,), jnp.float32) * 0.05,
        "wfc": jax.random.normal(ks[7], (1, 4096), jnp.float32) * 0.02,
        "bfc": jax.random.normal(ks[8], (1,), jnp.float32) * 0.05,
    }

    fwd = jax.jit(discriminator_svhn_forward)
    out = jax.block_until_ready(fwd(x, params))

    ref = jax.block_until_ready(_reference_forward(x, params))
    assert out.shape == (B, 1), out.shape
    max_diff = float(jnp.max(jnp.abs(out - ref)))
    assert jnp.allclose(out, ref, atol=2e-2, rtol=2e-2), (
        f"mismatch: max abs diff {max_diff}")

    print("KERNEL_OK")
</pallas_src>

<mosaic_0001>
module attributes {stable_mosaic.version = 11 : i64} {
  func.func @_conv_bias_lrelu_kernel(%arg0: i32, %arg1: memref<256x128xbf16, #tpu.memory_space<vmem>>, %arg2: memref<128x128xbf16, #tpu.memory_space<vmem>>, %arg3: memref<1x128xf32, #tpu.memory_space<vmem>>, %arg4: memref<256x128xbf16, #tpu.memory_space<vmem>>) attributes {dimension_semantics = [#tpu.dimension_semantics<parallel>], iteration_bounds = array<i64: 2>, scalar_prefetch = 0 : i64, scratch_operands = 0 : i64, tpu.core_type = #tpu.core_type<tc>, window_params = [{transform_indices = @transform_0, window_bounds = array<i64: 256, 128>}, {pipeline_mode = #tpu.pipeline_mode<synchronous>, transform_indices = @transform_1, window_bounds = array<i64: 128, 128>}, {pipeline_mode = #tpu.pipeline_mode<synchronous>, transform_indices = @transform_2, window_bounds = array<i64: 1, 128>}, {transform_indices = @transform_3, window_bounds = array<i64: 256, 128>}]} {
    %c0 = arith.constant 0 : index
    %c0_0 = arith.constant 0 : index
    %0 = vector.load %arg1[%c0, %c0_0] : memref<256x128xbf16, #tpu.memory_space<vmem>>, vector<256x128xbf16>
    %c0_1 = arith.constant 0 : index
    %c0_2 = arith.constant 0 : index
    %1 = vector.load %arg2[%c0_1, %c0_2] : memref<128x128xbf16, #tpu.memory_space<vmem>>, vector<128x128xbf16>
    %cst = arith.constant dense<0.000000e+00> : vector<256x128xf32>
    %2 = tpu.matmul %0, %1, %cst {dimension_numbers = #tpu.dot_dimension_numbers<[1], [0], [0], [1], [0, 0, 1, 1], [], []>} : vector<256x128xbf16>, vector<128x128xbf16>, vector<256x128xf32> -> vector<256x128xf32>
    %c0_3 = arith.constant 0 : index
    %c0_4 = arith.constant 0 : index
    %3 = vector.load %arg3[%c0_3, %c0_4] : memref<1x128xf32, #tpu.memory_space<vmem>>, vector<1x128xf32>
    %4 = vector.broadcast %3 : vector<1x128xf32> to vector<256x128xf32>
    %5 = arith.addf %2, %4 : vector<256x128xf32>
    %cst_5 = arith.constant 0.000000e+00 : f32
    %6 = vector.broadcast %cst_5 : f32 to vector<256x128xf32>
    %7 = arith.cmpf ogt, %5, %6 : vector<256x128xf32>
    %cst_6 = arith.constant 0.00999999977 : f32
    %8 = vector.broadcast %cst_6 : f32 to vector<256x128xf32>
    %9 = arith.mulf %8, %5 : vector<256x128xf32>
    %10 = arith.select %7, %5, %9 : vector<256x128xi1>, vector<256x128xf32>
    %11 = arith.truncf %10 : vector<256x128xf32> to vector<256x128xbf16>
    %c0_7 = arith.constant 0 : index
    %c0_8 = arith.constant 0 : index
    %12 = vector.load %arg4[%c0_7, %c0_8] : memref<256x128xbf16, #tpu.memory_space<vmem>>, vector<256x128xbf16>
    tpu.vector_store %arg4[%c0_7, %c0_8], %11 {strides = array<i32>} : memref<256x128xbf16, #tpu.memory_space<vmem>>, vector<256x128xbf16>,
    return
  }
  func.func @transform_0(%arg0: i32) -> (i32, i32) {
    %c0_i32 = arith.constant 0 : i32
    %c0_i32_0 = arith.constant 0 : i32
    return %arg0, %c0_i32 : i32, i32
  }
  func.func @transform_1(%arg0: i32) -> (i32, i32) {
    %c0_i32 = arith.constant 0 : i32
    %c0_i32_0 = arith.constant 0 : i32
    %c0_i32_1 = arith.constant 0 : i32
    return %c0_i32, %c0_i32_0 : i32, i32
  }
  func.func @transform_2(%arg0: i32) -> (i32, i32) {
    %c0_i32 = arith.constant 0 : i32
    %c0_i32_0 = arith.constant 0 : i32
    %c0_i32_1 = arith.constant 0 : i32
    return %c0_i32, %c0_i32_0 : i32, i32
  }
  func.func @transform_3(%arg0: i32) -> (i32, i32) {
    %c0_i32 = arith.constant 0 : i32
    %c0_i32_0 = arith.constant 0 : i32
    return %arg0, %c0_i32 : i32, i32
  }
}

module attributes {stable_mosaic.version = 11 : i64} {
  func.func @_conv_bias_lrelu_kernel(%arg0: i32, %arg1: memref<64x3200xbf16, #tpu.memory_space<vmem>>, %arg2: memref<3200x128xbf16, #tpu.memory_space<vmem>>, %arg3: memref<1x128xf32, #tpu.memory_space<vmem>>, %arg4: memref<64x128xbf16, #tpu.memory_space<vmem>>) attributes {dimension_semantics = [#tpu.dimension_semantics<parallel>], iteration_bounds = array<i64: 2>, scalar_prefetch = 0 : i64, scratch_operands = 0 : i64, tpu.core_type = #tpu.core_type<tc>, window_params = [{transform_indices = @transform_0, window_bounds = array<i64: 64, 3200>}, {pipeline_mode = #tpu.pipeline_mode<synchronous>, transform_indices = @transform_1, window_bounds = array<i64: 3200, 128>}, {pipeline_mode = #tpu.pipeline_mode<synchronous>, transform_indices = @transform_2, window_bounds = array<i64: 1, 128>}, {transform_indices = @transform_3, window_bounds = array<i64: 64, 128>}]} {
    %c0 = arith.constant 0 : index
    %c0_0 = arith.constant 0 : index
    %0 = vector.load %arg1[%c0, %c0_0] : memref<64x3200xbf16, #tpu.memory_space<vmem>>, vector<64x3200xbf16>
    %c0_1 = arith.constant 0 : index
    %c0_2 = arith.constant 0 : index
    %1 = vector.load %arg2[%c0_1, %c0_2] : memref<3200x128xbf16, #tpu.memory_space<vmem>>, vector<3200x128xbf16>
    %cst = arith.constant dense<0.000000e+00> : vector<64x128xf32>
    %2 = tpu.matmul %0, %1, %cst {dimension_numbers = #tpu.dot_dimension_numbers<[1], [0], [0], [1], [0, 0, 1, 1], [], []>} : vector<64x3200xbf16>, vector<3200x128xbf16>, vector<64x128xf32> -> vector<64x128xf32>
    %c0_3 = arith.constant 0 : index
    %c0_4 = arith.constant 0 : index
    %3 = vector.load %arg3[%c0_3, %c0_4] : memref<1x128xf32, #tpu.memory_space<vmem>>, vector<1x128xf32>
    %4 = vector.broadcast %3 : vector<1x128xf32> to vector<64x128xf32>
    %5 = arith.addf %2, %4 : vector<64x128xf32>
    %cst_5 = arith.constant 0.000000e+00 : f32
    %6 = vector.broadcast %cst_5 : f32 to vector<64x128xf32>
    %7 = arith.cmpf ogt, %5, %6 : vector<64x128xf32>
    %cst_6 = arith.constant 0.00999999977 : f32
    %8 = vector.broadcast %cst_6 : f32 to vector<64x128xf32>
    %9 = arith.mulf %8, %5 : vector<64x128xf32>
    %10 = arith.select %7, %5, %9 : vector<64x128xi1>, vector<64x128xf32>
    %11 = arith.truncf %10 : vector<64x128xf32> to vector<64x128xbf16>
    %c0_7 = arith.constant 0 : index
    %c0_8 = arith.constant 0 : index
    %12 = vector.load %arg4[%c0_7, %c0_8] : memref<64x128xbf16, #tpu.memory_space<vmem>>, vector<64x128xbf16>
    tpu.vector_store %arg4[%c0_7, %c0_8], %11 {strides = array<i32>} : memref<64x128xbf16, #tpu.memory_space<vmem>>, vector<64x128xbf16>,
    return
  }
  func.func @transform_0(%arg0: i32) -> (i32, i32) {
    %c0_i32 = arith.constant 0 : i32
    %c0_i32_0 = arith.constant 0 : i32
    return %arg0, %c0_i32 : i32, i32
  }
  func.func @transform_1(%arg0: i32) -> (i32, i32) {
    %c0_i32 = arith.constant 0 : i32
    %c0_i32_0 = arith.constant 0 : i32
    %c0_i32_1 = arith.constant 0 : i32
    return %c0_i32, %c0_i32_0 : i32, i32
  }
  func.func @transform_2(%arg0: i32) -> (i32, i32) {
    %c0_i32 = arith.constant 0 : i32
    %c0_i32_0 = arith.constant 0 : i32
    %c0_i32_1 = arith.constant 0 : i32
    return %c0_i32, %c0_i32_0 : i32, i32
  }
  func.func @transform_3(%arg0: i32) -> (i32, i32) {
    %c0_i32 = arith.constant 0 : i32
    %c0_i32_0 = arith.constant 0 : i32
    return %arg0, %c0_i32 : i32, i32
  }
}

module attributes {stable_mosaic.version = 11 : i64} {
  func.func @_conv_bias_lrelu_fc_kernel(%arg0: i32, %arg1: memref<16x3200xbf16, #tpu.memory_space<vmem>>, %arg2: memref<3200x256xbf16, #tpu.memory_space<vmem>>, %arg3: memref<1x256xf32, #tpu.memory_space<vmem>>, %arg4: memref<16x256xbf16, #tpu.memory_space<vmem>>, %arg5: memref<16x1xf32, #tpu.memory_space<vmem>>) attributes {dimension_semantics = [#tpu.dimension_semantics<parallel>], iteration_bounds = array<i64: 2>, scalar_prefetch = 0 : i64, scratch_operands = 0 : i64, tpu.core_type = #tpu.core_type<tc>, window_params = [{transform_indices = @transform_0, window_bounds = array<i64: 16, 3200>}, {pipeline_mode = #tpu.pipeline_mode<synchronous>, transform_indices = @transform_1, window_bounds = array<i64: 3200, 256>}, {pipeline_mode = #tpu.pipeline_mode<synchronous>, transform_indices = @transform_2, window_bounds = array<i64: 1, 256>}, {transform_indices = @transform_3, window_bounds = array<i64: 16, 256>}, {transform_indices = @transform_4, window_bounds = array<i64: 16, 1>}]} {
    %c0 = arith.constant 0 : index
    %c0_0 = arith.constant 0 : index
    %0 = vector.load %arg1[%c0, %c0_0] : memref<16x3200xbf16, #tpu.memory_space<vmem>>, vector<16x3200xbf16>
    %c0_1 = arith.constant 0 : index
    %c0_2 = arith.constant 0 : index
    %1 = vector.load %arg2[%c0_1, %c0_2] : memref<3200x256xbf16, #tpu.memory_space<vmem>>, vector<3200x256xbf16>
    %cst = arith.constant dense<0.000000e+00> : vector<16x256xf32>
    %2 = tpu.matmul %0, %1, %cst {dimension_numbers = #tpu.dot_dimension_numbers<[1], [0], [0], [1], [0, 0, 1, 1], [], []>} : vector<16x3200xbf16>, vector<3200x256xbf16>, vector<16x256xf32> -> vector<16x256xf32>
    %c0_3 = arith.constant 0 : index
    %c0_4 = arith.constant 0 : index
    %3 = vector.load %arg3[%c0_3, %c0_4] : memref<1x256xf32, #tpu.memory_space<vmem>>, vector<1x256xf32>
    %4 = vector.broadcast %3 : vector<1x256xf32> to vector<16x256xf32>
    %5 = arith.addf %2, %4 : vector<16x256xf32>
    %cst_5 = arith.constant 0.000000e+00 : f32
    %6 = vector.broadcast %cst_5 : f32 to vector<16x256xf32>
    %7 = arith.cmpf ogt, %5, %6 : vector<16x256xf32>
    %cst_6 = arith.constant 0.00999999977 : f32
    %8 = vector.broadcast %cst_6 : f32 to vector<16x256xf32>
    %9 = arith.mulf %8, %5 : vector<16x256xf32>
    %10 = arith.select %7, %5, %9 : vector<16x256xi1>, vector<16x256xf32>
    %11 = arith.truncf %10 : vector<16x256xf32> to vector<16x256xbf16>
    %12 = arith.extf %11 : vector<16x256xbf16> to vector<16x256xf32>
    %c0_7 = arith.constant 0 : index
    %c0_8 = arith.constant 0 : index
    %13 = vector.load %arg4[%c0_7, %c0_8] : memref<16x256xbf16, #tpu.memory_space<vmem>>, vector<16x256xbf16>
    %14 = arith.extf %13 : vector<16x256xbf16> to vector<16x256xf32>
    %15 = arith.mulf %12, %14 : vector<16x256xf32>
    %cst_9 = arith.constant dense<0.000000e+00> : vector<16xf32>
    %16 = vector.multi_reduction <add>, %15, %cst_9 [1] : vector<16x256xf32> to vector<16xf32>
    %17 = vector.shape_cast %16 : vector<16xf32> to vector<16x1xf32>
    %c0_10 = arith.constant 0 : index
    %c0_11 = arith.constant 0 : index
    %18 = vector.load %arg5[%c0_10, %c0_11] : memref<16x1xf32, #tpu.memory_space<vmem>>, vector<16x1xf32>
    tpu.vector_store %arg5[%c0_10, %c0_11], %17 {strides = array<i32>} : memref<16x1xf32, #tpu.memory_space<vmem>>, vector<16x1xf32>,
    return
  }
  func.func @transform_0(%arg0: i32) -> (i32, i32) {
    %c0_i32 = arith.constant 0 : i32
    %c0_i32_0 = arith.constant 0 : i32
    return %arg0, %c0_i32 : i32, i32
  }
  func.func @transform_1(%arg0: i32) -> (i32, i32) {
    %c0_i32 = arith.constant 0 : i32
    %c0_i32_0 = arith.constant 0 : i32
    %c0_i32_1 = arith.constant 0 : i32
    return %c0_i32, %c0_i32_0 : i32, i32
  }
  func.func @transform_2(%arg0: i32) -> (i32, i32) {
    %c0_i32 = arith.constant 0 : i32
    %c0_i32_0 = arith.constant 0 : i32
    %c0_i32_1 = arith.constant 0 : i32
    return %c0_i32, %c0_i32_0 : i32, i32
  }
  func.func @transform_3(%arg0: i32) -> (i32, i32) {
    %c0_i32 = arith.constant 0 : i32
    %c0_i32_0 = arith.constant 0 : i32
    return %arg0, %c0_i32 : i32, i32
  }
  func.func @transform_4(%arg0: i32) -> (i32, i32) {
    %c0_i32 = arith.constant 0 : i32
    %c0_i32_0 = arith.constant 0 : i32
    return %arg0, %c0_i32 : i32, i32
  }
}

</mosaic_0001>

<bundles_post_ra>
// kernel: discriminator_svhn_forward.3
= control target key start
LH: loop header
LB: loop body
LE: loop exit
PB: predicated region body
PF: predicated region fallthrough
CT: control target
= control target key end

     0   :  { %s1190_s12 = smov 0   ;;  %s1315_s0 = inlined_call_operand.vmem [shape: bf16[512,128], index: 0, kind: input, shape index: {}]   ;;  %s1316_s1 = inlined_call_operand.vmem [shape: bf16[128,128], index: 1, kind: input, shape index: {}]   ;;  %s1317_s2 = inlined_call_operand.vmem [shape: f32[1,128], index: 2, kind: input, shape index: {}]   ;;  %s1318_s3 = inlined_call_operand.vmem [shape: bf16[512,128], index: 3, kind: output, shape index: {}]  }
   0x1 LB: > { %s847_s13 = sadd.s32 4294967295, %s1168_s12   ;;  %p851_p0 = scmp.ge.s32.totalorder %s1168_s12, 1  ;;  %s1168_s12 = sphi %s1190_s12, %s13_s12  }
   0x2   : > { %p138_p1 = scmp.lt.s32.totalorder %s1168_s12, 3 }
   0x4   : > { %p139_p2 = pnand %p851_p0, %p138_p1 }
   0x5   : > { %s852_s16 = sshll.u32 (!%p139_p2), %s847_s13, 5 }
   0x6   : > { %142 = sbr.rel (%p139_p2) target bundleno = 279 (0x117), region = 32  ;;  %p163_p3 = scmp.lt.s32.totalorder (!%p139_p2), %s852_s16, 63 }
   0xb   : > { %v1138_v0 = vld [vmem:[%s1316_s1 + $0x38] sm:$0xff]   ;;  %v1139_v1 = vld [vmem:[%s1316_s1 + $0x30] sm:$0xff]   ;;  %s1320_s16 = smov (!%p163_p3, %s852_s16), 63  ;;  %v1140_v2 = vld [vmem:[%s1316_s1 + $0x28] sm:$0xff]  }
   0xc   : > { %1066 = vmatprep.subr.bf16.mxu0 %v1138_v0  ;;  %1114 = vmatprep.subr.bf16.mxu1 %v1138_v0  ;;  %s853_s21 = sshll.u32 %s1320_s16, 2  ;;  %v1141_v3 = vld [vmem:[%s1316_s1 + $0x20] sm:$0xff]   ;;  %v1142_v6 = vld [vmem:[%s1316_s1 + $0x18] sm:$0xff]   ;;  %v1143_v7 = vld [vmem:[%s1316_s1 + $0x10] sm:$0xff]  }
   0xd   : > { %1067 = vmatpush3.bf16.msra.mxu0 %v1138_v0  ;;  %1122 = vmatpush3.bf16.msra.mxu1 %v1138_v0  ;;  %s1215_s24 = scalar_lea.vmem %s1315_s0, %s853_s21  ;;  %v1144_v8 = vld [vmem:[%s1316_s1 + $0x8] sm:$0xff]   ;;  %v1145_v9 = vld [vmem:[%s1316_s1] sm:$0xff]   ;;  %s1266_s13 = scalar_lea.vmem %s1318_s3, %s853_s21 }
   0xe   : > { %1068 = vmatprep.subr.bf16.mxu0 %v1139_v1  ;;  %1115 = vmatprep.subr.bf16.mxu1 %v1139_v1  ;;  %v1146_v4 = vld [vmem:[%s1215_s24] sm:$0xff]   ;;  %v1148_v10 = vld [vmem:[%s1215_s24 + $0x8] sm:$0xff]   ;;  %v1150_v12 = vld [vmem:[%s1215_s24 + $0x10] sm:$0xff]  }
   0xf   : > { %v1147_v5 = vld [vmem:[%s1215_s24 + $0x40] sm:$0xff]   ;;  %1082 = vmatprep.mubr.bf16.mxu0 %v1146_v4  ;;  %v1149_v11 = vld [vmem:[%s1215_s24 + $0x48] sm:$0xff]   ;;  %v1151_v13 = vld [vmem:[%s1215_s24 + $0x50] sm:$0xff]  }
  0x10   : > { %1098 = vmatprep.mubr.bf16.mxu1 %v1147_v5  ;;  %v1152_v14 = vld [vmem:[%s1215_s24 + $0x18] sm:$0xff]   ;;  %v1154_v16 = vld [vmem:[%s1215_s24 + $0x20] sm:$0xff]   ;;  %v1156_v18 = vld [vmem:[%s1215_s24 + $0x28] sm:$0xff]  }
  0x11   : > { %1069 = vmatpush3.bf16.msra.mxu0 %v1139_v1  ;;  %1123 = vmatpush3.bf16.msra.mxu1 %v1139_v1  ;;  %v1153_v15 = vld [vmem:[%s1215_s24 + $0x58] sm:$0xff]   ;;  %v1155_v17 = vld [vmem:[%s1215_s24 + $0x60] sm:$0xff]   ;;  %v1157_v19 = vld [vmem:[%s1215_s24 + $0x68] sm:$0xff]  }
  0x12   : > { %1070 = vmatprep.subr.bf16.mxu0 %v1140_v2  ;;  %1116 = vmatprep.subr.bf16.mxu1 %v1140_v2  ;;  %v1158_v20 = vld [vmem:[%s1215_s24 + $0x30] sm:$0xff]   ;;  %v1160_v22 = vld [vmem:[%s1215_s24 + $0x38] sm:$0xff]   ;;  %v1251_v24 = vld [vmem:[%s1317_s2] ss:$0 sm:$0xff] }
  0x13   : > { %v1159_v21 = vld [vmem:[%s1215_s24 + $0x70] sm:$0xff]   ;;  %v1161_v23 = vld [vmem:[%s1215_s24 + $0x78] sm:$0xff]  }
  0x15   : > { %1071 = vmatpush3.bf16.msra.mxu0 %v1140_v2  ;;  %1124 = vmatpush3.bf16.msra.mxu1 %v1140_v2 }
  0x16   : > { %1072 = vmatprep.subr.bf16.mxu0 %v1141_v3  ;;  %1117 = vmatprep.subr.bf16.mxu1 %v1141_v3 }
  0x19   : > { %1073 = vmatpush3.bf16.msra.mxu0 %v1141_v3  ;;  %1125 = vmatpush3.bf16.msra.mxu1 %v1141_v3 }
  0x1a   : > { %1074 = vmatprep.subr.bf16.mxu0 %v1142_v6  ;;  %1118 = vmatprep.subr.bf16.mxu1 %v1142_v6 }
  0x1d   : > { %1075 = vmatpush3.bf16.msra.mxu0 %v1142_v6  ;;  %1126 = vmatpush3.bf16.msra.mxu1 %v1142_v6 }
  0x1e   : > { %1076 = vmatprep.subr.bf16.mxu0 %v1143_v7  ;;  %1119 = vmatprep.subr.bf16.mxu1 %v1143_v7 }
  0x21   : > { %1077 = vmatpush3.bf16.msra.mxu0 %v1143_v7  ;;  %1127 = vmatpush3.bf16.msra.mxu1 %v1143_v7 }
  0x22   : > { %1078 = vmatprep.subr.bf16.mxu0 %v1144_v8  ;;  %1120 = vmatprep.subr.bf16.mxu1 %v1144_v8 }
  0x25   : > { %1079 = vmatpush3.bf16.msra.mxu0 %v1144_v8  ;;  %1128 = vmatpush3.bf16.msra.mxu1 %v1144_v8 }
  0x26   : > { %1080 = vmatprep.subr.bf16.mxu0 %v1145_v9  ;;  %1121 = vmatprep.subr.bf16.mxu1 %v1145_v9 }
  0x29   : > { %1081 = vmatpush3.bf16.msra.mxu0 %v1145_v9  ;;  %1129 = vmatpush3.bf16.msra.mxu1 %v1145_v9 }
  0x2c   : > { %1083 = vmatmul.mubr.bf16.vlgmr.msra.gmra.mxu0 %v1148_v10  ;;  %1099 = vmatmul.mubr.bf16.vlgmr.msra.gmra.mxu1 %v1149_v11 }
  0x2d   : > { %1086 = vmatprep.mubr.bf16.mxu0 %v1150_v12  ;;  %1102 = vmatprep.mubr.bf16.mxu1 %v1151_v13 }
  0x34   : > { %1087 = vmatmul.mubr.bf16.gmra.mxu0 %v1152_v14  ;;  %1103 = vmatmul.mubr.bf16.gmra.mxu1 %v1153_v15 }
  0x35   : > { %1090 = vmatprep.mubr.bf16.mxu0 %v1154_v16  ;;  %1106 = vmatprep.mubr.bf16.mxu1 %v1155_v17 }
  0x3c   : > { %1091 = vmatmul.mubr.bf16.gmra.mxu0 %v1156_v18  ;;  %1107 = vmatmul.mubr.bf16.gmra.mxu1 %v1157_v19 }
  0x3d   : > { %1094 = vmatprep.mubr.bf16.mxu0 %v1158_v20  ;;  %1110 = vmatprep.mubr.bf16.mxu1 %v1159_v21 }
  0x44   : > { %1095 = vmatmul.mubr.bf16.gmra.mxu0 %v1160_v22  ;;  %1111 = vmatmul.mubr.bf16.gmra.mxu1 %v1161_v23 }
  0xec   : > { %v1084_v25 = vpop.f32.mrf.mxu0  ;;  %v1100_v26 = vpop.f32.mrf.mxu1 }
  0xed   : > { %v417_v27 = vadd.f32 %v1084_v25, %v1251_v24  ;;  %v481_v28 = vadd.f32 %v1100_v26, %v1251_v24 }
  0xee   : > { %v408_v29 = vpop.f32.mrf.mxu0  ;;  %v472_v30 = vpop.f32.mrf.mxu1 }
  0xef   : > { %vm537_vm0 = vcmp.gt.f32.partialorder %v417_v27, 0.0  ;;  %v569_v31 = vmul.f32 0.01, %v417_v27  ;;  %vm553_vm1 = vcmp.gt.f32.partialorder %v481_v28, 0.0  ;;  %v585_v32 = vmul.f32 0.01, %v481_v28 }
  0xf0   : > { %v409_v33 = vadd.f32 %v1251_v24, %v408_v29  ;;  %v473_v34 = vadd.f32 %v1251_v24, %v472_v30  ;;  %v1085_v35 = vpop.f32.mrf.mxu0  ;;  %v1101_v36 = vpop.f32.mrf.mxu1 }
  0xf1   : > { %v601_v37 = vsel %vm537_vm0, %v417_v27, %v569_v31  ;;  %v420_v38 = vadd.f32 %v1085_v35, %v1251_v24  ;;  %v484_v39 = vadd.f32 %v1101_v36, %v1251_v24  ;;  %v617_v40 = vsel %vm553_vm1, %v481_v28, %v585_v32 }
  0xf2   : > { %vm535_vm2 = vcmp.gt.f32.partialorder %v409_v33, 0.0  ;;  %v567_v41 = vmul.f32 0.01, %v409_v33  ;;  %vm551_vm3 = vcmp.gt.f32.partialorder %v473_v34, 0.0  ;;  %v411_v42 = vpop.f32.mrf.mxu0  ;;  %v475_v43 = vpop.f32.mrf.mxu1  ;;  %v583_v47 = vmul.f32 0.01, %v473_v34 }
  0xf3   : > { %vm538_vm4 = vcmp.gt.f32.partialorder %v420_v38, 0.0  ;;  %v570_v44 = vmul.f32 0.01, %v420_v38  ;;  %vm554_vm5 = vcmp.gt.f32.partialorder %v484_v39, 0.0  ;;  %v586_v45 = vmul.f32 0.01, %v484_v39 }
  0xf4   : > { %v599_v46 = vsel %vm535_vm2, %v409_v33, %v567_v41  ;;  %v412_v48 = vadd.f32 %v1251_v24, %v411_v42  ;;  %v476_v49 = vadd.f32 %v1251_v24, %v475_v43  ;;  %v1088_v50 = vpop.f32.mrf.mxu0  ;;  %v1104_v51 = vpop.f32.mrf.mxu1  ;;  %v615_v63 = vsel %vm551_vm3, %v473_v34, %v583_v47 }
  0xf5   : > { %v602_v52 = vsel %vm538_vm4, %v420_v38, %v570_v44  ;;  %v618_v53 = vsel %vm554_vm5, %v484_v39, %v586_v45  ;;  %v433_v54 = vadd.f32 %v1088_v50, %v1251_v24  ;;  %v497_v55 = vadd.f32 %v1104_v51, %v1251_v24 }
  0xf6   : > { %v955_v56 = vpack.c.bf16 %v602_v52, %v601_v37  ;;  %v995_v57 = vpack.c.bf16 %v618_v53, %v617_v40  ;;  %vm536_vm6 = vcmp.gt.f32.partialorder %v412_v48, 0.0  ;;  %v568_v58 = vmul.f32 0.01, %v412_v48  ;;  %v424_v59 = vpop.f32.mrf.mxu0  ;;  %v488_v60 = vpop.f32.mrf.mxu1 }
  0xf7   : > { %vm552_vm7 = vcmp.gt.f32.partialorder %v476_v49, 0.0  ;;  %v584_v61 = vmul.f32 0.01, %v476_v49  ;;  %vm541_vm8 = vcmp.gt.f32.partialorder %v433_v54, 0.0  ;;  %v573_v62 = vmul.f32 0.01, %v433_v54 }
  0xf8   : > { %1027 = vst [vmem:[%s1266_s13 + $0x8] sm:$0xff] %v955_v56   ;;  %1035 = vst [vmem:[%s1266_s13 + $0x48] sm:$0xff] %v995_v57   ;;  %v600_v0 = vsel %vm536_vm6, %v412_v48, %v568_v58  ;;  %v589_v1 = vmul.f32 0.01, %v497_v55  ;;  %v425_v2 = vadd.f32 %v1251_v24, %v424_v59  ;;  %v1089_v3 = vpop.f32.mrf.mxu0  ;;  %v1105_v4 = vpop.f32.mrf.mxu1  ;;  %vm557_vm9 = vcmp.gt.f32.partialorder %v497_v55, 0.0 }
  0xf9   : > { %v950_v5 = vpack.c.bf16 %v600_v0, %v599_v46  ;;  %v616_v6 = vsel %vm552_vm7, %v476_v49, %v584_v61  ;;  %v489_v7 = vadd.f32 %v1251_v24, %v488_v60  ;;  %v605_v9 = vsel %vm541_vm8, %v433_v54, %v573_v62 }
  0xfa   : > { %v990_v8 = vpack.c.bf16 %v616_v6, %v615_v63  ;;  %vm539_vm10 = vcmp.gt.f32.partialorder %v425_v2, 0.0  ;;  %v571_v10 = vmul.f32 0.01, %v425_v2  ;;  %v427_v11 = vpop.f32.mrf.mxu0  ;;  %v491_v12 = vpop.f32.mrf.mxu1  ;;  %v436_v14 = vadd.f32 %v1089_v3, %v1251_v24 }
  0xfb   : > { %951 = vst [vmem:[%s1266_s13] sm:$0xff] %v950_v5   ;;  %vm555_vm11 = vcmp.gt.f32.partialorder %v489_v7, 0.0  ;;  %v587_v13 = vmul.f32 0.01, %v489_v7  ;;  %v500_v15 = vadd.f32 %v1105_v4, %v1251_v24  ;;  %v621_v16 = vsel %vm557_vm9, %v497_v55, %v589_v1 }
  0xfc   : > { %1034 = vst [vmem:[%s1266_s13 + $0x40] sm:$0xff] %v990_v8   ;;  %v603_v17 = vsel %vm539_vm10, %v425_v2, %v571_v10  ;;  %v428_v18 = vadd.f32 %v1251_v24, %v427_v11  ;;  %v492_v19 = vadd.f32 %v1251_v24, %v491_v12  ;;  %v1092_v20 = vpop.f32.mrf.mxu0  ;;  %v1108_v21 = vpop.f32.mrf.mxu1  ;;  %vm542_vm12 = vcmp.gt.f32.partialorder %v436_v14, 0.0 }
  0xfd   : > { %v619_v22 = vsel %vm555_vm11, %v489_v7, %v587_v13  ;;  %v574_v23 = vmul.f32 0.01, %v436_v14  ;;  %vm558_vm13 = vcmp.gt.f32.partialorder %v500_v15, 0.0  ;;  %v590_v25 = vmul.f32 0.01, %v500_v15 }
  0xfe   : > { %vm540_vm14 = vcmp.gt.f32.partialorder %v428_v18, 0.0  ;;  %v572_v26 = vmul.f32 0.01, %v428_v18  ;;  %vm556_vm15 = vcmp.gt.f32.partialorder %v492_v19, 0.0  ;;  %v440_v27 = vpop.f32.mrf.mxu0  ;;  %v504_v28 = vpop.f32.mrf.mxu1  ;;  %v588_v30 = vmul.f32 0.01, %v492_v19 }
  0xff   : > { %v606_v29 = vsel %vm542_vm12, %v436_v14, %v574_v23  ;;  %v449_v31 = vadd.f32 %v1092_v20, %v1251_v24  ;;  %v513_v32 = vadd.f32 %v1108_v21, %v1251_v24  ;;  %v622_v34 = vsel %vm558_vm13, %v500_v15, %v590_v25 }
 0x100   : > { %v965_v33 = vpack.c.bf16 %v606_v29, %v605_v9  ;;  %v604_v35 = vsel %vm540_vm14, %v428_v18, %v572_v26  ;;  %v441_v36 = vadd.f32 %v1251_v24, %v440_v27  ;;  %v1093_v37 = vpop.f32.mrf.mxu0  ;;  %v1109_v38 = vpop.f32.mrf.mxu1  ;;  %v1005_v39 = vpack.c.bf16 %v622_v34, %v621_v16 }
 0x101   : > { %v960_v40 = vpack.c.bf16 %v604_v35, %v603_v17  ;;  %v620_v41 = vsel %vm556_vm15, %v492_v19, %v588_v30  ;;  %vm545_vm0 = vcmp.gt.f32.partialorder %v449_v31, 0.0  ;;  %v577_v43 = vmul.f32 0.01, %v449_v31 }
 0x102   : > { %1029 = vst [vmem:[%s1266_s13 + $0x18] sm:$0xff] %v965_v33   ;;  %v1000_v42 = vpack.c.bf16 %v620_v41, %v619_v22  ;;  %vm561_vm1 = vcmp.gt.f32.partialorder %v513_v32, 0.0  ;;  %v593_v44 = vmul.f32 0.01, %v513_v32  ;;  %v443_v45 = vpop.f32.mrf.mxu0  ;;  %v507_v46 = vpop.f32.mrf.mxu1  ;;  %1037 = vst [vmem:[%s1266_s13 + $0x58] sm:$0xff] %v1005_v39   ;;  %vm543_vm2 = vcmp.gt.f32.partialorder %v441_v36, 0.0 }
 0x103   : > { %1028 = vst [vmem:[%s1266_s13 + $0x10] sm:$0xff] %v960_v40   ;;  %v575_v47 = vmul.f32 0.01, %v441_v36  ;;  %v505_v48 = vadd.f32 %v1251_v24, %v504_v28  ;;  %v452_v49 = vadd.f32 %v1093_v37, %v1251_v24  ;;  %v609_v50 = vsel %vm545_vm0, %v449_v31, %v577_v43 }
 0x104   : > { %1036 = vst [vmem:[%s1266_s13 + $0x50] sm:$0xff] %v1000_v42   ;;  %v516_v51 = vadd.f32 %v1109_v38, %v1251_v24  ;;  %v444_v52 = vadd.f32 %v1251_v24, %v443_v45  ;;  %v1096_v53 = vpop.f32.mrf.mxu0  ;;  %v1112_v54 = vpop.f32.mrf.mxu1  ;;  %v625_v55 = vsel %vm561_vm1, %v513_v32, %v593_v44  ;;  %v508_v63 = vadd.f32 %v1251_v24, %v507_v46 }
 0x105   : > { %v607_v56 = vsel %vm543_vm2, %v441_v36, %v575_v47  ;;  %vm559_vm3 = vcmp.gt.f32.partialorder %v505_v48, 0.0  ;;  %vm546_vm4 = vcmp.gt.f32.partialorder %v452_v49, 0.0  ;;  %v578_v57 = vmul.f32 0.01, %v452_v49 }
 0x106   : > { %vm562_vm5 = vcmp.gt.f32.partialorder %v516_v51, 0.0  ;;  %v594_v58 = vmul.f32 0.01, %v516_v51  ;;  %vm544_vm6 = vcmp.gt.f32.partialorder %v444_v52, 0.0  ;;  %v456_v59 = vpop.f32.mrf.mxu0  ;;  %v520_v60 = vpop.f32.mrf.mxu1  ;;  %v591_v61 = vmul.f32 0.01, %v505_v48 }
 0x107   : > { %v576_v62 = vmul.f32 0.01, %v444_v52  ;;  %v465_v0 = vadd.f32 %v1096_v53, %v1251_v24  ;;  %v610_v1 = vsel %vm546_vm4, %v452_v49, %v578_v57  ;;  %v529_v3 = vadd.f32 %v1112_v54, %v1251_v24 }
 0x108   : > { %v626_v2 = vsel %vm562_vm5, %v516_v51, %v594_v58  ;;  %v457_v4 = vadd.f32 %v1251_v24, %v456_v59  ;;  %v1097_v5 = vpop.f32.mrf.mxu0  ;;  %v1113_v6 = vpop.f32.mrf.mxu1  ;;  %v975_v7 = vpack.c.bf16 %v610_v1, %v609_v50  ;;  %vm560_vm7 = vcmp.gt.f32.partialorder %v508_v63, 0.0 }
 0x109   : > { %v1015_v8 = vpack.c.bf16 %v626_v2, %v625_v55  ;;  %v608_v9 = vsel %vm544_vm6, %v444_v52, %v576_v62  ;;  %v592_v11 = vmul.f32 0.01, %v508_v63  ;;  %v581_v12 = vmul.f32 0.01, %v465_v0 }
 0x10a   : > { %v970_v10 = vpack.c.bf16 %v608_v9, %v607_v56  ;;  %v623_v13 = vsel %vm559_vm3, %v505_v48, %v591_v61  ;;  %1031 = vst [vmem:[%s1266_s13 + $0x28] sm:$0xff] %v975_v7   ;;  %vm549_vm8 = vcmp.gt.f32.partialorder %v465_v0, 0.0  ;;  %v597_v15 = vmul.f32 0.01, %v529_v3  ;;  %v459_v18 = vpop.f32.mrf.mxu0  ;;  %v523_v19 = vpop.f32.mrf.mxu1 }
 0x10b   : > { %1039 = vst [vmem:[%s1266_s13 + $0x68] sm:$0xff] %v1015_v8   ;;  %v624_v14 = vsel %vm560_vm7, %v508_v63, %v592_v11  ;;  %v521_v16 = vadd.f32 %v1251_v24, %v520_v60  ;;  %v468_v17 = vadd.f32 %v1097_v5, %v1251_v24  ;;  %vm565_vm9 = vcmp.gt.f32.partialorder %v529_v3, 0.0 }
 0x10c   : > { %1030 = vst [vmem:[%s1266_s13 + $0x20] sm:$0xff] %v970_v10   ;;  %v1010_v20 = vpack.c.bf16 %v624_v14, %v623_v13  ;;  %vm547_vm10 = vcmp.gt.f32.partialorder %v457_v4, 0.0  ;;  %v532_v21 = vadd.f32 %v1113_v6, %v1251_v24  ;;  %v613_v22 = vsel %vm549_vm8, %v465_v0, %v581_v12 }
 0x10d   : > { %v579_v23 = vmul.f32 0.01, %v457_v4  ;;  %vm550_vm11 = vcmp.gt.f32.partialorder %v468_v17, 0.0  ;;  %v582_v25 = vmul.f32 0.01, %v468_v17  ;;  %v460_v27 = vadd.f32 %v1251_v24, %v459_v18 }
 0x10e   : > { %1038 = vst [vmem:[%s1266_s13 + $0x60] sm:$0xff] %v1010_v20   ;;  %vm566_vm12 = vcmp.gt.f32.partialorder %v532_v21, 0.0  ;;  %v598_v26 = vmul.f32 0.01, %v532_v21  ;;  %v524_v28 = vadd.f32 %v1251_v24, %v523_v19  ;;  %v629_v29 = vsel %vm565_vm9, %v529_v3, %v597_v15 }
 0x10f   : > { %vm563_vm13 = vcmp.gt.f32.partialorder %v521_v16, 0.0  ;;  %v595_v30 = vmul.f32 0.01, %v521_v16  ;;  %v614_v31 = vsel %vm550_vm11, %v468_v17, %v582_v25  ;;  %vm548_vm14 = vcmp.gt.f32.partialorder %v460_v27, 0.0 }
 0x110   : > { %v985_v32 = vpack.c.bf16 %v614_v31, %v613_v22  ;;  %v630_v33 = vsel %vm566_vm12, %v532_v21, %v598_v26  ;;  %v580_v34 = vmul.f32 0.01, %v460_v27  ;;  %vm564_vm15 = vcmp.gt.f32.partialorder %v524_v28, 0.0 }
 0x111   : > { %v1025_v35 = vpack.c.bf16 %v630_v33, %v629_v29  ;;  %v596_v36 = vmul.f32 0.01, %v524_v28  ;;  %v611_v37 = vsel %vm547_vm10, %v457_v4, %v579_v23  ;;  %v627_v39 = vsel %vm563_vm13, %v521_v16, %v595_v30 }
 0x112   : > { %1033 = vst [vmem:[%s1266_s13 + $0x38] sm:$0xff] %v985_v32   ;;  %v612_v38 = vsel %vm548_vm14, %v460_v27, %v580_v34 }
 0x113   : > { %1041 = vst [vmem:[%s1266_s13 + $0x78] sm:$0xff] %v1025_v35   ;;  %v980_v24 = vpack.c.bf16 %v612_v38, %v611_v37  ;;  %v628_v40 = vsel %vm564_vm15, %v524_v28, %v596_v36 }
 0x114   : > { %v1020_v41 = vpack.c.bf16 %v628_v40, %v627_v39 }
 0x115   : > { %1032 = vst [vmem:[%s1266_s13 + $0x30] sm:$0xff] %v980_v24  }
 0x116   : > { %1040 = vst [vmem:[%s1266_s13 + $0x70] sm:$0xff] %v1020_v41  }
 0x117 PF: > { %s13_s12 = sadd.s32 1, %s1168_s12  }
 0x118   : > { %p10_p4 = scmp.ge.s32.totalorder %s13_s12, 4  }
 0x11a   :  { %12 = sbr.rel (!%p10_p4) target bundleno = 1 (0x1), region = 62 }

// kernel: discriminator_svhn_forward.4
= control target key start
LH: loop header
LB: loop body
LE: loop exit
PB: predicated region body
PF: predicated region fallthrough
CT: control target
= control target key end

     0   :  { %s4626_s12 = smov 0   ;;  %s5499_s0 = inlined_call_operand.vmem [shape: bf16[128,3200], index: 0, kind: input, shape index: {}]   ;;  %s5500_s1 = inlined_call_operand.vmem [shape: bf16[3200,128], index: 1, kind: input, shape index: {}]   ;;  %s5501_s2 = inlined_call_operand.vmem [shape: f32[1,128], index: 2, kind: input, shape index: {}]   ;;  %s5502_s3 = inlined_call_operand.vmem [shape: bf16[128,128], index: 3, kind: output, shape index: {}]  }
   0x1 LB: > { %s3358_s13 = sadd.s32 4294967295, %s4604_s12   ;;  %p3362_p0 = scmp.ge.s32.totalorder %s4604_s12, 1  ;;  %s4604_s12 = sphi %s4626_s12, %s13_s12  }
   0x2   : > { %p139_p1 = scmp.lt.s32.totalorder %s4604_s12, 3 }
   0x4   : > { %p140_p2 = pnand %p3362_p0, %p139_p1 }
   0x6   : > { %143 = sbr.rel (%p140_p2) target bundleno = 469 (0x1d5), region = 32 }
   0xb   : > { %v4250_v0 = vld [vmem:[%s5500_s1 + $0x78] sm:$0xff]   ;;  %v4254_v4 = vld [vmem:[%s5500_s1 + $0x70] sm:$0xff]   ;;  %v4258_v8 = vld [vmem:[%s5500_s1 + $0x68] sm:$0xff]   ;;  %s3363_s19 = sshll.u32 %s3358_s13, 3 }
   0xc   : > { %v4251_v1 = vld [vmem:[%s5500_s1 + $0xf8] sm:$0xff]   ;;  %3709 = vmatprep.subr.bf16.mxu0 %v4250_v0  ;;  %v4255_v5 = vld [vmem:[%s5500_s1 + $0xf0] sm:$0xff]   ;;  %v4259_v9 = vld [vmem:[%s5500_s1 + $0xe8] sm:$0xff]   ;;  %p165_p3 = scmp.lt.s32.totalorder %s3363_s19, 15 }
   0xd   : > { %v4252_v2 = vld [vmem:[%s5500_s1 + $0x38] sm:$0xff]   ;;  %3749 = vmatprep.subr.bf16.mxu1 %v4251_v1  ;;  %v4256_v6 = vld [vmem:[%s5500_s1 + $0x30] sm:$0xff]   ;;  %v4260_v10 = vld [vmem:[%s5500_s1 + $0x28] sm:$0xff]  }
   0xe   : > { %v4253_v3 = vld [vmem:[%s5500_s1 + $0xb8] sm:$0xff]   ;;  %3710 = vmatpush3.bf16.msra.mxu0 %v4252_v2  ;;  %v4257_v7 = vld [vmem:[%s5500_s1 + $0xb0] sm:$0xff]   ;;  %v4261_v11 = vld [vmem:[%s5500_s1 + $0xa8] sm:$0xff]   ;;  %s5526_s19 = smov (!%p165_p3, %s3363_s19), 15 }
   0xf   : > { %3750 = vmatpush3.bf16.msra.mxu1 %v4253_v3  ;;  %3711 = vmatprep.subr.bf16.mxu0 %v4254_v4  ;;  %v4262_v12 = vld [vmem:[%s5500_s1 + $0x60] sm:$0xff]   ;;  %v4266_v16 = vld [vmem:[%s5500_s1 + $0x58] sm:$0xff]   ;;  %v4270_v20 = vld [vmem:[%s5500_s1 + $0x50] sm:$0xff]   ;;  %s4241_s16 = smul.u32 100, %s5526_s19 }
  0x10   : > { %3751 = vmatprep.subr.bf16.mxu1 %v4255_v5  ;;  %v4263_v13 = vld [vmem:[%s5500_s1 + $0xe0] sm:$0xff]   ;;  %v4267_v17 = vld [vmem:[%s5500_s1 + $0xd8] sm:$0xff]   ;;  %v4271_v21 = vld [vmem:[%s5500_s1 + $0xd0] sm:$0xff]  }
  0x11   : > { %v4264_v14 = vld [vmem:[%s5500_s1 + $0x20] sm:$0xff]   ;;  %v4268_v18 = vld [vmem:[%s5500_s1 + $0x18] sm:$0xff]   ;;  %v4272_v22 = vld [vmem:[%s5500_s1 + $0x10] sm:$0xff]   ;;  %s4732_s13 = scalar_lea.vmem %s5499_s0, %s4241_s16 }
  0x12   : > { %3712 = vmatpush3.bf16.msra.mxu0 %v4256_v6  ;;  %v4265_v15 = vld [vmem:[%s5500_s1 + $0xa0] sm:$0xff]   ;;  %v4269_v19 = vld [vmem:[%s5500_s1 + $0x98] sm:$0xff]   ;;  %v4273_v23 = vld [vmem:[%s5500_s1 + $0x90] sm:$0xff]  }
  0x13   : > { %3752 = vmatpush3.bf16.msra.mxu1 %v4257_v7  ;;  %3713 = vmatprep.subr.bf16.mxu0 %v4258_v8  ;;  %v4274_v24 = vld [vmem:[%s5500_s1 + $0x48] sm:$0xff]   ;;  %v4278_v28 = vld [vmem:[%s5500_s1 + $0x40] sm:$0xff]   ;;  %v4288_v36 = vld [vmem:[%s5500_s1 + $0x178] sm:$0xff]  }
  0x14   : > { %3753 = vmatprep.subr.bf16.mxu1 %v4259_v9  ;;  %v4275_v25 = vld [vmem:[%s5500_s1 + $0xc8] sm:$0xff]   ;;  %v4279_v29 = vld [vmem:[%s5500_s1 + $0xc0] sm:$0xff]   ;;  %v4289_v37 = vld [vmem:[%s5500_s1 + $0x1f8] sm:$0xff]  }
  0x15   : > { %v4276_v26 = vld [vmem:[%s5500_s1 + $0x8] sm:$0xff]   ;;  %v4280_v30 = vld [vmem:[%s5500_s1] sm:$0xff]   ;;  %v4290_v38 = vld [vmem:[%s5500_s1 + $0x138] sm:$0xff]  }
  0x16   : > { %3714 = vmatpush3.bf16.msra.mxu0 %v4260_v10  ;;  %v4277_v27 = vld [vmem:[%s5500_s1 + $0x88] sm:$0xff]   ;;  %v4281_v31 = vld [vmem:[%s5500_s1 + $0x80] sm:$0xff]   ;;  %v4291_v39 = vld [vmem:[%s5500_s1 + $0x1b8] sm:$0xff]  }
  0x17   : > { %3754 = vmatpush3.bf16.msra.mxu1 %v4261_v11  ;;  %3715 = vmatprep.subr.bf16.mxu0 %v4262_v12  ;;  %v4282_v32 = vld [vmem:[%s4732_s13] ss:$100 sps:$4 sm:$0xff]   ;;  %v4285_v34 = vld [vmem:[%s4732_s13 + $0x8] ss:$100 sps:$4 sm:$0xff]   ;;  %v4292_v40 = vld [vmem:[%s5500_s1 + $0x170] sm:$0xff]  }
  0x18   : > { %3755 = vmatprep.subr.bf16.mxu1 %v4263_v13  ;;  %v4284_v33 = vld [vmem:[%s4732_s13 + $0x4] ss:$100 sps:$4 sm:$0xff]   ;;  %v4287_v35 = vld [vmem:[%s4732_s13 + $0xc] ss:$100 sps:$4 sm:$0xff]   ;;  %v4298_v45 = vld [vmem:[%s4732_s13 + $0xd4] ss:$100 sps:$4 sm:$0xff]  }
  0x19   : > { %2425 = vmatprep.mubr.bf16.mxu0 %v4284_v33  ;;  %2490 = vmatprep.mubr.bf16.mxu1 %v4287_v35  ;;  %v4293_v41 = vld [vmem:[%s5500_s1 + $0x1f0] sm:$0xff]   ;;  %v4300_v46 = vld [vmem:[%s4732_s13 + $0xc8] ss:$100 sps:$4 sm:$0xff]   ;;  %v4306_v52 = vld [vmem:[%s5500_s1 + $0x160] sm:$0xff]  }
  0x1a   : > { %3716 = vmatpush3.bf16.msra.mxu0 %v4264_v14  ;;  %v4294_v42 = vld [vmem:[%s5500_s1 + $0x130] sm:$0xff]   ;;  %v4302_v48 = vld [vmem:[%s5500_s1 + $0x168] sm:$0xff]   ;;  %v4307_v53 = vld [vmem:[%s5500_s1 + $0x1e0] sm:$0xff]  }
  0x1b   : > { %3756 = vmatpush3.bf16.msra.mxu1 %v4265_v15  ;;  %3717 = vmatprep.subr.bf16.mxu0 %v4266_v16  ;;  %v4295_v43 = vld [vmem:[%s5500_s1 + $0x1b0] sm:$0xff]   ;;  %v4303_v49 = vld [vmem:[%s5500_s1 + $0x1e8] sm:$0xff]   ;;  %v4308_v54 = vld [vmem:[%s5500_s1 + $0x120] sm:$0xff]  }
  0x1c   : > { %3757 = vmatprep.subr.bf16.mxu1 %v4267_v17  ;;  %v4296_v44 = vld [vmem:[%s4732_s13 + $0xcc] ss:$100 sps:$4 sm:$0xff]   ;;  %v4309_v55 = vld [vmem:[%s5500_s1 + $0x1a0] sm:$0xff]   ;;  %v4310_v56 = vld [vmem:[%s4732_s13 + $0x194] ss:$100 sps:$4 sm:$0xff]  }
  0x1d   : > { %v4301_v47 = vld [vmem:[%s4732_s13 + $0xd0] ss:$100 sps:$4 sm:$0xff]   ;;  %v4304_v50 = vld [vmem:[%s5500_s1 + $0x128] sm:$0xff]   ;;  %v4312_v57 = vld [vmem:[%s4732_s13 + $0x19c] ss:$100 sps:$4 sm:$0xff]  }
  0x1e   : > { %3718 = vmatpush3.bf16.msra.mxu0 %v4268_v18  ;;  %v4305_v51 = vld [vmem:[%s5500_s1 + $0x1a8] sm:$0xff]   ;;  %v4314_v58 = vld [vmem:[%s4732_s13 + $0x190] ss:$100 sps:$4 sm:$0xff]   ;;  %v4315_v59 = vld [vmem:[%s4732_s13 + $0x198] ss:$100 sps:$4 sm:$0xff]  }
  0x1f   : > { %3758 = vmatpush3.bf16.msra.mxu1 %v4269_v19  ;;  %3719 = vmatprep.subr.bf16.mxu0 %v4270_v20  ;;  %v4316_v60 = vld [vmem:[%s5500_s1 + $0x158] sm:$0xff]   ;;  %v4320_v0 = vld [vmem:[%s5500_s1 + $0x150] sm:$0xff]   ;;  %v4326_v5 = vld [vmem:[%s4732_s13 + $0x264] ss:$100 sps:$4 sm:$0xff]  }
  0x20   : > { %3759 = vmatprep.subr.bf16.mxu1 %v4271_v21  ;;  %v4317_v61 = vld [vmem:[%s5500_s1 + $0x1d8] sm:$0xff]   ;;  %v4321_v1 = vld [vmem:[%s5500_s1 + $0x1d0] sm:$0xff]   ;;  %v4329_v7 = vld [vmem:[%s4732_s13 + $0x260] ss:$100 sps:$4 sm:$0xff]  }
  0x21   : > { %v4318_v62 = vld [vmem:[%s5500_s1 + $0x118] sm:$0xff]   ;;  %v4322_v2 = vld [vmem:[%s5500_s1 + $0x110] sm:$0xff]   ;;  %v4330_v8 = vld [vmem:[%s5500_s1 + $0x148] sm:$0xff]  }
  0x22   : > { %3720 = vmatpush3.bf16.msra.mxu0 %v4272_v22  ;;  %v4319_v63 = vld [vmem:[%s5500_s1 + $0x198] sm:$0xff]   ;;  %v4323_v3 = vld [vmem:[%s5500_s1 + $0x190] sm:$0xff]   ;;  %v4331_v9 = vld [vmem:[%s5500_s1 + $0x1c8] sm:$0xff]  }
  0x23   : > { %3760 = vmatpush3.bf16.msra.mxu1 %v4273_v23  ;;  %3721 = vmatprep.subr.bf16.mxu0 %v4274_v24  ;;  %v4324_v4 = vld [vmem:[%s4732_s13 + $0x25c] ss:$100 sps:$4 sm:$0xff]   ;;  %v4332_v10 = vld [vmem:[%s5500_s1 + $0x108] sm:$0xff]   ;;  %v4338_v16 = vld [vmem:[%s4732_s13 + $0x10] ss:$100 sps:$4 sm:$0xff]  }
  0x24   : > { %3761 = vmatprep.subr.bf16.mxu1 %v4275_v25  ;;  %v4328_v6 = vld [vmem:[%s4732_s13 + $0x258] ss:$100 sps:$4 sm:$0xff]   ;;  %v4333_v11 = vld [vmem:[%s5500_s1 + $0x188] sm:$0xff]   ;;  %v4334_v12 = vld [vmem:[%s5500_s1 + $0x140] sm:$0xff]  }
  0x25   : > { %v4335_v13 = vld [vmem:[%s5500_s1 + $0x1c0] sm:$0xff]   ;;  %v4340_v17 = vld [vmem:[%s4732_s13 + $0x14] ss:$100 sps:$4 sm:$0xff]   ;;  %v4359_v33 = vld [vmem:[%s5500_s1 + $0x2e8] sm:$0xff]  }
  0x26   : > { %3722 = vmatpush3.bf16.msra.mxu0 %v4276_v26  ;;  %v4336_v14 = vld [vmem:[%s5500_s1 + $0x100] sm:$0xff]   ;;  %v4341_v18 = vld [vmem:[%s4732_s13 + $0x18] ss:$100 sps:$4 sm:$0xff]   ;;  %v4348_v24 = vld [vmem:[%s5500_s1 + $0x270] sm:$0xff]  }
  0x27   : > { %3762 = vmatpush3.bf16.msra.mxu1 %v4277_v27  ;;  %3723 = vmatprep.subr.bf16.mxu0 %v4278_v28  ;;  %v4337_v15 = vld [vmem:[%s5500_s1 + $0x180] sm:$0xff]   ;;  %v4344_v20 = vld [vmem:[%s5500_s1 + $0x278] sm:$0xff]   ;;  %v4349_v25 = vld [vmem:[%s5500_s1 + $0x2f0] sm:$0xff]  }
  0x28   : > { %3763 = vmatprep.subr.bf16.mxu1 %v4279_v29  ;;  %v4343_v19 = vld [vmem:[%s4732_s13 + $0x1c] ss:$100 sps:$4 sm:$0xff]   ;;  %v4350_v26 = vld [vmem:[%s5500_s1 + $0x230] sm:$0xff]   ;;  %v4354_v29 = vld [vmem:[%s4732_s13 + $0xe4] ss:$100 sps:$4 sm:$0xff]  }
  0x29   : > { %v4345_v21 = vld [vmem:[%s5500_s1 + $0x2f8] sm:$0xff]   ;;  %v4351_v27 = vld [vmem:[%s5500_s1 + $0x2b0] sm:$0xff]   ;;  %v4361_v35 = vld [vmem:[%s5500_s1 + $0x2a8] sm:$0xff]  }
  0x2a   : > { %3724 = vmatpush3.bf16.msra.mxu0 %v4280_v30  ;;  %v4346_v22 = vld [vmem:[%s5500_s1 + $0x238] sm:$0xff]  }
  0x2b   : > { %3764 = vmatpush3.bf16.msra.mxu1 %v4281_v31  ;;  %3789 = vmatprep.subr.bf16.mxu0 %v4288_v36  ;;  %v4347_v23 = vld [vmem:[%s5500_s1 + $0x2b8] sm:$0xff]   ;;  %v4357_v31 = vld [vmem:[%s4732_s13 + $0xe0] ss:$100 sps:$4 sm:$0xff]  }
  0x2c   : > { %3829 = vmatprep.subr.bf16.mxu1 %v4289_v37  ;;  %v4352_v28 = vld [vmem:[%s4732_s13 + $0xdc] ss:$100 sps:$4 sm:$0xff]  }
  0x2d   : > { %2426 = vmatmul.mubr.bf16.vlgmr.msra.gmra.mxu0 %v4282_v32  ;;  %v4356_v30 = vld [vmem:[%s4732_s13 + $0xd8] ss:$100 sps:$4 sm:$0xff]   ;;  %v4358_v32 = vld [vmem:[%s5500_s1 + $0x268] sm:$0xff]   ;;  %v4362_v36 = vld [vmem:[%s5500_s1 + $0x260] sm:$0xff]  }
  0x2e   : > { %2491 = vmatmul.mubr.bf16.vlgmr.msra.gmra.mxu1 %v4285_v34  ;;  %3790 = vmatpush3.bf16.msra.mxu0 %v4290_v38  ;;  %v4360_v34 = vld [vmem:[%s5500_s1 + $0x228] sm:$0xff]   ;;  %v4363_v37 = vld [vmem:[%s5500_s1 + $0x2e0] sm:$0xff]  }
  0x2f   : > { %3830 = vmatpush3.bf16.msra.mxu1 %v4291_v39  ;;  %3791 = vmatprep.subr.bf16.mxu0 %v4292_v40  ;;  %v4364_v38 = vld [vmem:[%s5500_s1 + $0x220] sm:$0xff]  }
  0x30   : > { %3831 = vmatprep.subr.bf16.mxu1 %v4293_v41  ;;  %2433 = vmatprep.mubr.bf16.mxu0 %v4296_v44  ;;  %v4365_v39 = vld [vmem:[%s5500_s1 + $0x2a0] sm:$0xff]   ;;  %v4368_v41 = vld [vmem:[%s4732_s13 + $0x1ac] ss:$100 sps:$4 sm:$0xff]   ;;  %v4372_v44 = vld [vmem:[%s5500_s1 + $0x258] sm:$0xff]  }
  0x31   : > { %2498 = vmatprep.mubr.bf16.mxu1 %v4298_v45  ;;  %v4366_v40 = vld [vmem:[%s4732_s13 + $0x1a4] ss:$100 sps:$4 sm:$0xff]   ;;  %v4373_v45 = vld [vmem:[%s5500_s1 + $0x2d8] sm:$0xff]  }
  0x32   : > { %3792 = vmatpush3.bf16.msra.mxu0 %v4294_v42  ;;  %v4370_v42 = vld [vmem:[%s4732_s13 + $0x1a0] ss:$100 sps:$4 sm:$0xff]  }
  0x33   : > { %3832 = vmatpush3.bf16.msra.mxu1 %v4295_v43  ;;  %3793 = vmatprep.subr.bf16.mxu0 %v4302_v48  ;;  %v4371_v43 = vld [vmem:[%s4732_s13 + $0x1a8] ss:$100 sps:$4 sm:$0xff]   ;;  %v4376_v48 = vld [vmem:[%s5500_s1 + $0x250] sm:$0xff]  }
  0x34   : > { %3833 = vmatprep.subr.bf16.mxu1 %v4303_v49  ;;  %v4377_v49 = vld [vmem:[%s5500_s1 + $0x2d0] sm:$0xff]  }
  0x35   : > { %2434 = vmatmul.mubr.bf16.gmra.mxu0 %v4300_v46  ;;  %v4374_v46 = vld [vmem:[%s5500_s1 + $0x218] sm:$0xff]  }
  0x36   : > { %2499 = vmatmul.mubr.bf16.gmra.mxu1 %v4301_v47  ;;  %3794 = vmatpush3.bf16.msra.mxu0 %v4304_v50  ;;  %v4375_v47 = vld [vmem:[%s5500_s1 + $0x298] sm:$0xff]   ;;  %v4378_v50 = vld [vmem:[%s5500_s1 + $0x210] sm:$0xff]  }
  0x37   : > { %3834 = vmatpush3.bf16.msra.mxu1 %v4305_v51  ;;  %3795 = vmatprep.subr.bf16.mxu0 %v4306_v52  ;;  %v4379_v51 = vld [vmem:[%s5500_s1 + $0x290] sm:$0xff]  }
  0x38   : > { %3835 = vmatprep.subr.bf16.mxu1 %v4307_v53  ;;  %2441 = vmatprep.mubr.bf16.mxu0 %v4310_v56  ;;  %v4380_v52 = vld [vmem:[%s4732_s13 + $0x26c] ss:$100 sps:$4 sm:$0xff]   ;;  %v4382_v53 = vld [vmem:[%s4732_s13 + $0x274] ss:$100 sps:$4 sm:$0xff]  }
  0x39   : > { %2506 = vmatprep.mubr.bf16.mxu1 %v4312_v57  ;;  %v4386_v56 = vld [vmem:[%s5500_s1 + $0x248] sm:$0xff]  }
  0x3a   : > { %3796 = vmatpush3.bf16.msra.mxu0 %v4308_v54  ;;  %v4384_v54 = vld [vmem:[%s4732_s13 + $0x268] ss:$100 sps:$4 sm:$0xff]  }
  0x3b   : > { %3836 = vmatpush3.bf16.msra.mxu1 %v4309_v55  ;;  %3797 = vmatprep.subr.bf16.mxu0 %v4316_v60  ;;  %v4385_v55 = vld [vmem:[%s4732_s13 + $0x270] ss:$100 sps:$4 sm:$0xff]   ;;  %v4387_v57 = vld [vmem:[%s5500_s1 + $0x2c8] sm:$0xff]   ;;  %v4390_v60 = vld [vmem:[%s5500_s1 + $0x240] sm:$0xff]  }
  0x3c   : > { %3837 = vmatprep.subr.bf16.mxu1 %v4317_v61  ;;  %v4391_v61 = vld [vmem:[%s5500_s1 + $0x2c0] sm:$0xff]  }
  0x3d   : > { %2442 = vmatmul.mubr.bf16.gmra.mxu0 %v4314_v58  ;;  %v4388_v58 = vld [vmem:[%s5500_s1 + $0x208] sm:$0xff]  }
  0x3e   : > { %2507 = vmatmul.mubr.bf16.gmra.mxu1 %v4315_v59  ;;  %3798 = vmatpush3.bf16.msra.mxu0 %v4318_v62  ;;  %v4389_v59 = vld [vmem:[%s5500_s1 + $0x288] sm:$0xff]   ;;  %v4392_v62 = vld [vmem:[%s5500_s1 + $0x200] sm:$0xff]  }
  0x3f   : > { %3838 = vmatpush3.bf16.msra.mxu1 %v4319_v63  ;;  %3799 = vmatprep.subr.bf16.mxu0 %v4320_v0  ;;  %v4393_v63 = vld [vmem:[%s5500_s1 + $0x280] sm:$0xff]  }
  0x40   : > { %3839 = vmatprep.subr.bf16.mxu1 %v4321_v1  ;;  %2449 = vmatprep.mubr.bf16.mxu0 %v4324_v4  ;;  %v4394_v0 = vld [vmem:[%s4732_s13 + $0x20] ss:$100 sps:$4 sm:$0xff]   ;;  %v4400_v4 = vld [vmem:[%s5500_s1 + $0x378] sm:$0xff]  }
  0x41   : > { %2514 = vmatprep.mubr.bf16.mxu1 %v4326_v5  ;;  %v4396_v1 = vld [vmem:[%s4732_s13 + $0x24] ss:$100 sps:$4 sm:$0xff]   ;;  %v4401_v5 = vld [vmem:[%s5500_s1 + $0x3f8] sm:$0xff]  }
  0x42   : > { %3800 = vmatpush3.bf16.msra.mxu0 %v4322_v2  ;;  %v4397_v2 = vld [vmem:[%s4732_s13 + $0x28] ss:$100 sps:$4 sm:$0xff]  }
  0x43   : > { %3840 = vmatpush3.bf16.msra.mxu1 %v4323_v3  ;;  %3801 = vmatprep.subr.bf16.mxu0 %v4330_v8  ;;  %v4399_v3 = vld [vmem:[%s4732_s13 + $0x2c] ss:$100 sps:$4 sm:$0xff]  }
  0x44   : > { %3841 = vmatprep.subr.bf16.mxu1 %v4331_v9  ;;  %v4404_v8 = vld [vmem:[%s5500_s1 + $0x370] sm:$0xff]  }
  0x45   : > { %2450 = vmatmul.mubr.bf16.gmra.mxu0 %v4328_v6  ;;  %v4402_v6 = vld [vmem:[%s5500_s1 + $0x338] sm:$0xff]   ;;  %v4405_v9 = vld [vmem:[%s5500_s1 + $0x3f0] sm:$0xff]  }
  0x46   : > { %2515 = vmatmul.mubr.bf16.gmra.mxu1 %v4329_v7  ;;  %3802 = vmatpush3.bf16.msra.mxu0 %v4332_v10  ;;  %v4403_v7 = vld [vmem:[%s5500_s1 + $0x3b8] sm:$0xff]   ;;  %v4406_v10 = vld [vmem:[%s5500_s1 + $0x330] sm:$0xff]  }
  0x47   : > { %3842 = vmatpush3.bf16.msra.mxu1 %v4333_v11  ;;  %3803 = vmatprep.subr.bf16.mxu0 %v4334_v12  ;;  %v4407_v11 = vld [vmem:[%s5500_s1 + $0x3b0] sm:$0xff]  }
  0x48   : > { %3843 = vmatprep.subr.bf16.mxu1 %v4335_v13  ;;  %2555 = vmatprep.mubr.bf16.mxu0 %v4340_v17  ;;  %v4408_v12 = vld [vmem:[%s4732_s13 + $0xec] ss:$100 sps:$4 sm:$0xff]   ;;  %v4410_v13 = vld [vmem:[%s4732_s13 + $0xf4] ss:$100 sps:$4 sm:$0xff]  }
  0x49   : > { %2620 = vmatprep.mubr.bf16.mxu1 %v4343_v19  ;;  %v4415_v17 = vld [vmem:[%s5500_s1 + $0x3e8] sm:$0xff]  }
  0x4a   : > { %3804 = vmatpush3.bf16.msra.mxu0 %v4336_v14  ;;  %v4412_v14 = vld [vmem:[%s4732_s13 + $0xe8] ss:$100 sps:$4 sm:$0xff]  }
  0x4b   : > { %3844 = vmatpush3.bf16.msra.mxu1 %v4337_v15  ;;  %3869 = vmatprep.subr.bf16.mxu0 %v4344_v20  ;;  %v4413_v15 = vld [vmem:[%s4732_s13 + $0xf0] ss:$100 sps:$4 sm:$0xff]   ;;  %v4417_v19 = vld [vmem:[%s5500_s1 + $0x3a8] sm:$0xff]   ;;  %v4418_v20 = vld [vmem:[%s5500_s1 + $0x360] sm:$0xff]  }
  0x4c   : > { %3909 = vmatprep.subr.bf16.mxu1 %v4345_v21  ;;  %v4419_v21 = vld [vmem:[%s5500_s1 + $0x3e0] sm:$0xff]  }
  0x4d   : > { %2556 = vmatmul.mubr.bf16.vlgmr.msra.gmra.mxu0 %v4338_v16  ;;  %v4414_v16 = vld [vmem:[%s5500_s1 + $0x368] sm:$0xff]  }
  0x4e   : > { %2621 = vmatmul.mubr.bf16.vlgmr.msra.gmra.mxu1 %v4341_v18  ;;  %3870 = vmatpush3.bf16.msra.mxu0 %v4346_v22  ;;  %v4416_v18 = vld [vmem:[%s5500_s1 + $0x328] sm:$0xff]   ;;  %v4420_v22 = vld [vmem:[%s5500_s1 + $0x320] sm:$0xff]  }
  0x4f   : > { %3910 = vmatpush3.bf16.msra.mxu1 %v4347_v23  ;;  %3871 = vmatprep.subr.bf16.mxu0 %v4348_v24  ;;  %v4421_v23 = vld [vmem:[%s5500_s1 + $0x3a0] sm:$0xff]   ;;  %v4422_v24 = vld [vmem:[%s4732_s13 + $0x1b4] ss:$100 sps:$4 sm:$0xff]  }
  0x50   : > { %3911 = vmatprep.subr.bf16.mxu1 %v4349_v25  ;;  %2563 = vmatprep.mubr.bf16.mxu0 %v4352_v28  ;;  %v4424_v25 = vld [vmem:[%s4732_s13 + $0x1bc] ss:$100 sps:$4 sm:$0xff]  }
  0x51   : > { %2628 = vmatprep.mubr.bf16.mxu1 %v4354_v29  ;;  %v4428_v28 = vld [vmem:[%s5500_s1 + $0x358] sm:$0xff]  }
  0x52   : > { %3872 = vmatpush3.bf16.msra.mxu0 %v4350_v26  ;;  %v4426_v26 = vld [vmem:[%s4732_s13 + $0x1b0] ss:$100 sps:$4 sm:$0xff]   ;;  %v4429_v29 = vld [vmem:[%s5500_s1 + $0x3d8] sm:$0xff]  }
  0x53   : > { %3912 = vmatpush3.bf16.msra.mxu1 %v4351_v27  ;;  %3873 = vmatprep.subr.bf16.mxu0 %v4358_v32  ;;  %v4427_v27 = vld [vmem:[%s4732_s13 + $0x1b8] ss:$100 sps:$4 sm:$0xff]   ;;  %v4432_v32 = vld [vmem:[%s5500_s1 + $0x350] sm:$0xff]  }
  0x54   : > { %3913 = vmatprep.subr.bf16.mxu1 %v4359_v33  ;;  %v4433_v33 = vld [vmem:[%s5500_s1 + $0x3d0] sm:$0xff]  }
  0x55   : > { %2564 = vmatmul.mubr.bf16.gmra.mxu0 %v4356_v30  ;;  %v4430_v30 = vld [vmem:[%s5500_s1 + $0x318] sm:$0xff]  }
  0x56   : > { %2629 = vmatmul.mubr.bf16.gmra.mxu1 %v4357_v31  ;;  %3874 = vmatpush3.bf16.msra.mxu0 %v4360_v34  ;;  %v4431_v31 = vld [vmem:[%s5500_s1 + $0x398] sm:$0xff]   ;;  %v4434_v34 = vld [vmem:[%s5500_s1 + $0x310] sm:$0xff]  }
  0x57   : > { %3914 = vmatpush3.bf16.msra.mxu1 %v4361_v35  ;;  %3875 = vmatprep.subr.bf16.mxu0 %v4362_v36  ;;  %v4435_v35 = vld [vmem:[%s5500_s1 + $0x390] sm:$0xff]   ;;  %v4436_v36 = vld [vmem:[%s4732_s13 + $0x27c] ss:$100 sps:$4 sm:$0xff]  }
  0x58   : > { %3915 = vmatprep.subr.bf16.mxu1 %v4363_v37  ;;  %2571 = vmatprep.mubr.bf16.mxu0 %v4366_v40  ;;  %v4438_v37 = vld [vmem:[%s4732_s13 + $0x284] ss:$100 sps:$4 sm:$0xff]  }
  0x59   : > { %2636 = vmatprep.mubr.bf16.mxu1 %v4368_v41  ;;  %v4442_v40 = vld [vmem:[%s5500_s1 + $0x348] sm:$0xff]  }
  0x5a   : > { %3876 = vmatpush3.bf16.msra.mxu0 %v4364_v38  ;;  %v4440_v38 = vld [vmem:[%s4732_s13 + $0x278] ss:$100 sps:$4 sm:$0xff]   ;;  %v4443_v41 = vld [vmem:[%s5500_s1 + $0x3c8] sm:$0xff]  }
  0x5b   : > { %3916 = vmatpush3.bf16.msra.mxu1 %v4365_v39  ;;  %3877 = vmatprep.subr.bf16.mxu0 %v4372_v44  ;;  %v4441_v39 = vld [vmem:[%s4732_s13 + $0x280] ss:$100 sps:$4 sm:$0xff]  }
  0x5c   : > { %3917 = vmatprep.subr.bf16.mxu1 %v4373_v45  ;;  %v4446_v44 = vld [vmem:[%s5500_s1 + $0x340] sm:$0xff]  }
  0x5d   : > { %2572 = vmatmul.mubr.bf16.gmra.mxu0 %v4370_v42  ;;  %v4444_v42 = vld [vmem:[%s5500_s1 + $0x308] sm:$0xff]   ;;  %v4447_v45 = vld [vmem:[%s5500_s1 + $0x3c0] sm:$0xff]  }
  0x5e   : > { %2637 = vmatmul.mubr.bf16.gmra.mxu1 %v4371_v43  ;;  %3878 = vmatpush3.bf16.msra.mxu0 %v4374_v46  ;;  %v4445_v43 = vld [vmem:[%s5500_s1 + $0x388] sm:$0xff]   ;;  %v4448_v46 = vld [vmem:[%s5500_s1 + $0x300] sm:$0xff]  }
  0x5f   : > { %3918 = vmatpush3.bf16.msra.mxu1 %v4375_v47  ;;  %3879 = vmatprep.subr.bf16.mxu0 %v4376_v48  ;;  %v4449_v47 = vld [vmem:[%s5500_s1 + $0x380] sm:$0xff]   ;;  %v4450_v48 = vld [vmem:[%s4732_s13 + $0x30] ss:$100 sps:$4 sm:$0xff]  }
  0x60   : > { %3919 = vmatprep.subr.bf16.mxu1 %v4377_v49  ;;  %2579 = vmatprep.mubr.bf16.mxu0 %v4380_v52  ;;  %v4452_v49 = vld [vmem:[%s4732_s13 + $0x34] ss:$100 sps:$4 sm:$0xff]  }
  0x61   : > { %2644 = vmatprep.mubr.bf16.mxu1 %v4382_v53  ;;  %v4456_v52 = vld [vmem:[%s5500_s1 + $0x478] sm:$0xff]  }
  0x62   : > { %3880 = vmatpush3.bf16.msra.mxu0 %v4378_v50  ;;  %v4453_v50 = vld [vmem:[%s4732_s13 + $0x38] ss:$100 sps:$4 sm:$0xff]  }
  0x63   : > { %3920 = vmatpush3.bf16.msra.mxu1 %v4379_v51  ;;  %3881 = vmatprep.subr.bf16.mxu0 %v4386_v56  ;;  %v4455_v51 = vld [vmem:[%s4732_s13 + $0x3c] ss:$100 sps:$4 sm:$0xff]   ;;  %v4460_v56 = vld [vmem:[%s5500_s1 + $0x470] sm:$0xff]  }
  0x64   : > { %3921 = vmatprep.subr.bf16.mxu1 %v4387_v57  ;;  %v4457_v53 = vld [vmem:[%s5500_s1 + $0x4f8] sm:$0xff]   ;;  %v4461_v57 = vld [vmem:[%s5500_s1 + $0x4f0] sm:$0xff]  }
  0x65   : > { %2580 = vmatmul.mubr.bf16.gmra.mxu0 %v4384_v54  ;;  %v4458_v54 = vld [vmem:[%s5500_s1 + $0x438] sm:$0xff]  }
  0x66   : > { %2645 = vmatmul.mubr.bf16.gmra.mxu1 %v4385_v55  ;;  %3882 = vmatpush3.bf16.msra.mxu0 %v4388_v58  ;;  %v4459_v55 = vld [vmem:[%s5500_s1 + $0x4b8] sm:$0xff]   ;;  %v4462_v58 = vld [vmem:[%s5500_s1 + $0x430] sm:$0xff]  }
  0x67   : > { %3922 = vmatpush3.bf16.msra.mxu1 %v4389_v59  ;;  %3883 = vmatprep.subr.bf16.mxu0 %v4390_v60  ;;  %v4463_v59 = vld [vmem:[%s5500_s1 + $0x4b0] sm:$0xff]   ;;  %v4464_v60 = vld [vmem:[%s4732_s13 + $0xfc] ss:$100 sps:$4 sm:$0xff]  }
  0x68   : > { %3923 = vmatprep.subr.bf16.mxu1 %v4391_v61  ;;  %2685 = vmatprep.mubr.bf16.mxu0 %v4396_v1  ;;  %v4466_v61 = vld [vmem:[%s4732_s13 + $0x104] ss:$100 sps:$4 sm:$0xff]  }
  0x69   : > { %2750 = vmatprep.mubr.bf16.mxu1 %v4399_v3  ;;  %v4471_v1 = vld [vmem:[%s5500_s1 + $0x4e8] sm:$0xff]  }
  0x6a   : > { %3884 = vmatpush3.bf16.msra.mxu0 %v4392_v62  ;;  %v4468_v62 = vld [vmem:[%s4732_s13 + $0xf8] ss:$100 sps:$4 sm:$0xff]   ;;  %v4473_v3 = vld [vmem:[%s5500_s1 + $0x4a8] sm:$0xff]  }
  0x6b   : > { %3924 = vmatpush3.bf16.msra.mxu1 %v4393_v63  ;;  %3949 = vmatprep.subr.bf16.mxu0 %v4400_v4  ;;  %v4469_v63 = vld [vmem:[%s4732_s13 + $0x100] ss:$100 sps:$4 sm:$0xff]  }
  0x6c   : > { %3989 = vmatprep.subr.bf16.mxu1 %v4401_v5  ;;  %v4474_v4 = vld [vmem:[%s5500_s1 + $0x460] sm:$0xff]  }
  0x6d   : > { %2686 = vmatmul.mubr.bf16.vlgmr.msra.gmra.mxu0 %v4394_v0  ;;  %v4470_v0 = vld [vmem:[%s5500_s1 + $0x468] sm:$0xff]   ;;  %v4475_v5 = vld [vmem:[%s5500_s1 + $0x4e0] sm:$0xff]  }
  0x6e   : > { %2751 = vmatmul.mubr.bf16.vlgmr.msra.gmra.mxu1 %v4397_v2  ;;  %3950 = vmatpush3.bf16.msra.mxu0 %v4402_v6  ;;  %v4472_v2 = vld [vmem:[%s5500_s1 + $0x428] sm:$0xff]   ;;  %v4476_v6 = vld [vmem:[%s5500_s1 + $0x420] sm:$0xff]  }
  0x6f   : > { %3990 = vmatpush3.bf16.msra.mxu1 %v4403_v7  ;;  %3951 = vmatprep.subr.bf16.mxu0 %v4404_v8  ;;  %v4477_v7 = vld [vmem:[%s5500_s1 + $0x4a0] sm:$0xff]  }
  0x70   : > { %3991 = vmatprep.subr.bf16.mxu1 %v4405_v9  ;;  %2693 = vmatprep.mubr.bf16.mxu0 %v4408_v12  ;;  %v4478_v8 = vld [vmem:[%s4732_s13 + $0x1c4] ss:$100 sps:$4 sm:$0xff]   ;;  %v4480_v9 = vld [vmem:[%s4732_s13 + $0x1cc] ss:$100 sps:$4 sm:$0xff]   ;;  %v4484_v12 = vld [vmem:[%s5500_s1 + $0x458] sm:$0xff]  }
  0x71   : > { %2758 = vmatprep.mubr.bf16.mxu1 %v4410_v13  ;;  %v4485_v13 = vld [vmem:[%s5500_s1 + $0x4d8] sm:$0xff]  }
  0x72   : > { %3952 = vmatpush3.bf16.msra.mxu0 %v4406_v10  ;;  %v4482_v10 = vld [vmem:[%s4732_s13 + $0x1c0] ss:$100 sps:$4 sm:$0xff]  }
  0x73   : > { %3992 = vmatpush3.bf16.msra.mxu1 %v4407_v11  ;;  %3953 = vmatprep.subr.bf16.mxu0 %v4414_v16  ;;  %v4483_v11 = vld [vmem:[%s4732_s13 + $0x1c8] ss:$100 sps:$4 sm:$0xff]   ;;  %v4488_v16 = vld [vmem:[%s5500_s1 + $0x450] sm:$0xff]  }
  0x74   : > { %3993 = vmatprep.subr.bf16.mxu1 %v4415_v17  ;;  %v4489_v17 = vld [vmem:[%s5500_s1 + $0x4d0] sm:$0xff]  }
  0x75   : > { %2694 = vmatmul.mubr.bf16.gmra.mxu0 %v4412_v14  ;;  %v4486_v14 = vld [vmem:[%s5500_s1 + $0x418] sm:$0xff]  }
  0x76   : > { %2759 = vmatmul.mubr.bf16.gmra.mxu1 %v4413_v15  ;;  %3954 = vmatpush3.bf16.msra.mxu0 %v4416_v18  ;;  %v4487_v15 = vld [vmem:[%s5500_s1 + $0x498] sm:$0xff]   ;;  %v4490_v18 = vld [vmem:[%s5500_s1 + $0x410] sm:$0xff]  }
  0x77   : > { %3994 = vmatpush3.bf16.msra.mxu1 %v4417_v19  ;;  %3955 = vmatprep.subr.bf16.mxu0 %v4418_v20  ;;  %v4491_v19 = vld [vmem:[%s5500_s1 + $0x490] sm:$0xff]  }
  0x78   : > { %3995 = vmatprep.subr.bf16.mxu1 %v4419_v21  ;;  %2701 = vmatprep.mubr.bf16.mxu0 %v4422_v24  ;;  %v4492_v20 = vld [vmem:[%s4732_s13 + $0x28c] ss:$100 sps:$4 sm:$0xff]   ;;  %v4494_v21 = vld [vmem:[%s4732_s13 + $0x294] ss:$100 sps:$4 sm:$0xff]  }
  0x79   : > { %2766 = vmatprep.mubr.bf16.mxu1 %v4424_v25  ;;  %v4498_v24 = vld [vmem:[%s5500_s1 + $0x448] sm:$0xff]  }
  0x7a   : > { %3956 = vmatpush3.bf16.msra.mxu0 %v4420_v22  ;;  %v4496_v22 = vld [vmem:[%s4732_s13 + $0x288] ss:$100 sps:$4 sm:$0xff]  }
  0x7b   : > { %3996 = vmatpush3.bf16.msra.mxu1 %v4421_v23  ;;  %3957 = vmatprep.subr.bf16.mxu0 %v4428_v28  ;;  %v4497_v23 = vld [vmem:[%s4732_s13 + $0x290] ss:$100 sps:$4 sm:$0xff]   ;;  %v4499_v25 = vld [vmem:[%s5500_s1 + $0x4c8] sm:$0xff]   ;;  %v4502_v28 = vld [vmem:[%s5500_s1 + $0x440] sm:$0xff]  }
  0x7c   : > { %3997 = vmatprep.subr.bf16.mxu1 %v4429_v29  ;;  %v4503_v29 = vld [vmem:[%s5500_s1 + $0x4c0] sm:$0xff]  }
  0x7d   : > { %2702 = vmatmul.mubr.bf16.gmra.mxu0 %v4426_v26  ;;  %v4500_v26 = vld [vmem:[%s5500_s1 + $0x408] sm:$0xff]  }
  0x7e   : > { %2767 = vmatmul.mubr.bf16.gmra.mxu1 %v4427_v27  ;;  %3958 = vmatpush3.bf16.msra.mxu0 %v4430_v30  ;;  %v4501_v27 = vld [vmem:[%s5500_s1 + $0x488] sm:$0xff]   ;;  %v4504_v30 = vld [vmem:[%s5500_s1 + $0x400] sm:$0xff]  }
  0x7f   : > { %3998 = vmatpush3.bf16.msra.mxu1 %v4431_v31  ;;  %3959 = vmatprep.subr.bf16.mxu0 %v4432_v32  ;;  %v4505_v31 = vld [vmem:[%s5500_s1 + $0x480] sm:$0xff]  }
  0x80   : > { %3999 = vmatprep.subr.bf16.mxu1 %v4433_v33  ;;  %2709 = vmatprep.mubr.bf16.mxu0 %v4436_v36  ;;  %v4506_v32 = vld [vmem:[%s4732_s13 + $0x40] ss:$100 sps:$4 sm:$0xff]   ;;  %v4512_v36 = vld [vmem:[%s5500_s1 + $0x578] sm:$0xff]  }
  0x81   : > { %2774 = vmatprep.mubr.bf16.mxu1 %v4438_v37  ;;  %v4508_v33 = vld [vmem:[%s4732_s13 + $0x44] ss:$100 sps:$4 sm:$0xff]   ;;  %v4513_v37 = vld [vmem:[%s5500_s1 + $0x5f8] sm:$0xff]  }
  0x82   : > { %3960 = vmatpush3.bf16.msra.mxu0 %v4434_v34  ;;  %v4509_v34 = vld [vmem:[%s4732_s13 + $0x48] ss:$100 sps:$4 sm:$0xff]  }
  0x83   : > { %4000 = vmatpush3.bf16.msra.mxu1 %v4435_v35  ;;  %3961 = vmatprep.subr.bf16.mxu0 %v4442_v40  ;;  %v4511_v35 = vld [vmem:[%s4732_s13 + $0x4c] ss:$100 sps:$4 sm:$0xff]  }
  0x84   : > { %4001 = vmatprep.subr.bf16.mxu1 %v4443_v41  ;;  %v4516_v40 = vld [vmem:[%s5500_s1 + $0x570] sm:$0xff]  }
  0x85   : > { %2710 = vmatmul.mubr.bf16.gmra.mxu0 %v4440_v38  ;;  %v4514_v38 = vld [vmem:[%s5500_s1 + $0x538] sm:$0xff]   ;;  %v4517_v41 = vld [vmem:[%s5500_s1 + $0x5f0] sm:$0xff]  }
  0x86   : > { %2775 = vmatmul.mubr.bf16.gmra.mxu1 %v4441_v39  ;;  %3962 = vmatpush3.bf16.msra.mxu0 %v4444_v42  ;;  %v4515_v39 = vld [vmem:[%s5500_s1 + $0x5b8] sm:$0xff]   ;;  %v4518_v42 = vld [vmem:[%s5500_s1 + $0x530] sm:$0xff]  }
  0x87   : > { %4002 = vmatpush3.bf16.msra.mxu1 %v4445_v43  ;;  %3963 = vmatprep.subr.bf16.mxu0 %v4446_v44  ;;  %v4519_v43 = vld [vmem:[%s5500_s1 + $0x5b0] sm:$0xff]  }
  0x88   : > { %4003 = vmatprep.subr.bf16.mxu1 %v4447_v45  ;;  %2815 = vmatprep.mubr.bf16.mxu0 %v4452_v49  ;;  %v4520_v44 = vld [vmem:[%s4732_s13 + $0x10c] ss:$100 sps:$4 sm:$0xff]   ;;  %v4522_v45 = vld [vmem:[%s4732_s13 + $0x114] ss:$100 sps:$4 sm:$0xff]  }
  0x89   : > { %2880 = vmatprep.mubr.bf16.mxu1 %v4455_v51  ;;  %v4527_v49 = vld [vmem:[%s5500_s1 + $0x5e8] sm:$0xff]  }
  0x8a   : > { %3964 = vmatpush3.bf16.msra.mxu0 %v4448_v46  ;;  %v4524_v46 = vld [vmem:[%s4732_s13 + $0x108] ss:$100 sps:$4 sm:$0xff]  }
  0x8b   : > { %4004 = vmatpush3.bf16.msra.mxu1 %v4449_v47  ;;  %4029 = vmatprep.subr.bf16.mxu0 %v4456_v52  ;;  %v4525_v47 = vld [vmem:[%s4732_s13 + $0x110] ss:$100 sps:$4 sm:$0xff]   ;;  %v4529_v51 = vld [vmem:[%s5500_s1 + $0x5a8] sm:$0xff]   ;;  %v4530_v52 = vld [vmem:[%s5500_s1 + $0x560] sm:$0xff]  }
  0x8c   : > { %4069 = vmatprep.subr.bf16.mxu1 %v4457_v53  ;;  %v4531_v53 = vld [vmem:[%s5500_s1 + $0x5e0] sm:$0xff]  }
  0x8d   : > { %2816 = vmatmul.mubr.bf16.vlgmr.msra.gmra.mxu0 %v4450_v48  ;;  %v4526_v48 = vld [vmem:[%s5500_s1 + $0x568] sm:$0xff]  }
  0x8e   : > { %2881 = vmatmul.mubr.bf16.vlgmr.msra.gmra.mxu1 %v4453_v50  ;;  %4030 = vmatpush3.bf16.msra.mxu0 %v4458_v54  ;;  %v4528_v50 = vld [vmem:[%s5500_s1 + $0x528] sm:$0xff]   ;;  %v4532_v54 = vld [vmem:[%s5500_s1 + $0x520] sm:$0xff]  }
  0x8f   : > { %4070 = vmatpush3.bf16.msra.mxu1 %v4459_v55  ;;  %4031 = vmatprep.subr.bf16.mxu0 %v4460_v56  ;;  %v4533_v55 = vld [vmem:[%s5500_s1 + $0x5a0] sm:$0xff]   ;;  %v4534_v56 = vld [vmem:[%s4732_s13 + $0x1d4] ss:$100 sps:$4 sm:$0xff]  }
  0x90   : > { %4071 = vmatprep.subr.bf16.mxu1 %v4461_v57  ;;  %2823 = vmatprep.mubr.bf16.mxu0 %v4464_v60  ;;  %v4536_v57 = vld [vmem:[%s4732_s13 + $0x1dc] ss:$100 sps:$4 sm:$0xff]  }
  0x91   : > { %2888 = vmatprep.mubr.bf16.mxu1 %v4466_v61  ;;  %v4540_v60 = vld [vmem:[%s5500_s1 + $0x558] sm:$0xff]  }
  0x92   : > { %4032 = vmatpush3.bf16.msra.mxu0 %v4462_v58  ;;  %v4538_v58 = vld [vmem:[%s4732_s13 + $0x1d0] ss:$100 sps:$4 sm:$0xff]   ;;  %v4541_v61 = vld [vmem:[%s5500_s1 + $0x5d8] sm:$0xff]  }
  0x93   : > { %4072 = vmatpush3.bf16.msra.mxu1 %v4463_v59  ;;  %4033 = vmatprep.subr.bf16.mxu0 %v4470_v0  ;;  %v4539_v59 = vld [vmem:[%s4732_s13 + $0x1d8] ss:$100 sps:$4 sm:$0xff]  }
  0x94   : > { %4073 = vmatprep.subr.bf16.mxu1 %v4471_v1  ;;  %v4543_v1 = vld [vmem:[%s5500_s1 + $0x598] sm:$0xff]  }
  0x95   : > { %2824 = vmatmul.mubr.bf16.gmra.mxu0 %v4468_v62 }
  0x96   : > { %2889 = vmatmul.mubr.bf16.gmra.mxu1 %v4469_v63  ;;  %4034 = vmatpush3.bf16.msra.mxu0 %v4472_v2  ;;  %v4542_v63 = vld [vmem:[%s5500_s1 + $0x518] sm:$0xff]  }
  0x97   : > { %4074 = vmatpush3.bf16.msra.mxu1 %v4473_v3  ;;  %4035 = vmatprep.subr.bf16.mxu0 %v4474_v4  ;;  %v4544_v3 = vld [vmem:[%s5500_s1 + $0x550] sm:$0xff]  }
  0x98   : > { %4075 = vmatprep.subr.bf16.mxu1 %v4475_v5  ;;  %2831 = vmatprep.mubr.bf16.mxu0 %v4478_v8 }
  0x99   : > { %2896 = vmatprep.mubr.bf16.mxu1 %v4480_v9  ;;  %v4546_v9 = vld [vmem:[%s5500_s1 + $0x510] sm:$0xff]  }
  0x9a   : > { %4036 = vmatpush3.bf16.msra.mxu0 %v4476_v6  ;;  %v4545_v6 = vld [vmem:[%s5500_s1 + $0x5d0] sm:$0xff]  }
  0x9b   : > { %4076 = vmatpush3.bf16.msra.mxu1 %v4477_v7  ;;  %4037 = vmatprep.subr.bf16.mxu0 %v4484_v12 }
  0x9c   : > { %4077 = vmatprep.subr.bf16.mxu1 %v4485_v13  ;;  %v4548_v13 = vld [vmem:[%s4732_s13 + $0x29c] ss:$100 sps:$4 sm:$0xff]  }
  0x9d   : > { %2832 = vmatmul.mubr.bf16.gmra.mxu0 %v4482_v10 }
  0x9e   : > { %2897 = vmatmul.mubr.bf16.gmra.mxu1 %v4483_v11  ;;  %4038 = vmatpush3.bf16.msra.mxu0 %v4486_v14  ;;  %v4547_v11 = vld [vmem:[%s5500_s1 + $0x590] sm:$0xff]  }
  0x9f   : > { %4078 = vmatpush3.bf16.msra.mxu1 %v4487_v15  ;;  %4039 = vmatprep.subr.bf16.mxu0 %v4488_v16  ;;  %v4550_v16 = vld [vmem:[%s4732_s13 + $0x2a4] ss:$100 sps:$4 sm:$0xff]  }
  0xa0   : > { %4079 = vmatprep.subr.bf16.mxu1 %v4489_v17  ;;  %2839 = vmatprep.mubr.bf16.mxu0 %v4492_v20  ;;  %v4552_v17 = vld [vmem:[%s4732_s13 + $0x298] ss:$100 sps:$4 sm:$0xff]   ;;  %v4554_v20 = vld [vmem:[%s5500_s1 + $0x548] sm:$0xff]  }
  0xa1   : > { %2904 = vmatprep.mubr.bf16.mxu1 %v4494_v21 }
  0xa2   : > { %4040 = vmatpush3.bf16.msra.mxu0 %v4490_v18 }
  0xa3   : > { %4080 = vmatpush3.bf16.msra.mxu1 %v4491_v19  ;;  %4041 = vmatprep.subr.bf16.mxu0 %v4498_v24  ;;  %v4553_v19 = vld [vmem:[%s4732_s13 + $0x2a0] ss:$100 sps:$4 sm:$0xff]   ;;  %v4556_v24 = vld [vmem:[%s5500_s1 + $0x508] sm:$0xff]  }
  0xa4   : > { %4081 = vmatprep.subr.bf16.mxu1 %v4499_v25 }
  0xa5   : > { %2840 = vmatmul.mubr.bf16.gmra.mxu0 %v4496_v22  ;;  %v4555_v22 = vld [vmem:[%s5500_s1 + $0x5c8] sm:$0xff]  }
  0xa6   : > { %2905 = vmatmul.mubr.bf16.gmra.mxu1 %v4497_v23  ;;  %4042 = vmatpush3.bf16.msra.mxu0 %v4500_v26  ;;  %v4557_v26 = vld [vmem:[%s5500_s1 + $0x588] sm:$0xff]  }
  0xa7   : > { %4082 = vmatpush3.bf16.msra.mxu1 %v4501_v27  ;;  %4043 = vmatprep.subr.bf16.mxu0 %v4502_v28 }
  0xa8   : > { %4083 = vmatprep.subr.bf16.mxu1 %v4503_v29  ;;  %2945 = vmatprep.mubr.bf16.mxu0 %v4508_v33  ;;  %v4558_v29 = vld [vmem:[%s5500_s1 + $0x540] sm:$0xff]  }
  0xa9   : > { %3010 = vmatprep.mubr.bf16.mxu1 %v4511_v35 }
  0xaa   : > { %4044 = vmatpush3.bf16.msra.mxu0 %v4504_v30 }
  0xab   : > { %4084 = vmatpush3.bf16.msra.mxu1 %v4505_v31  ;;  %4109 = vmatprep.subr.bf16.mxu0 %v4512_v36  ;;  %v4561_v36 = vld [vmem:[%s5500_s1 + $0x580] sm:$0xff]  }
  0xac   : > { %4149 = vmatprep.subr.bf16.mxu1 %v4513_v37 }
  0xad   : > { %2946 = vmatmul.mubr.bf16.vlgmr.msra.gmra.mxu0 %v4506_v32  ;;  %v4559_v32 = vld [vmem:[%s5500_s1 + $0x5c0] sm:$0xff]  }
  0xae   : > { %3011 = vmatmul.mubr.bf16.vlgmr.msra.gmra.mxu1 %v4509_v34  ;;  %4110 = vmatpush3.bf16.msra.mxu0 %v4514_v38  ;;  %v4560_v34 = vld [vmem:[%s5500_s1 + $0x500] sm:$0xff]  }
  0xaf   : > { %4150 = vmatpush3.bf16.msra.mxu1 %v4515_v39  ;;  %4111 = vmatprep.subr.bf16.mxu0 %v4516_v40  ;;  %v4562_v39 = vld [vmem:[%s4732_s13 + $0x50] ss:$100 sps:$4 sm:$0xff]  }
  0xb0   : > { %4151 = vmatprep.subr.bf16.mxu1 %v4517_v41  ;;  %2953 = vmatprep.mubr.bf16.mxu0 %v4520_v44  ;;  %v4564_v40 = vld [vmem:[%s4732_s13 + $0x54] ss:$100 sps:$4 sm:$0xff]  }
  0xb1   : > { %3018 = vmatprep.mubr.bf16.mxu1 %v4522_v45  ;;  %v4568_v44 = vld [vmem:[%s5500_s1 + $0x638] sm:$0xff]   ;;  %v4569_v45 = vld [vmem:[%s5500_s1 + $0x630] sm:$0xff]  }
  0xb2   : > { %4112 = vmatpush3.bf16.msra.mxu0 %v4518_v42  ;;  %v4565_v42 = vld [vmem:[%s4732_s13 + $0x58] ss:$100 sps:$4 sm:$0xff]  }
  0xb3   : > { %4152 = vmatpush3.bf16.msra.mxu1 %v4519_v43  ;;  %4113 = vmatprep.subr.bf16.mxu0 %v4526_v48  ;;  %v4567_v43 = vld [vmem:[%s4732_s13 + $0x5c] ss:$100 sps:$4 sm:$0xff]  }
  0xb4   : > { %4153 = vmatprep.subr.bf16.mxu1 %v4527_v49  ;;  %v4572_v49 = vld [vmem:[%s4732_s13 + $0x124] ss:$100 sps:$4 sm:$0xff]  }
  0xb5   : > { %2954 = vmatmul.mubr.bf16.gmra.mxu0 %v4524_v46 }
  0xb6   : > { %3019 = vmatmul.mubr.bf16.gmra.mxu1 %v4525_v47  ;;  %4114 = vmatpush3.bf16.msra.mxu0 %v4528_v50  ;;  %v4570_v47 = vld [vmem:[%s4732_s13 + $0x11c] ss:$100 sps:$4 sm:$0xff]  }
  0xb7   : > { %4154 = vmatpush3.bf16.msra.mxu1 %v4529_v51  ;;  %4115 = vmatprep.subr.bf16.mxu0 %v4530_v52  ;;  %v4574_v51 = vld [vmem:[%s4732_s13 + $0x118] ss:$100 sps:$4 sm:$0xff]  }
  0xb8   : > { %4155 = vmatprep.subr.bf16.mxu1 %v4531_v53  ;;  %2961 = vmatprep.mubr.bf16.mxu0 %v4534_v56 }
  0xb9   : > { %3026 = vmatprep.mubr.bf16.mxu1 %v4536_v57  ;;  %v4575_v57 = vld [vmem:[%s4732_s13 + $0x120] ss:$100 sps:$4 sm:$0xff]  }
  0xba   : > { %4116 = vmatpush3.bf16.msra.mxu0 %v4532_v54  ;;  %v4576_v54 = vld [vmem:[%s5500_s1 + $0x628] sm:$0xff]  }
  0xbb   : > { %4156 = vmatpush3.bf16.msra.mxu1 %v4533_v55  ;;  %4117 = vmatprep.subr.bf16.mxu0 %v4540_v60 }
  0xbc   : > { %4157 = vmatprep.subr.bf16.mxu1 %v4541_v61  ;;  %v4577_v61 = vld [vmem:[%s5500_s1 + $0x620] sm:$0xff]  }
  0xbd   : > { %2962 = vmatmul.mubr.bf16.gmra.mxu0 %v4538_v58 }
  0xbe   : > { %3027 = vmatmul.mubr.bf16.gmra.mxu1 %v4539_v59  ;;  %4118 = vmatpush3.bf16.msra.mxu0 %v4542_v63  ;;  %v4578_v59 = vld [vmem:[%s4732_s13 + $0x1e4] ss:$100 sps:$4 sm:$0xff]  }
  0xbf   : > { %4158 = vmatpush3.bf16.msra.mxu1 %v4543_v1  ;;  %4119 = vmatprep.subr.bf16.mxu0 %v4544_v3 }
  0xc0   : > { %4159 = vmatprep.subr.bf16.mxu1 %v4545_v6  ;;  %2969 = vmatprep.mubr.bf16.mxu0 %v4548_v13  ;;  %v4582_v6 = vld [vmem:[%s4732_s13 + $0x1e0] ss:$100 sps:$4 sm:$0xff]  }
  0xc1   : > { %3034 = vmatprep.mubr.bf16.mxu1 %v4550_v16  ;;  %v4585_v16 = vld [vmem:[%s5500_s1 + $0x610] sm:$0xff]  }
  0xc2   : > { %4120 = vmatpush3.bf16.msra.mxu0 %v4546_v9  ;;  %v4586_v9 = vld [vmem:[%s4732_s13 + $0x2ac] ss:$100 sps:$4 sm:$0xff]  }
  0xc3   : > { %4160 = vmatpush3.bf16.msra.mxu1 %v4547_v11  ;;  %4121 = vmatprep.subr.bf16.mxu0 %v4554_v20 }
  0xc4   : > { %4161 = vmatprep.subr.bf16.mxu1 %v4555_v22 }
  0xc5   : > { %2970 = vmatmul.mubr.bf16.gmra.mxu0 %v4552_v17 }
  0xc6   : > { %3035 = vmatmul.mubr.bf16.gmra.mxu1 %v4553_v19  ;;  %4122 = vmatpush3.bf16.msra.mxu0 %v4556_v24  ;;  %v4592_v24 = vld [vmem:[%s5500_s1 + $0x608] sm:$0xff]  }
  0xc7   : > { %4162 = vmatpush3.bf16.msra.mxu1 %v4557_v26  ;;  %4123 = vmatprep.subr.bf16.mxu0 %v4558_v29  ;;  %v4590_v26 = vld [vmem:[%s4732_s13 + $0x2a8] ss:$100 sps:$4 sm:$0xff]  }
  0xc8   : > { %4163 = vmatprep.subr.bf16.mxu1 %v4559_v32  ;;  %3075 = vmatprep.mubr.bf16.mxu0 %v4564_v40 }
  0xc9   : > { %3140 = vmatprep.mubr.bf16.mxu1 %v4567_v43 }
  0xca   : > { %4124 = vmatpush3.bf16.msra.mxu0 %v4560_v34  ;;  %v4594_v34 = vld [vmem:[%s4732_s13 + $0x60] ss:$100 sps:$4 sm:$0xff]  }
  0xcb   : > { %4164 = vmatpush3.bf16.msra.mxu1 %v4561_v36  ;;  %4201 = vmatprep.subr.bf16.mxu0 %v4568_v44 }
  0xcc   : > { %4225 = vmatprep.subr.bf16.mxu1 %v4568_v44 }
  0xcd   : > { %3076 = vmatmul.mubr.bf16.vlgmr.msra.gmra.mxu0 %v4562_v39 }
  0xce   : > { %3141 = vmatmul.mubr.bf16.vlgmr.msra.gmra.mxu1 %v4565_v42  ;;  %4202 = vmatpush3.bf16.msra.mxu0 %v4568_v44  ;;  %v4595_v42 = vld [vmem:[%s4732_s13 + $0x1f0] ss:$100 sps:$4 sm:$0xff]  }
  0xcf   : > { %4233 = vmatpush3.bf16.msra.mxu1 %v4568_v44  ;;  %4203 = vmatprep.subr.bf16.mxu0 %v4569_v45 }
  0xd0   : > { %4226 = vmatprep.subr.bf16.mxu1 %v4569_v45  ;;  %3083 = vmatprep.mubr.bf16.mxu0 %v4570_v47 }
  0xd1   : > { %3148 = vmatprep.mubr.bf16.mxu1 %v4572_v49 }
  0xd2   : > { %4204 = vmatpush3.bf16.msra.mxu0 %v4569_v45 }
  0xd3   : > { %4234 = vmatpush3.bf16.msra.mxu1 %v4569_v45  ;;  %4205 = vmatprep.subr.bf16.mxu0 %v4576_v54 }
  0xd4   : > { %4227 = vmatprep.subr.bf16.mxu1 %v4576_v54 }
  0xd5   : > { %3084 = vmatmul.mubr.bf16.gmra.mxu0 %v4574_v51 }
  0xd6   : > { %3149 = vmatmul.mubr.bf16.gmra.mxu1 %v4575_v57  ;;  %3091 = vmatprep.mubr.bf16.mxu0 %v4578_v59  ;;  %v4597_v57 = vld [vmem:[%s4732_s13 + $0x2b8] ss:$100 sps:$4 sm:$0xff]  }
  0xd7   : > { %4206 = vmatpush3.bf16.msra.mxu0 %v4576_v54  ;;  %4235 = vmatpush3.bf16.msra.mxu1 %v4576_v54 }
  0xd8   : > { %4207 = vmatprep.subr.bf16.mxu0 %v4577_v61  ;;  %4228 = vmatprep.subr.bf16.mxu1 %v4577_v61 }
  0xdb   : > { %4208 = vmatpush3.bf16.msra.mxu0 %v4577_v61  ;;  %4236 = vmatpush3.bf16.msra.mxu1 %v4577_v61 }
  0xdd   : > { %3092 = vmatmul.mubr.bf16.gmra.mxu0 %v4582_v6 }
  0xde   : > { %3099 = vmatprep.mubr.bf16.mxu0 %v4586_v9 }
  0xe5   : > { %3100 = vmatmul.mubr.bf16.gmra.mxu0 %v4590_v26 }
  0xe6   : > { %4217 = vmatprep.mubr.bf16.mxu0 %v4594_v34 }
  0xed   : > { %v3725_v62 = vpop.f32.mrf.mxu0 }
  0xee   : > { %v3765_v0 = vpop.f32.mrf.mxu1 }
  0xef   : > { %v3726_v2 = vpop.f32.mrf.mxu0 }
  0xf0   : > { %v5263_v4 = vadd.f32 %v3726_v2, %v3725_v62  ;;  %v3766_v5 = vpop.f32.mrf.mxu1  ;;  %v4580_v62 = vld [vmem:[%s4732_s13 + $0x1ec] ss:$100 sps:$4 sm:$0xff]   ;;  %v4584_v2 = vld [vmem:[%s5500_s1 + $0x618] sm:$0xff]  }
  0xf1   : > { %v5268_v7 = vadd.f32 %v3766_v5, %v3765_v0  ;;  %v3728_v8 = vpop.f32.mrf.mxu0  ;;  %3156 = vmatprep.mubr.bf16.mxu1 %v4580_v62  ;;  %4209 = vmatprep.subr.bf16.mxu0 %v4584_v2 }
  0xf2   : > { %v3768_v10 = vpop.f32.mrf.mxu1  ;;  %4229 = vmatprep.subr.bf16.mxu1 %v4584_v2  ;;  %4210 = vmatpush3.bf16.msra.mxu0 %v4584_v2 }
  0xf3   : > { %v3729_v12 = vpop.f32.mrf.mxu0  ;;  %4237 = vmatpush3.bf16.msra.mxu1 %v4584_v2  ;;  %4211 = vmatprep.subr.bf16.mxu0 %v4585_v16 }
  0xf4   : > { %v5277_v14 = vadd.f32 %v3729_v12, %v3728_v8  ;;  %v3769_v15 = vpop.f32.mrf.mxu1  ;;  %v4583_v8 = vld [vmem:[%s4732_s13 + $0x1e8] ss:$100 sps:$4 sm:$0xff]   ;;  %v4588_v12 = vld [vmem:[%s4732_s13 + $0x2b4] ss:$100 sps:$4 sm:$0xff]   ;;  %4230 = vmatprep.subr.bf16.mxu1 %v4585_v16 }
  0xf5   : > { %v5281_v18 = vadd.f32 %v3769_v15, %v3768_v10  ;;  %v3731_v21 = vpop.f32.mrf.mxu0  ;;  %3157 = vmatmul.mubr.bf16.gmra.mxu1 %v4583_v8 }
  0xf6   : > { %v3771_v23 = vpop.f32.mrf.mxu1  ;;  %3164 = vmatprep.mubr.bf16.mxu1 %v4588_v12  ;;  %4212 = vmatpush3.bf16.msra.mxu0 %v4585_v16 }
  0xf7   : > { %v3732_v25 = vpop.f32.mrf.mxu0  ;;  %4238 = vmatpush3.bf16.msra.mxu1 %v4585_v16  ;;  %4213 = vmatprep.subr.bf16.mxu0 %v4592_v24 }
  0xf8   : > { %v5296_v27 = vadd.f32 %v3732_v25, %v3731_v21  ;;  %v3772_v28 = vpop.f32.mrf.mxu1  ;;  %v3367_v25 = vld [vmem:[%s5501_s2] ss:$0 sm:$0xff]  ;;  %4231 = vmatprep.subr.bf16.mxu1 %v4592_v24 }
  0xf9   : > { %v5301_v30 = vadd.f32 %v3772_v28, %v3771_v23  ;;  %v3734_v31 = vpop.f32.mrf.mxu0  ;;  %v2428_v28 = vadd.f32 %v5263_v4, %v3367_v25  ;;  %v2431_v29 = vadd.f32 %v5277_v14, %v3367_v25 }
  0xfa   : > { %v3774_v33 = vpop.f32.mrf.mxu1  ;;  %4214 = vmatpush3.bf16.msra.mxu0 %v4592_v24 }
  0xfb   : > { %v3735_v35 = vpop.f32.mrf.mxu0  ;;  %v2493_v43 = vadd.f32 %v5268_v7, %v2428_v28  ;;  %v2496_v4 = vadd.f32 %v5281_v18, %v2431_v29  ;;  %4239 = vmatpush3.bf16.msra.mxu1 %v4592_v24 }
  0xfc   : > { %v5312_v37 = vadd.f32 %v3735_v35, %v3734_v31  ;;  %v3775_v38 = vpop.f32.mrf.mxu1  ;;  %v2436_v31 = vadd.f32 %v5296_v27, %v3367_v25 }
  0xfd   : > { %v5316_v41 = vadd.f32 %v3775_v38, %v3774_v33  ;;  %v3737_v46 = vpop.f32.mrf.mxu0  ;;  %v4591_v33 = vld [vmem:[%s4732_s13 + $0x2b0] ss:$100 sps:$4 sm:$0xff]  }
  0xfe   : > { %v3777_v48 = vpop.f32.mrf.mxu1  ;;  %v2439_v32 = vadd.f32 %v5312_v37, %v3367_v25  ;;  %v2501_v14 = vadd.f32 %v5301_v30, %v2436_v31  ;;  %v4593_v37 = vld [vmem:[%s5500_s1 + $0x600] sm:$0xff]   ;;  %3165 = vmatmul.mubr.bf16.gmra.mxu1 %v4591_v33 }
  0xff   : > { %v3738_v50 = vpop.f32.mrf.mxu0  ;;  %4221 = vmatprep.mubr.bf16.mxu1 %v4595_v42  ;;  %4215 = vmatprep.subr.bf16.mxu0 %v4593_v37 }
 0x100   : > { %v5329_v52 = vadd.f32 %v3738_v50, %v3737_v46  ;;  %v3778_v53 = vpop.f32.mrf.mxu1  ;;  %v2504_v27 = vadd.f32 %v5316_v41, %v2439_v32  ;;  %4232 = vmatprep.subr.bf16.mxu1 %v4593_v37  ;;  %4216 = vmatpush3.bf16.msra.mxu0 %v4593_v37 }
 0x101   : > { %v5334_v55 = vadd.f32 %v3778_v53, %v3777_v48  ;;  %v3740_v56 = vpop.f32.mrf.mxu0  ;;  %4240 = vmatpush3.bf16.msra.mxu1 %v4593_v37 }
 0x102   : > { %v3780_v58 = vpop.f32.mrf.mxu1  ;;  %v2444_v35 = vadd.f32 %v5329_v52, %v3367_v25 }
 0x103   : > { %v3741_v60 = vpop.f32.mrf.mxu0 }
 0x104   : > { %v3742_v63 = vadd.f32 %v3741_v60, %v3740_v56  ;;  %v3781_v0 = vpop.f32.mrf.mxu1  ;;  %v2509_v44 = vadd.f32 %v5334_v55, %v2444_v35  ;;  %v4596_v55 = vld [vmem:[%s4732_s13 + $0x128] ss:$100 sps:$4 sm:$0xff]   ;;  %s3366_s13 = sshll.u32 %s5526_s19, 2 }
 0x105   : > { %v3782_v1 = vadd.f32 %v3781_v0, %v3780_v58  ;;  %v3743_v3 = vpop.f32.mrf.mxu0  ;;  %4218 = vmatmul.mubr.bf16.vlgmr.msra.gmra.mxu0 %v4596_v55  ;;  %s175_s9 = scalar_lea.vmem %s5502_s3, %s3366_s13 }
 0x106   : > { %v3783_v5 = vpop.f32.mrf.mxu1  ;;  %v2447_v36 = vadd.f32 %v3742_v63, %v3367_v25  ;;  %4222 = vmatmul.mubr.bf16.vlgmr.msra.gmra.mxu1 %v4597_v57 }
 0x107   : > { %v3744_v10 = vpop.f32.mrf.mxu0 }
 0x108   : > { %v3784_v11 = vpop.f32.mrf.mxu1  ;;  %v3745_v13 = vadd.f32 %v3744_v10, %v3743_v3  ;;  %v5375_v45 = vadd.f32 %v3782_v1, %v2447_v36 }
 0x109   : > { %v3785_v15 = vadd.f32 %v3784_v11, %v3783_v5  ;;  %v3746_v17 = vpop.f32.mrf.mxu0 }
 0x10a   : > { %v3786_v19 = vpop.f32.mrf.mxu1  ;;  %v2452_v38 = vadd.f32 %v3745_v13, %v3367_v25 }
 0x10b   : > { %v3747_v20 = vpop.f32.mrf.mxu0 }
 0x10c   : > { %v3787_v21 = vpop.f32.mrf.mxu1  ;;  %v3748_v22 = vadd.f32 %v3747_v20, %v3746_v17  ;;  %v5377_v46 = vadd.f32 %v3785_v15, %v2452_v38 }
 0x10d   : > { %v3788_v23 = vadd.f32 %v3787_v21, %v3786_v19  ;;  %v3805_v40 = vpop.f32.mrf.mxu0 }
 0x10e   : > { %v2455_v39 = vadd.f32 %v3748_v22, %v3367_v25  ;;  %v3845_v47 = vpop.f32.mrf.mxu1 }
 0x10f   : > { %v3806_v7 = vpop.f32.mrf.mxu0 }
 0x110   : > { %v5379_v18 = vadd.f32 %v3788_v23, %v2455_v39  ;;  %v3807_v30 = vadd.f32 %v3806_v7, %v3805_v40  ;;  %v3846_v41 = vpop.f32.mrf.mxu1 }
 0x111   : > { %v3808_v48 = vpop.f32.mrf.mxu0  ;;  %v3847_v50 = vadd.f32 %v3846_v41, %v3845_v47 }
 0x112   : > { %v2558_v49 = vadd.f32 %v3807_v30, %v2493_v43  ;;  %v3848_v51 = vpop.f32.mrf.mxu1 }
 0x113   : > { %v3809_v52 = vpop.f32.mrf.mxu0 }
 0x114   : > { %v5381_v53 = vadd.f32 %v3847_v50, %v2558_v49  ;;  %v3810_v54 = vadd.f32 %v3809_v52, %v3808_v48  ;;  %v3849_v56 = vpop.f32.mrf.mxu1 }
 0x115   : > { %v3850_v59 = vadd.f32 %v3849_v56, %v3848_v51  ;;  %v3811_v61 = vpop.f32.mrf.mxu0 }
 0x116   : > { %v2561_v58 = vadd.f32 %v3810_v54, %v2496_v4  ;;  %v3851_v62 = vpop.f32.mrf.mxu1 }
 0x117   : > { %v3812_v63 = vpop.f32.mrf.mxu0 }
 0x118   : > { %v5385_v60 = vadd.f32 %v3850_v59, %v2561_v58  ;;  %v3813_v0 = vadd.f32 %v3812_v63, %v3811_v61  ;;  %v3852_v1 = vpop.f32.mrf.mxu1 }
 0x119   : > { %v3853_v2 = vadd.f32 %v3852_v1, %v3851_v62  ;;  %v3814_v3 = vpop.f32.mrf.mxu0 }
 0x11a   : > { %v2566_v5 = vadd.f32 %v3813_v0, %v2501_v14  ;;  %v3854_v6 = vpop.f32.mrf.mxu1 }
 0x11b   : > { %v3815_v8 = vpop.f32.mrf.mxu0 }
 0x11c   : > { %v2631_v9 = vadd.f32 %v3853_v2, %v2566_v5  ;;  %v3816_v10 = vadd.f32 %v3815_v8, %v3814_v3  ;;  %v3855_v11 = vpop.f32.mrf.mxu1 }
 0x11d   : > { %v3856_v12 = vadd.f32 %v3855_v11, %v3854_v6  ;;  %v3817_v16 = vpop.f32.mrf.mxu0 }
 0x11e   : > { %v2569_v13 = vadd.f32 %v3816_v10, %v2504_v27  ;;  %v3857_v17 = vpop.f32.mrf.mxu1 }
 0x11f   : > { %v3818_v19 = vpop.f32.mrf.mxu0 }
 0x120   : > { %v5387_v15 = vadd.f32 %v3856_v12, %v2569_v13  ;;  %v3858_v20 = vpop.f32.mrf.mxu1  ;;  %v3819_v21 = vadd.f32 %v3818_v19, %v3817_v16 }
 0x121   : > { %v3859_v22 = vadd.f32 %v3858_v20, %v3857_v17  ;;  %v3820_v23 = vpop.f32.mrf.mxu0 }
 0x122   : > { %v3860_v24 = vpop.f32.mrf.mxu1  ;;  %v2574_v25 = vadd.f32 %v3819_v21, %v2509_v44 }
 0x123   : > { %v3821_v26 = vpop.f32.mrf.mxu0 }
 0x124   : > { %v3861_v28 = vpop.f32.mrf.mxu1  ;;  %v2639_v29 = vadd.f32 %v3859_v22, %v2574_v25  ;;  %v3822_v31 = vadd.f32 %v3821_v26, %v3820_v23 }
 0x125   : > { %v3862_v32 = vadd.f32 %v3861_v28, %v3860_v24  ;;  %v3823_v34 = vpop.f32.mrf.mxu0 }
 0x126   : > { %v2577_v33 = vadd.f32 %v3822_v31, %v5375_v45  ;;  %v3863_v36 = vpop.f32.mrf.mxu1 }
 0x127   : > { %v3824_v38 = vpop.f32.mrf.mxu0 }
 0x128   : > { %v2642_v35 = vadd.f32 %v3862_v32, %v2577_v33  ;;  %v3825_v39 = vadd.f32 %v3824_v38, %v3823_v34  ;;  %v3864_v40 = vpop.f32.mrf.mxu1 }
 0x129   : > { %v3865_v42 = vadd.f32 %v3864_v40, %v3863_v36  ;;  %v3826_v43 = vpop.f32.mrf.mxu0 }
 0x12a   : > { %v2582_v4 = vadd.f32 %v3825_v39, %v5377_v46  ;;  %v3866_v14 = vpop.f32.mrf.mxu1 }
 0x12b   : > { %v3827_v27 = vpop.f32.mrf.mxu0 }
 0x12c   : > { %v2647_v37 = vadd.f32 %v3865_v42, %v2582_v4  ;;  %v3828_v44 = vadd.f32 %v3827_v27, %v3826_v43  ;;  %v3867_v47 = vpop.f32.mrf.mxu1 }
 0x12d   : > { %v3868_v7 = vadd.f32 %v3867_v47, %v3866_v14  ;;  %v3885_v45 = vpop.f32.mrf.mxu0 }
 0x12e   : > { %v2585_v30 = vadd.f32 %v3828_v44, %v5379_v18  ;;  %v3925_v48 = vpop.f32.mrf.mxu1 }
 0x12f   : > { %v3886_v49 = vpop.f32.mrf.mxu0 }
 0x130   : > { %v5392_v41 = vadd.f32 %v3868_v7, %v2585_v30  ;;  %v3887_v50 = vadd.f32 %v3886_v49, %v3885_v45  ;;  %v3926_v51 = vpop.f32.mrf.mxu1 }
 0x131   : > { %v3927_v52 = vadd.f32 %v3926_v51, %v3925_v48  ;;  %v3888_v54 = vpop.f32.mrf.mxu0 }
 0x132   : > { %v2688_v55 = vadd.f32 %v3887_v50, %v5381_v53  ;;  %v3928_v46 = vpop.f32.mrf.mxu1 }
 0x133   : > { %v3889_v56 = vpop.f32.mrf.mxu0 }
 0x134   : > { %v2753_v57 = vadd.f32 %v3927_v52, %v2688_v55  ;;  %v3890_v58 = vadd.f32 %v3889_v56, %v3888_v54  ;;  %v3929_v59 = vpop.f32.mrf.mxu1 }
 0x135   : > { %v3930_v61 = vadd.f32 %v3929_v59, %v3928_v46  ;;  %v3891_v63 = vpop.f32.mrf.mxu0 }
 0x136   : > { %v2691_v62 = vadd.f32 %v3890_v58, %v5385_v60  ;;  %v3931_v0 = vpop.f32.mrf.mxu1 }
 0x137   : > { %v3892_v1 = vpop.f32.mrf.mxu0 }
 0x138   : > { %v5396_v18 = vadd.f32 %v3930_v61, %v2691_v62  ;;  %v3932_v2 = vpop.f32.mrf.mxu1  ;;  %v3893_v3 = vadd.f32 %v3892_v1, %v3891_v63 }
 0x139   : > { %v3933_v5 = vadd.f32 %v3932_v2, %v3931_v0  ;;  %v3894_v6 = vpop.f32.mrf.mxu0 }
 0x13a   : > { %v3934_v8 = vpop.f32.mrf.mxu1  ;;  %v2696_v10 = vadd.f32 %v3893_v3, %v2631_v9 }
 0x13b   : > { %v3895_v53 = vpop.f32.mrf.mxu0 }
 0x13c   : > { %v3935_v11 = vpop.f32.mrf.mxu1  ;;  %v2761_v12 = vadd.f32 %v3933_v5, %v2696_v10  ;;  %v3896_v13 = vadd.f32 %v3895_v53, %v3894_v6 }
 0x13d   : > { %v3936_v16 = vadd.f32 %v3935_v11, %v3934_v8  ;;  %v3897_v19 = vpop.f32.mrf.mxu0 }
 0x13e   : > { %v2699_v17 = vadd.f32 %v3896_v13, %v5387_v15  ;;  %v3937_v20 = vpop.f32.mrf.mxu1 }
 0x13f   : > { %v3898_v21 = vpop.f32.mrf.mxu0 }
 0x140   : > { %v2764_v60 = vadd.f32 %v3936_v16, %v2699_v17  ;;  %v3899_v22 = vadd.f32 %v3898_v21, %v3897_v19  ;;  %v3938_v23 = vpop.f32.mrf.mxu1 }
 0x141   : > { %v3939_v24 = vadd.f32 %v3938_v23, %v3937_v20  ;;  %v3900_v25 = vpop.f32.mrf.mxu0 }
 0x142   : > { %v2704_v26 = vadd.f32 %v3899_v22, %v2639_v29  ;;  %v3940_v28 = vpop.f32.mrf.mxu1 }
 0x143   : > { %v3901_v31 = vpop.f32.mrf.mxu0 }
 0x144   : > { %v2769_v32 = vadd.f32 %v3939_v24, %v2704_v26  ;;  %v3902_v9 = vadd.f32 %v3901_v31, %v3900_v25  ;;  %v3941_v33 = vpop.f32.mrf.mxu1 }
 0x145   : > { %v3942_v34 = vadd.f32 %v3941_v33, %v3940_v28  ;;  %v3903_v39 = vpop.f32.mrf.mxu0 }
 0x146   : > { %v2707_v36 = vadd.f32 %v3902_v9, %v2642_v35  ;;  %v3943_v15 = vpop.f32.mrf.mxu1 }
 0x147   : > { %v3904_v40 = vpop.f32.mrf.mxu0 }
 0x148   : > { %v5399_v38 = vadd.f32 %v3942_v34, %v2707_v36  ;;  %v3905_v42 = vadd.f32 %v3904_v40, %v3903_v39  ;;  %v3944_v43 = vpop.f32.mrf.mxu1 }
 0x149   : > { %v3945_v4 = vadd.f32 %v3944_v43, %v3943_v15  ;;  %v3906_v14 = vpop.f32.mrf.mxu0 }
 0x14a   : > { %v2712_v27 = vadd.f32 %v3905_v42, %v2647_v37  ;;  %v3946_v44 = vpop.f32.mrf.mxu1 }
 0x14b   : > { %v3907_v47 = vpop.f32.mrf.mxu0 }
 0x14c   : > { %v2777_v29 = vadd.f32 %v3945_v4, %v2712_v27  ;;  %v3908_v7 = vadd.f32 %v3907_v47, %v3906_v14  ;;  %v3947_v30 = vpop.f32.mrf.mxu1 }
 0x14d   : > { %v3948_v45 = vadd.f32 %v3947_v30, %v3946_v44  ;;  %v3965_v35 = vpop.f32.mrf.mxu0 }
 0x14e   : > { %v2715_v48 = vadd.f32 %v3908_v7, %v5392_v41  ;;  %v4005_v50 = vpop.f32.mrf.mxu1 }
 0x14f   : > { %v3966_v51 = vpop.f32.mrf.mxu0 }
 0x150   : > { %v5402_v49 = vadd.f32 %v3948_v45, %v2715_v48  ;;  %v3967_v52 = vadd.f32 %v3966_v51, %v3965_v35  ;;  %v4006_v54 = vpop.f32.mrf.mxu1 }
 0x151   : > { %v4007_v55 = vadd.f32 %v4006_v54, %v4005_v50  ;;  %v3968_v46 = vpop.f32.mrf.mxu0 }
 0x152   : > { %v2818_v56 = vadd.f32 %v3967_v52, %v2753_v57  ;;  %v4008_v58 = vpop.f32.mrf.mxu1 }
 0x153   : > { %v3969_v37 = vpop.f32.mrf.mxu0 }
 0x154   : > { %v5404_v59 = vadd.f32 %v4007_v55, %v2818_v56  ;;  %v3970_v61 = vadd.f32 %v3969_v37, %v3968_v46  ;;  %v4009_v62 = vpop.f32.mrf.mxu1 }
 0x155   : > { %v4010_v63 = vadd.f32 %v4009_v62, %v4008_v58  ;;  %v3971_v41 = vpop.f32.mrf.mxu0 }
 0x156   : > { %v2821_v0 = vadd.f32 %v3970_v61, %v5396_v18  ;;  %v4011_v2 = vpop.f32.mrf.mxu1 }
 0x157   : > { %v3972_v3 = vpop.f32.mrf.mxu0 }
 0x158   : > { %v5407_v1 = vadd.f32 %v4010_v63, %v2821_v0  ;;  %v3973_v5 = vadd.f32 %v3972_v3, %v3971_v41  ;;  %v4012_v6 = vpop.f32.mrf.mxu1 }
 0x159   : > { %v4013_v8 = vadd.f32 %v4012_v6, %v4011_v2  ;;  %v3974_v10 = vpop.f32.mrf.mxu0 }
 0x15a   : > { %v2826_v53 = vadd.f32 %v3973_v5, %v2761_v12  ;;  %v4014_v57 = vpop.f32.mrf.mxu1 }
 0x15b   : > { %v3975_v11 = vpop.f32.mrf.mxu0 }
 0x15c   : > { %v5409_v13 = vadd.f32 %v4013_v8, %v2826_v53  ;;  %v3976_v16 = vadd.f32 %v3975_v11, %v3974_v10  ;;  %v4015_v17 = vpop.f32.mrf.mxu1 }
 0x15d   : > { %v4016_v19 = vadd.f32 %v4015_v17, %v4014_v57  ;;  %v3977_v18 = vpop.f32.mrf.mxu0 }
 0x15e   : > { %v2829_v20 = vadd.f32 %v3976_v16, %v2764_v60  ;;  %v4017_v22 = vpop.f32.mrf.mxu1 }
 0x15f   : > { %v3978_v23 = vpop.f32.mrf.mxu0 }
 0x160   : > { %v5411_v21 = vadd.f32 %v4016_v19, %v2829_v20  ;;  %v3979_v24 = vadd.f32 %v3978_v23, %v3977_v18  ;;  %v4018_v25 = vpop.f32.mrf.mxu1 }
 0x161   : > { %v4019_v26 = vadd.f32 %v4018_v25, %v4017_v22  ;;  %v3980_v28 = vpop.f32.mrf.mxu0 }
 0x162   : > { %v2834_v31 = vadd.f32 %v3979_v24, %v2769_v32  ;;  %v4020_v9 = vpop.f32.mrf.mxu1 }
 0x163   : > { %v3981_v12 = vpop.f32.mrf.mxu0 }
 0x164   : > { %v5413_v33 = vadd.f32 %v4019_v26, %v2834_v31  ;;  %v3982_v34 = vadd.f32 %v3981_v12, %v3980_v28  ;;  %v4021_v36 = vpop.f32.mrf.mxu1 }
 0x165   : > { %v4022_v39 = vadd.f32 %v4021_v36, %v4020_v9  ;;  %v3983_v40 = vpop.f32.mrf.mxu0 }
 0x166   : > { %v2837_v15 = vadd.f32 %v3982_v34, %v5399_v38  ;;  %v4023_v42 = vpop.f32.mrf.mxu1 }
 0x167   : > { %v3984_v43 = vpop.f32.mrf.mxu0 }
 0x168   : > { %v5416_v60 = vadd.f32 %v4022_v39, %v2837_v15  ;;  %v4024_v4 = vpop.f32.mrf.mxu1  ;;  %v3985_v14 = vadd.f32 %v3984_v43, %v3983_v40 }
 0x169   : > { %v3986_v27 = vpop.f32.mrf.mxu0  ;;  %v4025_v47 = vadd.f32 %v4024_v4, %v4023_v42 }
 0x16a   : > { %v5418_v44 = vpop.f32.mrf.mxu1  ;;  %v2842_v32 = vadd.f32 %v3985_v14, %v2777_v29 }
 0x16b   : > { %v3987_v7 = vpop.f32.mrf.mxu0 }
 0x16c   : > { %v5420_v30 = vadd.f32 %v4025_v47, %v2842_v32  ;;  %v4027_v45 = vpop.f32.mrf.mxu1  ;;  %v3988_v42 = vadd.f32 %v3987_v7, %v3986_v27 }
 0x16d   : > { %v4045_v48 = vpop.f32.mrf.mxu0 }
 0x16e   : > { %v5422_v35 = vpop.f32.mrf.mxu1 }
 0x16f   : > { %v4046_v38 = vpop.f32.mrf.mxu0 }
 0x170   : > { %v5424_v50 = vpop.f32.mrf.mxu1  ;;  %v4047_v32 = vadd.f32 %v4046_v38, %v4045_v48 }
 0x171   : > { %v4048_v51 = vpop.f32.mrf.mxu0 }
 0x172   : > { %v5426_v52 = vpop.f32.mrf.mxu1  ;;  %v2948_v27 = vadd.f32 %v4047_v32, %v5404_v59 }
 0x173   : > { %v4049_v54 = vpop.f32.mrf.mxu0 }
 0x174   : > { %v5428_v55 = vpop.f32.mrf.mxu1  ;;  %v4050_v7 = vadd.f32 %v4049_v54, %v4048_v51 }
 0x175   : > { %v4051_v46 = vpop.f32.mrf.mxu0 }
 0x176   : > { %v4091_v56 = vpop.f32.mrf.mxu1 }
 0x177   : > { %v4052_v29 = vpop.f32.mrf.mxu0 }
 0x178   : > { %v4092_v58 = vpop.f32.mrf.mxu1 }
 0x179   : > { %v4054_v37 = vpop.f32.mrf.mxu0 }
 0x17a   : > { %v4094_v61 = vpop.f32.mrf.mxu1 }
 0x17b   : > { %v4055_v62 = vpop.f32.mrf.mxu0 }
 0x17c   : > { %v4095_v63 = vpop.f32.mrf.mxu1 }
 0x17d   : > { %v4057_v0 = vpop.f32.mrf.mxu0 }
 0x17e   : > { %v5430_v41 = vpop.f32.mrf.mxu1 }
 0x17f   : > { %v4058_v2 = vpop.f32.mrf.mxu0 }
 0x180   : > { %v5432_v3 = vpop.f32.mrf.mxu1 }
 0x181   : > { %v4060_v5 = vpop.f32.mrf.mxu0 }
 0x182   : > { %v5434_v6 = vpop.f32.mrf.mxu1 }
 0x183   : > { %v4061_v8 = vpop.f32.mrf.mxu0 }
 0x184   : > { %v5436_v10 = vpop.f32.mrf.mxu1  ;;  %v4062_v51 = vadd.f32 %v4061_v8, %v4060_v5 }
 0x185   : > { %5503 = vst [vmem:[#allocation2_spill] sm:$0xff] %v5436_v10  ;;  %v4063_v53 = vpop.f32.mrf.mxu0 }
 0x186   : > { %v4103_v57 = vpop.f32.mrf.mxu1 }
 0x187   : > { %v4064_v11 = vpop.f32.mrf.mxu0 }
 0x188   : > { %v4104_v16 = vpop.f32.mrf.mxu1 }
 0x189   : > { %v4066_v17 = vpop.f32.mrf.mxu0  ;;  %v4105_v54 = vadd.f32 %v4104_v16, %v4103_v57 }
 0x18a   : > { %v4106_v19 = vpop.f32.mrf.mxu1 }
 0x18b   : > { %v4067_v20 = vpop.f32.mrf.mxu0 }
 0x18c   : > { %v4107_v18 = vpop.f32.mrf.mxu1 }
 0x18d   : > { %v4125_v22 = vpop.f32.mrf.mxu0 }
 0x18e   : > { %v5438_v23 = vpop.f32.mrf.mxu1 }
 0x18f   : > { %5504 = vst [vmem:[#allocation3_spill] sm:$0xff] %v5438_v23  ;;  %v4126_v24 = vpop.f32.mrf.mxu0 }
 0x190   : > { %v5440_v25 = vpop.f32.mrf.mxu1 }
 0x191   : > { %5505 = vst [vmem:[#allocation4_spill] sm:$0xff] %v5440_v25  ;;  %v5442_v26 = vpop.f32.mrf.mxu0  ;;  %v4059_v25 = vadd.f32 %v4058_v2, %v4057_v0  ;;  %v4127_v0 = vadd.f32 %v4126_v24, %v4125_v22 }
 0x192   : > { %5506 = vst [vmem:[#allocation5_spill] sm:$0xff] %v5442_v26  ;;  %v5444_v28 = vpop.f32.mrf.mxu1  ;;  %v4065_v26 = vadd.f32 %v4064_v11, %v4063_v53 }
 0x193   : > { %5507 = vst [vmem:[#allocation6_spill] sm:$0xff] %v5444_v28  ;;  %v5446_v31 = vpop.f32.mrf.mxu0  ;;  %v2845_v28 = vadd.f32 %v3988_v42, %v5402_v49 }
 0x194   : > { %5508 = vst [vmem:[#allocation7_spill] sm:$0xff] %v5446_v31  ;;  %v5448_v9 = vpop.f32.mrf.mxu1  ;;  %v4056_v31 = vadd.f32 %v4055_v62, %v4054_v37  ;;  %v4087_v37 = vadd.f32 %v5424_v50, %v5422_v35  ;;  %v4093_v62 = vadd.f32 %v4092_v58, %v4091_v56  ;;  %v4099_v50 = vadd.f32 %v5432_v3, %v5430_v41 }
 0x195   : > { %5509 = vst [vmem:[#allocation8_spill] sm:$0xff] %v5448_v9  ;;  %v4131_v12 = vpop.f32.mrf.mxu0  ;;  %v4053_v9 = vadd.f32 %v4052_v29, %v4051_v46  ;;  %v2972_v46 = vadd.f32 %v4065_v26, %v5420_v30  ;;  %v4108_v58 = vadd.f32 %v4107_v18, %v4106_v19 }
 0x196   : > { %v5450_v34 = vpop.f32.mrf.mxu1  ;;  %v2959_v49 = vadd.f32 %v4056_v31, %v5411_v21  ;;  %v3013_v11 = vadd.f32 %v4087_v37, %v2948_v27  ;;  %v4090_v21 = vadd.f32 %v5428_v55, %v5426_v52  ;;  %v5514_v55 = vld [vmem:[#allocation2_spill] sm:$0xff]  ;;  %v5515_v3 = vld [vmem:[#allocation3_spill] sm:$0xff] }
 0x197   : > { %5510 = vst [vmem:[#allocation9_spill] sm:$0xff] %v5450_v34  ;;  %v4132_v36 = vpop.f32.mrf.mxu0  ;;  %v2956_v38 = vadd.f32 %v4053_v9, %v5409_v13  ;;  %v2951_v13 = vadd.f32 %v4050_v7, %v5407_v1  ;;  %v2967_v1 = vadd.f32 %v4062_v51, %v5416_v60  ;;  %v4102_v24 = vadd.f32 %v5514_v55, %v5434_v6 }
 0x198   : > { %v5452_v39 = vpop.f32.mrf.mxu1  ;;  %v4133_v2 = vadd.f32 %v4132_v36, %v4131_v12  ;;  %v3078_v16 = vadd.f32 %v4127_v0, %v3013_v11  ;;  %v5516_v31 = vld [vmem:[#allocation4_spill] sm:$0xff] }
 0x199   : > { %5511 = vst [vmem:[#allocation10_spill] sm:$0xff] %v5452_v39  ;;  %v4134_v15 = vpop.f32.mrf.mxu0  ;;  %v4028_v39 = vadd.f32 %v4027_v45, %v5418_v44  ;;  %v4096_v44 = vadd.f32 %v4095_v63, %v4094_v61  ;;  %v2964_v45 = vadd.f32 %v4059_v25, %v5413_v33  ;;  %v3037_v33 = vadd.f32 %v4105_v54, %v2972_v46  ;;  %v5517_v18 = vld [vmem:[#allocation5_spill] sm:$0xff] }
 0x19a   : > { %v5454_v40 = vpop.f32.mrf.mxu1  ;;  %v4167_v19 = vadd.f32 %v5516_v31, %v5515_v3  ;;  %v3016_v32 = vadd.f32 %v4090_v21, %v2951_v13  ;;  %v3032_v27 = vadd.f32 %v4102_v24, %v2967_v1 }
 0x19b   : > { %5512 = vst [vmem:[#allocation11_spill] sm:$0xff] %v5454_v40  ;;  %v4135_v43 = vpop.f32.mrf.mxu0  ;;  %v4068_v40 = vadd.f32 %v4067_v20, %v4066_v17  ;;  %v2910_v48 = vadd.f32 %v4028_v39, %v2845_v28  ;;  %v3021_v20 = vadd.f32 %v4093_v62, %v2956_v38  ;;  %v3024_v35 = vadd.f32 %v4096_v44, %v2959_v49  ;;  %v5518_v9 = vld [vmem:[#allocation7_spill] sm:$0xff] }
 0x19c   : > { %v5456_v4 = vpop.f32.mrf.mxu1  ;;  %v4136_v61 = vadd.f32 %v4135_v43, %v4134_v15  ;;  %v3029_v57 = vadd.f32 %v4099_v50, %v2964_v45  ;;  %v4130_v12 = vadd.f32 %v5518_v9, %v5517_v18 }
 0x19d   : > { %5513 = vst [vmem:[#allocation12_spill] sm:$0xff] %v5456_v4  ;;  %v4137_v14 = vpop.f32.mrf.mxu0  ;;  %v2975_v30 = vadd.f32 %v4068_v40, %v2910_v48  ;;  %v3086_v22 = vadd.f32 %v4133_v2, %v3021_v20  ;;  %v3143_v48 = vadd.f32 %v4167_v19, %v3078_v16 }
 0x19e   : > { %v3089_v40 = vadd.f32 %v4136_v61, %v3024_v35  ;;  %v3081_v51 = vadd.f32 %v4130_v12, %v3016_v32 }
 0x19f   : > { %v4138_v34 = vpop.f32.mrf.mxu0  ;;  %v3040_v25 = vadd.f32 %v4108_v58, %v2975_v30 }
 0x1a0   : > { %v4139_v63 = vadd.f32 %v4138_v34, %v4137_v14  ;;  %v5519_v34 = vld [vmem:[#allocation9_spill] sm:$0xff]  ;;  %v5520_v36 = vld [vmem:[#allocation10_spill] sm:$0xff] }
 0x1a1   : > { %v4140_v10 = vpop.f32.mrf.mxu0  ;;  %v4173_v39 = vadd.f32 %v5520_v36, %v5519_v34 }
 0x1a2   : > { %v3094_v42 = vadd.f32 %v4139_v63, %v3029_v57  ;;  %v5521_v38 = vld [vmem:[#allocation11_spill] sm:$0xff] }
 0x1a3   : > { %v4141_v29 = vpop.f32.mrf.mxu0  ;;  %v3151_v7 = vadd.f32 %v4173_v39, %v3086_v22 }
 0x1a4   : > { %v4142_v60 = vadd.f32 %v4141_v29, %v4140_v10  ;;  %v5522_v49 = vld [vmem:[#allocation12_spill] sm:$0xff]  ;;  %v5523_v10 = vld [vmem:[#allocation6_spill] sm:$0xff] }
 0x1a5   : > { %v4143_v53 = vpop.f32.mrf.mxu0  ;;  %v4176_v46 = vadd.f32 %v5522_v49, %v5521_v38  ;;  %v5524_v29 = vld [vmem:[#allocation8_spill] sm:$0xff] }
 0x1a6   : > { %v4170_v54 = vadd.f32 %v5524_v29, %v5523_v10  ;;  %v3097_v0 = vadd.f32 %v4142_v60, %v3032_v27 }
 0x1a7   : > { %v4144_v56 = vpop.f32.mrf.mxu0  ;;  %v3154_v30 = vadd.f32 %v4176_v46, %v3089_v40 }
 0x1a8   : > { %v4145_v5 = vadd.f32 %v4144_v56, %v4143_v53  ;;  %v3146_v63 = vadd.f32 %v4170_v54, %v3081_v51 }
 0x1a9   : > { %v4146_v52 = vpop.f32.mrf.mxu0 }
 0x1aa   : > { %v3102_v26 = vadd.f32 %v4145_v5, %v3037_v33 }
 0x1ab   : > { %v4147_v15 = vpop.f32.mrf.mxu0 }
 0x1ac   : > { %v4148_v43 = vadd.f32 %v4147_v15, %v4146_v52 }
 0x1ae   : > { %v3105_v62 = vadd.f32 %v4148_v43, %v3040_v25 }
 0x1b5   : > { %v5458_v47 = vpop.f32.mrf.mxu1 }
 0x1b7   : > { %v4178_v23 = vpop.f32.mrf.mxu1 }
 0x1b8   : > { %v4179_v37 = vadd.f32 %v4178_v23, %v5458_v47 }
 0x1b9   : > { %v5463_v4 = vpop.f32.mrf.mxu1 }
 0x1ba   : > { %v3159_v21 = vadd.f32 %v4179_v37, %v3094_v42 }
 0x1bb   : > { %v4181_v59 = vpop.f32.mrf.mxu1 }
 0x1bc   : > { %v4182_v20 = vadd.f32 %v4181_v59, %v5463_v4 }
 0x1be   : > { %v4183_v17 = vpop.f32.mrf.mxu1  ;;  %v3162_v5 = vadd.f32 %v4182_v20, %v3097_v0 }
 0x1c0   : > { %v4184_v8 = vpop.f32.mrf.mxu1 }
 0x1c1   : > { %v4185_v28 = vadd.f32 %v4184_v8, %v4183_v17 }
 0x1c2   : > { %v4186_v41 = vpop.f32.mrf.mxu1 }
 0x1c3   : > { %v3167_v6 = vadd.f32 %v4185_v28, %v3102_v26 }
 0x1c4   : > { %v4187_v14 = vpop.f32.mrf.mxu1 }
 0x1c5   : > { %v4188_v44 = vadd.f32 %v4187_v14, %v4186_v41  ;;  %v4219_v45 = vpop.f32.mrf.mxu0 }
 0x1c6   : > { %v3216_v2 = vadd.f32 %v4219_v45, %v3151_v7  ;;  %v4223_v53 = vpop.f32.mrf.mxu1 }
 0x1c7   : > { %v3232_v11 = vadd.f32 %v4223_v53, %v3167_v6  ;;  %v3207_v13 = vpop.f32.mrf.mxu0  ;;  %v3170_v17 = vadd.f32 %v4188_v44, %v3105_v62 }
 0x1c8   : > { %vm3240_vm0 = vcmp.gt.f32.partialorder %v3216_v2, 0.0  ;;  %v3248_v23 = vmul.f32 0.01, %v3216_v2  ;;  %v3208_v47 = vadd.f32 %v3207_v13, %v3143_v48  ;;  %v3223_v35 = vpop.f32.mrf.mxu1 }
 0x1c9   : > { %vm3244_vm1 = vcmp.gt.f32.partialorder %v3232_v11, 0.0  ;;  %v3252_v50 = vmul.f32 0.01, %v3232_v11  ;;  %v3224_v33 = vadd.f32 %v3223_v35, %v3159_v21  ;;  %v4220_v56 = vpop.f32.mrf.mxu0 }
 0x1ca   : > { %v3219_v58 = vadd.f32 %v4220_v56, %v3154_v30  ;;  %v4224_v61 = vpop.f32.mrf.mxu1  ;;  %v3256_v8 = vsel %vm3240_vm0, %v3216_v2, %v3248_v23  ;;  %vm3238_vm2 = vcmp.gt.f32.partialorder %v3208_v47, 0.0  ;;  %v3246_v57 = vmul.f32 0.01, %v3208_v47 }
 0x1cb   : > { %v3235_v1 = vadd.f32 %v4224_v61, %v3170_v17  ;;  %v3210_v16 = vpop.f32.mrf.mxu0  ;;  %v3260_v4 = vsel %vm3244_vm1, %v3232_v11, %v3252_v50  ;;  %v3250_v55 = vmul.f32 0.01, %v3224_v33  ;;  %vm3242_vm5 = vcmp.gt.f32.partialorder %v3224_v33, 0.0 }
 0x1cc   : > { %vm3241_vm3 = vcmp.gt.f32.partialorder %v3219_v58, 0.0  ;;  %v3249_v59 = vmul.f32 0.01, %v3219_v58  ;;  %v3211_v22 = vadd.f32 %v3210_v16, %v3146_v63  ;;  %v3226_v52 = vpop.f32.mrf.mxu1  ;;  %v3254_v19 = vsel %vm3238_vm2, %v3208_v47, %v3246_v57 }
 0x1cd   : > { %vm3245_vm4 = vcmp.gt.f32.partialorder %v3235_v1, 0.0  ;;  %v3253_v24 = vmul.f32 0.01, %v3235_v1  ;;  %v3227_v25 = vadd.f32 %v3226_v52, %v3162_v5  ;;  %v3258_v12 = vsel %vm3242_vm5, %v3224_v33, %v3250_v55 }
 0x1ce   : > { %v3257_v26 = vsel %vm3241_vm3, %v3219_v58, %v3249_v59  ;;  %vm3239_vm6 = vcmp.gt.f32.partialorder %v3211_v22, 0.0  ;;  %v3247_v28 = vmul.f32 0.01, %v3211_v22 }
 0x1cf   : > { %v3694_v41 = vpack.c.bf16 %v3257_v26, %v3256_v8  ;;  %v3261_v3 = vsel %vm3245_vm4, %v3235_v1, %v3253_v24  ;;  %vm3243_vm7 = vcmp.gt.f32.partialorder %v3227_v25, 0.0  ;;  %v3251_v31 = vmul.f32 0.01, %v3227_v25 }
 0x1d0   : > { %v3704_v18 = vpack.c.bf16 %v3261_v3, %v3260_v4  ;;  %v3255_v9 = vsel %vm3239_vm6, %v3211_v22, %v3247_v28 }
 0x1d1   : > { %3706 = vst [vmem:[%s175_s9 + $0x8] sm:$0xff] %v3694_v41   ;;  %v3689_v34 = vpack.c.bf16 %v3255_v9, %v3254_v19  ;;  %v3259_v36 = vsel %vm3243_vm7, %v3227_v25, %v3251_v31 }
 0x1d2   : > { %3708 = vst [vmem:[%s175_s9 + $0x18] sm:$0xff] %v3704_v18   ;;  %v3699_v39 = vpack.c.bf16 %v3259_v36, %v3258_v12 }
 0x1d3   : > { %3690 = vst [vmem:[%s175_s9] sm:$0xff] %v3689_v34  }
 0x1d4   : > { %3707 = vst [vmem:[%s175_s9 + $0x10] sm:$0xff] %v3699_v39  }
 0x1d5 PF: > { %s13_s12 = sadd.s32 1, %s4604_s12  }
 0x1d6   : > { %p10_p4 = scmp.ge.s32.totalorder %s13_s12, 4  }
 0x1d8   :  { %12 = sbr.rel (!%p10_p4) target bundleno = 1 (0x1), region = 62 }

// kernel: discriminator_svhn_forward.5
= control target key start
LH: loop header
LB: loop body
LE: loop exit
PB: predicated region body
PF: predicated region fallthrough
CT: control target
= control target key end

     0   :  { %s4579_s15 = smov 0   ;;  %s5839_s0 = inlined_call_operand.vmem [shape: bf16[32,3200], index: 0, kind: input, shape index: {}]   ;;  %s5840_s1 = inlined_call_operand.vmem [shape: bf16[3200,256], index: 1, kind: input, shape index: {}]   ;;  %s5841_s2 = inlined_call_operand.vmem [shape: f32[1,256], index: 2, kind: input, shape index: {}]   ;;  %s5842_s3 = inlined_call_operand.vmem [shape: bf16[32,256], index: 3, kind: input, shape index: {}]   ;;  %s5843_s4 = inlined_call_operand.vmem [shape: f32[32,1], index: 4, kind: output, shape index: {}]  }
   0x1 LB: > { %s3458_s16 = sadd.s32 4294967295, %s4551_s15   ;;  %p3462_p0 = scmp.ge.s32.totalorder %s4551_s15, 1  ;;  %s4551_s15 = sphi %s4579_s15, %s14_s15  }
   0x2   : > { %p176_p1 = scmp.lt.s32.totalorder %s4551_s15, 3 }
   0x4   : > { %p177_p2 = pnand %p3462_p0, %p176_p1 }
   0x5   : > { %s3463_s27 = sshll.u32 (!%p177_p2), %s3458_s16, 1 }
   0x6   : > { %180 = sbr.rel (%p177_p2) target bundleno = 783 (0x30f), region = 36  ;;  %p210_p3 = scmp.lt.s32.totalorder (!%p177_p2), %s3463_s27, 3 }
   0xb   : > { %v3908_v0 = vld [vmem:[%s5840_s1 + $0x74] ss:$8 sps:$4 sm:$0xff]   ;;  %v3910_v1 = vld [vmem:[%s5840_s1 + $0x70] ss:$8 sps:$4 sm:$0xff]   ;;  %v3914_v4 = vld [vmem:[%s5840_s1 + $0x64] ss:$8 sps:$4 sm:$0xff]  }
   0xc   : > { %2794 = vmatprep.subr.bf16.mxu0 %v3908_v0  ;;  %v3911_v2 = vld [vmem:[%s5840_s1 + $0x174] ss:$8 sps:$4 sm:$0xff]   ;;  %v3913_v3 = vld [vmem:[%s5840_s1 + $0x170] ss:$8 sps:$4 sm:$0xff]   ;;  %v3916_v5 = vld [vmem:[%s5840_s1 + $0x60] ss:$8 sps:$4 sm:$0xff]  }
   0xd   : > { %2795 = vmatpush1.bf16.msra.mxu0 %v3910_v1  ;;  %2837 = vmatprep.subr.bf16.mxu1 %v3911_v2  ;;  %v3917_v6 = vld [vmem:[%s5840_s1 + $0x164] ss:$8 sps:$4 sm:$0xff]   ;;  %v3919_v7 = vld [vmem:[%s5840_s1 + $0x160] ss:$8 sps:$4 sm:$0xff]   ;;  %v3920_v8 = vld [vmem:[%s5840_s1 + $0x54] ss:$8 sps:$4 sm:$0xff]  }
   0xe   : > { %2838 = vmatpush1.bf16.msra.mxu1 %v3913_v3  ;;  %2796 = vmatprep.subr.bf16.mxu0 %v3914_v4  ;;  %v3922_v9 = vld [vmem:[%s5840_s1 + $0x50] ss:$8 sps:$4 sm:$0xff]   ;;  %v3923_v10 = vld [vmem:[%s5840_s1 + $0x154] ss:$8 sps:$4 sm:$0xff]   ;;  %v3926_v11 = vld [vmem:[%s5840_s1 + $0x44] ss:$8 sps:$4 sm:$0xff]  }
   0xf   : > { %2839 = vmatprep.subr.bf16.mxu1 %v3917_v6  ;;  %v3925_v12 = vld [vmem:[%s5840_s1 + $0x150] ss:$8 sps:$4 sm:$0xff]   ;;  %v3929_v13 = vld [vmem:[%s5840_s1 + $0x144] ss:$8 sps:$4 sm:$0xff]   ;;  %v3928_v14 = vld [vmem:[%s5840_s1 + $0x40] ss:$8 sps:$4 sm:$0xff]  }
  0x10   : > { %v3932_v15 = vld [vmem:[%s5840_s1 + $0x34] ss:$8 sps:$4 sm:$0xff]   ;;  %v3931_v16 = vld [vmem:[%s5840_s1 + $0x140] ss:$8 sps:$4 sm:$0xff]   ;;  %v3934_v18 = vld [vmem:[%s5840_s1 + $0x30] ss:$8 sps:$4 sm:$0xff]  }
  0x11   : > { %2797 = vmatpush1.bf16.msra.mxu0 %v3916_v5  ;;  %v3935_v17 = vld [vmem:[%s5840_s1 + $0x134] ss:$8 sps:$4 sm:$0xff]   ;;  %v3938_v19 = vld [vmem:[%s5840_s1 + $0x24] ss:$8 sps:$4 sm:$0xff]   ;;  %v3937_v20 = vld [vmem:[%s5840_s1 + $0x130] ss:$8 sps:$4 sm:$0xff]  }
  0x12   : > { %2798 = vmatprep.subr.bf16.mxu0 %v3920_v8  ;;  %2840 = vmatpush1.bf16.msra.mxu1 %v3919_v7  ;;  %v3941_v21 = vld [vmem:[%s5840_s1 + $0x124] ss:$8 sps:$4 sm:$0xff]   ;;  %v3940_v22 = vld [vmem:[%s5840_s1 + $0x20] ss:$8 sps:$4 sm:$0xff]   ;;  %v3944_v23 = vld [vmem:[%s5840_s1 + $0x14] ss:$8 sps:$4 sm:$0xff]  }
  0x13   : > { %2841 = vmatprep.subr.bf16.mxu1 %v3923_v10  ;;  %v3943_v24 = vld [vmem:[%s5840_s1 + $0x120] ss:$8 sps:$4 sm:$0xff]   ;;  %v3947_v25 = vld [vmem:[%s5840_s1 + $0x114] ss:$8 sps:$4 sm:$0xff]   ;;  %v3946_v26 = vld [vmem:[%s5840_s1 + $0x10] ss:$8 sps:$4 sm:$0xff]  }
  0x14   : > { %v3950_v27 = vld [vmem:[%s5840_s1 + $0x4] ss:$8 sps:$4 sm:$0xff]   ;;  %v3949_v28 = vld [vmem:[%s5840_s1 + $0x110] ss:$8 sps:$4 sm:$0xff]   ;;  %v3952_v30 = vld [vmem:[%s5840_s1] ss:$8 sps:$4 sm:$0xff]  }
  0x15   : > { %2799 = vmatpush1.bf16.msra.mxu0 %v3922_v9  ;;  %v3953_v29 = vld [vmem:[%s5840_s1 + $0x104] ss:$8 sps:$4 sm:$0xff]   ;;  %v3956_v31 = vld [vmem:[%s5840_s1 + $0xf4] ss:$8 sps:$4 sm:$0xff]   ;;  %v3955_v32 = vld [vmem:[%s5840_s1 + $0x100] ss:$8 sps:$4 sm:$0xff]  }
  0x16   : > { %2800 = vmatprep.subr.bf16.mxu0 %v3926_v11  ;;  %2842 = vmatpush1.bf16.msra.mxu1 %v3925_v12  ;;  %v3959_v33 = vld [vmem:[%s5840_s1 + $0x1f4] ss:$8 sps:$4 sm:$0xff]   ;;  %v3958_v34 = vld [vmem:[%s5840_s1 + $0xf0] ss:$8 sps:$4 sm:$0xff]   ;;  %v3962_v35 = vld [vmem:[%s5840_s1 + $0xe4] ss:$8 sps:$4 sm:$0xff]  }
  0x17   : > { %2843 = vmatprep.subr.bf16.mxu1 %v3929_v13  ;;  %s5845_s27 = smov (!%p210_p3, %s3463_s27), 3  ;;  %v3961_v36 = vld [vmem:[%s5840_s1 + $0x1f0] ss:$8 sps:$4 sm:$0xff]   ;;  %v3965_v37 = vld [vmem:[%s5840_s1 + $0x1e4] ss:$8 sps:$4 sm:$0xff]   ;;  %vm3387_vm4 = vcmask 7168  }
  0x18   : > { %v3964_v38 = vld [vmem:[%s5840_s1 + $0xe0] ss:$8 sps:$4 sm:$0xff]   ;;  %v3968_v39 = vld [vmem:[%s5840_s1 + $0xd4] ss:$8 sps:$4 sm:$0xff]   ;;  %s3898_s25 = smul.u32 100, %s5845_s27  ;;  %s3897_s11 = sshll.u32 %s5845_s27, 3 }
  0x19   : > { %2801 = vmatpush1.bf16.msra.mxu0 %v3928_v14  ;;  %v3967_v40 = vld [vmem:[%s5840_s1 + $0x1e0] ss:$8 sps:$4 sm:$0xff]   ;;  %v3971_v41 = vld [vmem:[%s5840_s1 + $0x1d4] ss:$8 sps:$4 sm:$0xff]   ;;  %v3970_v42 = vld [vmem:[%s5840_s1 + $0xd0] ss:$8 sps:$4 sm:$0xff]   ;;  %s221_s14 = scalar_lea.vmem %s5842_s3, %s3897_s11  ;;  %s227_s19 = scalar_lea.vmem %s5843_s4, %s3897_s11 }
  0x1a   : > { %2802 = vmatprep.subr.bf16.mxu0 %v3932_v15  ;;  %2844 = vmatpush1.bf16.msra.mxu1 %v3931_v16  ;;  %v3974_v43 = vld [vmem:[%s5840_s1 + $0xc4] ss:$8 sps:$4 sm:$0xff]   ;;  %s4727_s10 = scalar_lea.vmem %s5839_s0, %s3898_s25  ;;  %v3973_v44 = vld [vmem:[%s5840_s1 + $0x1d0] ss:$8 sps:$4 sm:$0xff]   ;;  %v3976_v46 = vld [vmem:[%s5840_s1 + $0xc0] ss:$8 sps:$4 sm:$0xff]  }
  0x1b   : > { %2845 = vmatprep.subr.bf16.mxu1 %v3935_v17  ;;  %v3977_v45 = vld [vmem:[%s5840_s1 + $0x1c4] ss:$8 sps:$4 sm:$0xff]   ;;  %v3980_v48 = vld [vmem:[%s5840_s1 + $0xb4] ss:$8 sps:$4 sm:$0xff]   ;;  %v3979_v49 = vld [vmem:[%s5840_s1 + $0x1c0] ss:$8 sps:$4 sm:$0xff]  }
  0x1c   : > { %v4005_v47 = vld [vmem:[%s4727_s10 + $0x4] ss:$100 sps:$4 sm:$0xff]   ;;  %v3983_v50 = vld [vmem:[%s5840_s1 + $0x1b4] ss:$8 sps:$4 sm:$0xff]   ;;  %v4012_v51 = vld [vmem:[%s4727_s10 + $0xc] ss:$100 sps:$4 sm:$0xff]  }
  0x1d   : > { %2803 = vmatpush1.bf16.msra.mxu0 %v3934_v18  ;;  %2826 = vmatprep.mubr.bf16.mxu0 %v4005_v47  ;;  %v3982_v52 = vld [vmem:[%s5840_s1 + $0xb0] ss:$8 sps:$4 sm:$0xff]   ;;  %v3986_v53 = vld [vmem:[%s5840_s1 + $0xa4] ss:$8 sps:$4 sm:$0xff]   ;;  %v3988_v56 = vld [vmem:[%s5840_s1 + $0xa0] ss:$8 sps:$4 sm:$0xff]  }
  0x1e   : > { %2804 = vmatprep.subr.bf16.mxu0 %v3938_v19  ;;  %2846 = vmatpush1.bf16.msra.mxu1 %v3937_v20  ;;  %v3985_v54 = vld [vmem:[%s5840_s1 + $0x1b0] ss:$8 sps:$4 sm:$0xff]   ;;  %v3989_v55 = vld [vmem:[%s5840_s1 + $0x1a4] ss:$8 sps:$4 sm:$0xff]   ;;  %v3992_v57 = vld [vmem:[%s5840_s1 + $0x94] ss:$8 sps:$4 sm:$0xff]  }
  0x1f   : > { %2847 = vmatprep.subr.bf16.mxu1 %v3941_v21  ;;  %2869 = vmatprep.mubr.bf16.mxu1 %v4012_v51  ;;  %v3991_v58 = vld [vmem:[%s5840_s1 + $0x1a0] ss:$8 sps:$4 sm:$0xff]   ;;  %v3995_v59 = vld [vmem:[%s5840_s1 + $0x194] ss:$8 sps:$4 sm:$0xff]   ;;  %v3994_v60 = vld [vmem:[%s5840_s1 + $0x90] ss:$8 sps:$4 sm:$0xff]  }
  0x20   : > { %v3998_v61 = vld [vmem:[%s5840_s1 + $0x84] ss:$8 sps:$4 sm:$0xff]   ;;  %v3997_v62 = vld [vmem:[%s5840_s1 + $0x190] ss:$8 sps:$4 sm:$0xff]   ;;  %v4000_v0 = vld [vmem:[%s5840_s1 + $0x80] ss:$8 sps:$4 sm:$0xff]  }
  0x21   : > { %2805 = vmatpush1.bf16.msra.mxu0 %v3940_v22  ;;  %v4001_v63 = vld [vmem:[%s5840_s1 + $0x184] ss:$8 sps:$4 sm:$0xff]   ;;  %v4009_v1 = vld [vmem:[%s5840_s1 + $0x274] ss:$8 sps:$4 sm:$0xff]   ;;  %v4006_v2 = vld [vmem:[%s5840_s1 + $0x180] ss:$8 sps:$4 sm:$0xff]  }
  0x22   : > { %2806 = vmatprep.subr.bf16.mxu0 %v3944_v23  ;;  %2848 = vmatpush1.bf16.msra.mxu1 %v3943_v24  ;;  %v4003_v3 = vld [vmem:[%s4727_s10] ss:$100 sps:$4 sm:$0xff]   ;;  %v4015_v4 = vld [vmem:[%s5840_s1 + $0x374] ss:$8 sps:$4 sm:$0xff]   ;;  %v4007_v5 = vld [vmem:[%s5840_s1 + $0x270] ss:$8 sps:$4 sm:$0xff]  }
  0x23   : > { %2849 = vmatprep.subr.bf16.mxu1 %v3947_v25  ;;  %v4010_v6 = vld [vmem:[%s4727_s10 + $0x8] ss:$100 sps:$4 sm:$0xff]   ;;  %v4013_v8 = vld [vmem:[%s5840_s1 + $0x370] ss:$8 sps:$4 sm:$0xff]   ;;  %v4024_v11 = vld [vmem:[%s5840_s1 + $0x254] ss:$8 sps:$4 sm:$0xff]  }
  0x24   : > { %v4018_v7 = vld [vmem:[%s5840_s1 + $0x264] ss:$8 sps:$4 sm:$0xff]   ;;  %v4016_v10 = vld [vmem:[%s5840_s1 + $0x260] ss:$8 sps:$4 sm:$0xff]   ;;  %v4027_v13 = vld [vmem:[%s5840_s1 + $0x354] ss:$8 sps:$4 sm:$0xff]  }
  0x25   : > { %2807 = vmatpush1.bf16.msra.mxu0 %v3946_v26  ;;  %v4021_v9 = vld [vmem:[%s5840_s1 + $0x364] ss:$8 sps:$4 sm:$0xff]   ;;  %v4019_v12 = vld [vmem:[%s5840_s1 + $0x360] ss:$8 sps:$4 sm:$0xff]   ;;  %v4022_v14 = vld [vmem:[%s5840_s1 + $0x250] ss:$8 sps:$4 sm:$0xff]  }
  0x26   : > { %2808 = vmatprep.subr.bf16.mxu0 %v3950_v27  ;;  %2850 = vmatpush1.bf16.msra.mxu1 %v3949_v28  ;;  %v4030_v15 = vld [vmem:[%s5840_s1 + $0x244] ss:$8 sps:$4 sm:$0xff]   ;;  %v4025_v16 = vld [vmem:[%s5840_s1 + $0x350] ss:$8 sps:$4 sm:$0xff]   ;;  %v4028_v18 = vld [vmem:[%s5840_s1 + $0x240] ss:$8 sps:$4 sm:$0xff]  }
  0x27   : > { %2851 = vmatprep.subr.bf16.mxu1 %v3953_v29  ;;  %v4033_v17 = vld [vmem:[%s5840_s1 + $0x344] ss:$8 sps:$4 sm:$0xff]   ;;  %v4036_v19 = vld [vmem:[%s5840_s1 + $0x234] ss:$8 sps:$4 sm:$0xff]   ;;  %v4031_v20 = vld [vmem:[%s5840_s1 + $0x340] ss:$8 sps:$4 sm:$0xff]  }
  0x28   : > { %v4039_v21 = vld [vmem:[%s5840_s1 + $0x334] ss:$8 sps:$4 sm:$0xff]   ;;  %v4034_v22 = vld [vmem:[%s5840_s1 + $0x230] ss:$8 sps:$4 sm:$0xff]   ;;  %v4042_v23 = vld [vmem:[%s5840_s1 + $0x224] ss:$8 sps:$4 sm:$0xff]  }
  0x29   : > { %2809 = vmatpush1.bf16.msra.mxu0 %v3952_v30  ;;  %v4037_v24 = vld [vmem:[%s5840_s1 + $0x330] ss:$8 sps:$4 sm:$0xff]   ;;  %v4045_v25 = vld [vmem:[%s5840_s1 + $0x324] ss:$8 sps:$4 sm:$0xff]   ;;  %v4040_v26 = vld [vmem:[%s5840_s1 + $0x220] ss:$8 sps:$4 sm:$0xff]  }
  0x2a   : > { %2810 = vmatprep.subr.bf16.mxu0 %v3956_v31  ;;  %2852 = vmatpush1.bf16.msra.mxu1 %v3955_v32  ;;  %v4048_v27 = vld [vmem:[%s5840_s1 + $0x214] ss:$8 sps:$4 sm:$0xff]   ;;  %v4043_v28 = vld [vmem:[%s5840_s1 + $0x320] ss:$8 sps:$4 sm:$0xff]   ;;  %v4046_v30 = vld [vmem:[%s5840_s1 + $0x210] ss:$8 sps:$4 sm:$0xff]  }
  0x2b   : > { %2853 = vmatprep.subr.bf16.mxu1 %v3959_v33  ;;  %v4051_v29 = vld [vmem:[%s5840_s1 + $0x314] ss:$8 sps:$4 sm:$0xff]   ;;  %v4049_v31 = vld [vmem:[%s5840_s1 + $0x310] ss:$8 sps:$4 sm:$0xff]   ;;  %v4054_v32 = vld [vmem:[%s5840_s1 + $0x204] ss:$8 sps:$4 sm:$0xff]  }
  0x2c   : > { %v4108_v33 = vld [vmem:[%s4727_s10 + $0x14] ss:$100 sps:$4 sm:$0xff]   ;;  %v4081_v51 = vld [vmem:[%s5840_s1 + $0x3c4] ss:$8 sps:$4 sm:$0xff]  }
  0x2d   : > { %2811 = vmatpush2.bf16.msra.mxu0 %v3958_v34  ;;  %v4057_v34 = vld [vmem:[%s5840_s1 + $0x304] ss:$8 sps:$4 sm:$0xff]   ;;  %v4075_v47 = vld [vmem:[%s5840_s1 + $0x3d4] ss:$8 sps:$4 sm:$0xff]  }
  0x2e   : > { %2812 = vmatprep.subr.bf16.mxu0 %v3962_v35  ;;  %2854 = vmatpush2.bf16.msra.mxu1 %v3961_v36  ;;  %v4052_v35 = vld [vmem:[%s5840_s1 + $0x200] ss:$8 sps:$4 sm:$0xff]  }
  0x2f   : > { %2855 = vmatprep.subr.bf16.mxu1 %v3965_v37  ;;  %v4114_v36 = vld [vmem:[%s4727_s10 + $0x1c] ss:$100 sps:$4 sm:$0xff]  }
  0x30   : > { %v4060_v37 = vld [vmem:[%s5840_s1 + $0x2f4] ss:$8 sps:$4 sm:$0xff]  }
  0x31   : > { %2813 = vmatpush2.bf16.msra.mxu0 %v3964_v38  ;;  %v4055_v38 = vld [vmem:[%s5840_s1 + $0x300] ss:$8 sps:$4 sm:$0xff]  }
  0x32   : > { %2814 = vmatprep.subr.bf16.mxu0 %v3968_v39  ;;  %2856 = vmatpush2.bf16.msra.mxu1 %v3967_v40  ;;  %v4063_v39 = vld [vmem:[%s5840_s1 + $0x3f4] ss:$8 sps:$4 sm:$0xff]   ;;  %v4058_v40 = vld [vmem:[%s5840_s1 + $0x2f0] ss:$8 sps:$4 sm:$0xff]  }
  0x33   : > { %2857 = vmatprep.subr.bf16.mxu1 %v3971_v41  ;;  %v4066_v41 = vld [vmem:[%s5840_s1 + $0x2e4] ss:$8 sps:$4 sm:$0xff]  }
  0x35   : > { %2815 = vmatpush2.bf16.msra.mxu0 %v3970_v42  ;;  %v4061_v42 = vld [vmem:[%s5840_s1 + $0x3f0] ss:$8 sps:$4 sm:$0xff]  }
  0x36   : > { %2816 = vmatprep.subr.bf16.mxu0 %v3974_v43  ;;  %2858 = vmatpush2.bf16.msra.mxu1 %v3973_v44  ;;  %v4069_v43 = vld [vmem:[%s5840_s1 + $0x3e4] ss:$8 sps:$4 sm:$0xff]   ;;  %v4064_v44 = vld [vmem:[%s5840_s1 + $0x2e0] ss:$8 sps:$4 sm:$0xff]  }
  0x37   : > { %2859 = vmatprep.subr.bf16.mxu1 %v3977_v45  ;;  %v4072_v45 = vld [vmem:[%s5840_s1 + $0x2d4] ss:$8 sps:$4 sm:$0xff]  }
  0x39   : > { %2817 = vmatpush2.bf16.msra.mxu0 %v3976_v46  ;;  %v4067_v46 = vld [vmem:[%s5840_s1 + $0x3e0] ss:$8 sps:$4 sm:$0xff]  }
  0x3a   : > { %2818 = vmatprep.subr.bf16.mxu0 %v3980_v48  ;;  %2860 = vmatpush2.bf16.msra.mxu1 %v3979_v49  ;;  %v4070_v48 = vld [vmem:[%s5840_s1 + $0x2d0] ss:$8 sps:$4 sm:$0xff]   ;;  %v4078_v49 = vld [vmem:[%s5840_s1 + $0x2c4] ss:$8 sps:$4 sm:$0xff]  }
  0x3b   : > { %2861 = vmatprep.subr.bf16.mxu1 %v3983_v50  ;;  %v4073_v50 = vld [vmem:[%s5840_s1 + $0x3d0] ss:$8 sps:$4 sm:$0xff]  }
  0x3d   : > { %2819 = vmatpush2.bf16.msra.mxu0 %v3982_v52  ;;  %v4076_v52 = vld [vmem:[%s5840_s1 + $0x2c0] ss:$8 sps:$4 sm:$0xff]  }
  0x3e   : > { %2820 = vmatprep.subr.bf16.mxu0 %v3986_v53  ;;  %2862 = vmatpush2.bf16.msra.mxu1 %v3985_v54  ;;  %v4084_v53 = vld [vmem:[%s5840_s1 + $0x2b4] ss:$8 sps:$4 sm:$0xff]   ;;  %v4079_v54 = vld [vmem:[%s5840_s1 + $0x3c0] ss:$8 sps:$4 sm:$0xff]  }
  0x3f   : > { %2863 = vmatprep.subr.bf16.mxu1 %v3989_v55  ;;  %v4087_v55 = vld [vmem:[%s5840_s1 + $0x3b4] ss:$8 sps:$4 sm:$0xff]  }
  0x41   : > { %2821 = vmatpush2.bf16.msra.mxu0 %v3988_v56  ;;  %v4082_v56 = vld [vmem:[%s5840_s1 + $0x2b0] ss:$8 sps:$4 sm:$0xff]  }
  0x42   : > { %2822 = vmatprep.subr.bf16.mxu0 %v3992_v57  ;;  %2864 = vmatpush2.bf16.msra.mxu1 %v3991_v58  ;;  %v4090_v57 = vld [vmem:[%s5840_s1 + $0x2a4] ss:$8 sps:$4 sm:$0xff]   ;;  %v4085_v58 = vld [vmem:[%s5840_s1 + $0x3b0] ss:$8 sps:$4 sm:$0xff]  }
  0x43   : > { %2865 = vmatprep.subr.bf16.mxu1 %v3995_v59  ;;  %v4093_v59 = vld [vmem:[%s5840_s1 + $0x3a4] ss:$8 sps:$4 sm:$0xff]  }
  0x45   : > { %2823 = vmatpush2.bf16.msra.mxu0 %v3994_v60  ;;  %v4088_v60 = vld [vmem:[%s5840_s1 + $0x2a0] ss:$8 sps:$4 sm:$0xff]  }
  0x46   : > { %2824 = vmatprep.subr.bf16.mxu0 %v3998_v61  ;;  %2866 = vmatpush2.bf16.msra.mxu1 %v3997_v62  ;;  %v4096_v61 = vld [vmem:[%s5840_s1 + $0x294] ss:$8 sps:$4 sm:$0xff]   ;;  %v4091_v62 = vld [vmem:[%s5840_s1 + $0x3a0] ss:$8 sps:$4 sm:$0xff]  }
  0x47   : > { %2867 = vmatprep.subr.bf16.mxu1 %v4001_v63  ;;  %v4099_v63 = vld [vmem:[%s5840_s1 + $0x394] ss:$8 sps:$4 sm:$0xff]  }
  0x49   : > { %2825 = vmatpush2.bf16.msra.mxu0 %v4000_v0  ;;  %v4094_v0 = vld [vmem:[%s5840_s1 + $0x290] ss:$8 sps:$4 sm:$0xff]  }
  0x4a   : > { %2880 = vmatprep.subr.bf16.mxu0 %v4009_v1  ;;  %2868 = vmatpush2.bf16.msra.mxu1 %v4006_v2  ;;  %v4102_v1 = vld [vmem:[%s5840_s1 + $0x284] ss:$8 sps:$4 sm:$0xff]   ;;  %v4097_v2 = vld [vmem:[%s5840_s1 + $0x390] ss:$8 sps:$4 sm:$0xff]  }
  0x4b   : > { %2923 = vmatprep.subr.bf16.mxu1 %v4015_v4  ;;  %v4100_v4 = vld [vmem:[%s5840_s1 + $0x280] ss:$8 sps:$4 sm:$0xff]  }
  0x4c   : > { %2827 = vmatmul.mubr.bf16.vlgmr.msra.gmra.mxu0 %v4003_v3  ;;  %v4105_v3 = vld [vmem:[%s5840_s1 + $0x384] ss:$8 sps:$4 sm:$0xff]  }
  0x4d   : > { %2881 = vmatpush1.bf16.msra.mxu0 %v4007_v5  ;;  %2870 = vmatmul.mubr.bf16.vlgmr.msra.gmra.mxu1 %v4010_v6  ;;  %v4111_v5 = vld [vmem:[%s5840_s1 + $0x474] ss:$8 sps:$4 sm:$0xff]   ;;  %v4103_v6 = vld [vmem:[%s5840_s1 + $0x380] ss:$8 sps:$4 sm:$0xff]  }
  0x4e   : > { %2882 = vmatprep.subr.bf16.mxu0 %v4018_v7  ;;  %2924 = vmatpush1.bf16.msra.mxu1 %v4013_v8  ;;  %v4106_v7 = vld [vmem:[%s4727_s10 + $0x10] ss:$100 sps:$4 sm:$0xff]  }
  0x4f   : > { %2925 = vmatprep.subr.bf16.mxu1 %v4021_v9  ;;  %2912 = vmatprep.mubr.bf16.mxu0 %v4108_v33  ;;  %v4117_v8 = vld [vmem:[%s5840_s1 + $0x574] ss:$8 sps:$4 sm:$0xff]   ;;  %v4109_v9 = vld [vmem:[%s5840_s1 + $0x470] ss:$8 sps:$4 sm:$0xff]  }
  0x50   : > { %2955 = vmatprep.mubr.bf16.mxu1 %v4114_v36  ;;  %v4150_v33 = vld [vmem:[%s5840_s1 + $0x414] ss:$8 sps:$4 sm:$0xff]   ;;  %v4148_v36 = vld [vmem:[%s5840_s1 + $0x410] ss:$8 sps:$4 sm:$0xff]  }
  0x51   : > { %2883 = vmatpush1.bf16.msra.mxu0 %v4016_v10  ;;  %v4112_v10 = vld [vmem:[%s4727_s10 + $0x18] ss:$100 sps:$4 sm:$0xff]  }
  0x52   : > { %2884 = vmatprep.subr.bf16.mxu0 %v4024_v11  ;;  %2926 = vmatpush1.bf16.msra.mxu1 %v4019_v12  ;;  %v4120_v11 = vld [vmem:[%s5840_s1 + $0x464] ss:$8 sps:$4 sm:$0xff]   ;;  %v4115_v12 = vld [vmem:[%s5840_s1 + $0x570] ss:$8 sps:$4 sm:$0xff]  }
  0x53   : > { %2927 = vmatprep.subr.bf16.mxu1 %v4027_v13  ;;  %v4123_v13 = vld [vmem:[%s5840_s1 + $0x564] ss:$8 sps:$4 sm:$0xff]  }
  0x55   : > { %2885 = vmatpush1.bf16.msra.mxu0 %v4022_v14  ;;  %v4118_v14 = vld [vmem:[%s5840_s1 + $0x460] ss:$8 sps:$4 sm:$0xff]  }
  0x56   : > { %2886 = vmatprep.subr.bf16.mxu0 %v4030_v15  ;;  %2928 = vmatpush1.bf16.msra.mxu1 %v4025_v16  ;;  %v4126_v15 = vld [vmem:[%s5840_s1 + $0x454] ss:$8 sps:$4 sm:$0xff]   ;;  %v4121_v16 = vld [vmem:[%s5840_s1 + $0x560] ss:$8 sps:$4 sm:$0xff]  }
  0x57   : > { %2929 = vmatprep.subr.bf16.mxu1 %v4033_v17  ;;  %v4129_v17 = vld [vmem:[%s5840_s1 + $0x554] ss:$8 sps:$4 sm:$0xff]  }
  0x59   : > { %2887 = vmatpush1.bf16.msra.mxu0 %v4028_v18  ;;  %v4210_v18 = vld [vmem:[%s4727_s10 + $0x24] ss:$100 sps:$4 sm:$0xff]  }
  0x5a   : > { %2888 = vmatprep.subr.bf16.mxu0 %v4036_v19  ;;  %2930 = vmatpush1.bf16.msra.mxu1 %v4031_v20  ;;  %v4124_v19 = vld [vmem:[%s5840_s1 + $0x450] ss:$8 sps:$4 sm:$0xff]  }
  0x5b   : > { %2931 = vmatprep.subr.bf16.mxu1 %v4039_v21  ;;  %v4127_v20 = vld [vmem:[%s5840_s1 + $0x550] ss:$8 sps:$4 sm:$0xff]   ;;  %v4132_v21 = vld [vmem:[%s5840_s1 + $0x444] ss:$8 sps:$4 sm:$0xff]  }
  0x5d   : > { %2889 = vmatpush1.bf16.msra.mxu0 %v4034_v22  ;;  %v4216_v22 = vld [vmem:[%s4727_s10 + $0x2c] ss:$100 sps:$4 sm:$0xff]  }
  0x5e   : > { %2890 = vmatprep.subr.bf16.mxu0 %v4042_v23  ;;  %2932 = vmatpush1.bf16.msra.mxu1 %v4037_v24  ;;  %v4135_v23 = vld [vmem:[%s5840_s1 + $0x544] ss:$8 sps:$4 sm:$0xff]   ;;  %v4130_v24 = vld [vmem:[%s5840_s1 + $0x440] ss:$8 sps:$4 sm:$0xff]  }
  0x5f   : > { %2933 = vmatprep.subr.bf16.mxu1 %v4045_v25  ;;  %v4138_v25 = vld [vmem:[%s5840_s1 + $0x434] ss:$8 sps:$4 sm:$0xff]  }
  0x61   : > { %2891 = vmatpush1.bf16.msra.mxu0 %v4040_v26  ;;  %v4133_v26 = vld [vmem:[%s5840_s1 + $0x540] ss:$8 sps:$4 sm:$0xff]  }
  0x62   : > { %2892 = vmatprep.subr.bf16.mxu0 %v4048_v27  ;;  %2934 = vmatpush1.bf16.msra.mxu1 %v4043_v28  ;;  %v4141_v27 = vld [vmem:[%s5840_s1 + $0x534] ss:$8 sps:$4 sm:$0xff]   ;;  %v4136_v28 = vld [vmem:[%s5840_s1 + $0x430] ss:$8 sps:$4 sm:$0xff]  }
  0x63   : > { %2935 = vmatprep.subr.bf16.mxu1 %v4051_v29  ;;  %v4144_v29 = vld [vmem:[%s5840_s1 + $0x424] ss:$8 sps:$4 sm:$0xff]  }
  0x65   : > { %2893 = vmatpush1.bf16.msra.mxu0 %v4046_v30  ;;  %v4139_v30 = vld [vmem:[%s5840_s1 + $0x530] ss:$8 sps:$4 sm:$0xff]  }
  0x66   : > { %2894 = vmatprep.subr.bf16.mxu0 %v4054_v32  ;;  %2936 = vmatpush1.bf16.msra.mxu1 %v4049_v31  ;;  %v4147_v31 = vld [vmem:[%s5840_s1 + $0x524] ss:$8 sps:$4 sm:$0xff]   ;;  %v4142_v32 = vld [vmem:[%s5840_s1 + $0x420] ss:$8 sps:$4 sm:$0xff]  }
  0x67   : > { %2937 = vmatprep.subr.bf16.mxu1 %v4057_v34  ;;  %v4145_v34 = vld [vmem:[%s5840_s1 + $0x520] ss:$8 sps:$4 sm:$0xff]  }
  0x69   : > { %2895 = vmatpush1.bf16.msra.mxu0 %v4052_v35  ;;  %v4153_v35 = vld [vmem:[%s5840_s1 + $0x514] ss:$8 sps:$4 sm:$0xff]  }
  0x6a   : > { %2896 = vmatprep.subr.bf16.mxu0 %v4060_v37  ;;  %2938 = vmatpush1.bf16.msra.mxu1 %v4055_v38  ;;  %v4156_v37 = vld [vmem:[%s5840_s1 + $0x404] ss:$8 sps:$4 sm:$0xff]   ;;  %v4151_v38 = vld [vmem:[%s5840_s1 + $0x510] ss:$8 sps:$4 sm:$0xff]  }
  0x6b   : > { %2939 = vmatprep.subr.bf16.mxu1 %v4063_v39  ;;  %v4159_v39 = vld [vmem:[%s5840_s1 + $0x504] ss:$8 sps:$4 sm:$0xff]  }
  0x6d   : > { %2897 = vmatpush2.bf16.msra.mxu0 %v4058_v40  ;;  %v4154_v40 = vld [vmem:[%s5840_s1 + $0x400] ss:$8 sps:$4 sm:$0xff]  }
  0x6e   : > { %2898 = vmatprep.subr.bf16.mxu0 %v4066_v41  ;;  %2940 = vmatpush2.bf16.msra.mxu1 %v4061_v42  ;;  %v4162_v41 = vld [vmem:[%s5840_s1 + $0x4f4] ss:$8 sps:$4 sm:$0xff]   ;;  %v4157_v42 = vld [vmem:[%s5840_s1 + $0x500] ss:$8 sps:$4 sm:$0xff]  }
  0x6f   : > { %2941 = vmatprep.subr.bf16.mxu1 %v4069_v43  ;;  %v4165_v43 = vld [vmem:[%s5840_s1 + $0x5f4] ss:$8 sps:$4 sm:$0xff]  }
  0x71   : > { %2899 = vmatpush2.bf16.msra.mxu0 %v4064_v44  ;;  %v4160_v44 = vld [vmem:[%s5840_s1 + $0x4f0] ss:$8 sps:$4 sm:$0xff]  }
  0x72   : > { %2900 = vmatprep.subr.bf16.mxu0 %v4072_v45  ;;  %2942 = vmatpush2.bf16.msra.mxu1 %v4067_v46  ;;  %v4168_v45 = vld [vmem:[%s5840_s1 + $0x4e4] ss:$8 sps:$4 sm:$0xff]   ;;  %v4163_v46 = vld [vmem:[%s5840_s1 + $0x5f0] ss:$8 sps:$4 sm:$0xff]  }
  0x73   : > { %2943 = vmatprep.subr.bf16.mxu1 %v4075_v47  ;;  %v4171_v47 = vld [vmem:[%s5840_s1 + $0x5e4] ss:$8 sps:$4 sm:$0xff]  }
  0x75   : > { %2901 = vmatpush2.bf16.msra.mxu0 %v4070_v48  ;;  %v4166_v48 = vld [vmem:[%s5840_s1 + $0x4e0] ss:$8 sps:$4 sm:$0xff]  }
  0x76   : > { %2902 = vmatprep.subr.bf16.mxu0 %v4078_v49  ;;  %2944 = vmatpush2.bf16.msra.mxu1 %v4073_v50  ;;  %v4174_v49 = vld [vmem:[%s5840_s1 + $0x4d4] ss:$8 sps:$4 sm:$0xff]   ;;  %v4169_v50 = vld [vmem:[%s5840_s1 + $0x5e0] ss:$8 sps:$4 sm:$0xff]  }
  0x77   : > { %2945 = vmatprep.subr.bf16.mxu1 %v4081_v51  ;;  %v4177_v51 = vld [vmem:[%s5840_s1 + $0x5d4] ss:$8 sps:$4 sm:$0xff]  }
  0x79   : > { %2903 = vmatpush2.bf16.msra.mxu0 %v4076_v52  ;;  %v4172_v52 = vld [vmem:[%s5840_s1 + $0x4d0] ss:$8 sps:$4 sm:$0xff]  }
  0x7a   : > { %2904 = vmatprep.subr.bf16.mxu0 %v4084_v53  ;;  %2946 = vmatpush2.bf16.msra.mxu1 %v4079_v54  ;;  %v4180_v53 = vld [vmem:[%s5840_s1 + $0x4c4] ss:$8 sps:$4 sm:$0xff]   ;;  %v4175_v54 = vld [vmem:[%s5840_s1 + $0x5d0] ss:$8 sps:$4 sm:$0xff]  }
  0x7b   : > { %2947 = vmatprep.subr.bf16.mxu1 %v4087_v55  ;;  %v4183_v55 = vld [vmem:[%s5840_s1 + $0x5c4] ss:$8 sps:$4 sm:$0xff]  }
  0x7d   : > { %2905 = vmatpush2.bf16.msra.mxu0 %v4082_v56  ;;  %v4178_v56 = vld [vmem:[%s5840_s1 + $0x4c0] ss:$8 sps:$4 sm:$0xff]  }
  0x7e   : > { %2906 = vmatprep.subr.bf16.mxu0 %v4090_v57  ;;  %2948 = vmatpush2.bf16.msra.mxu1 %v4085_v58  ;;  %v4186_v57 = vld [vmem:[%s5840_s1 + $0x4b4] ss:$8 sps:$4 sm:$0xff]   ;;  %v4181_v58 = vld [vmem:[%s5840_s1 + $0x5c0] ss:$8 sps:$4 sm:$0xff]  }
  0x7f   : > { %2949 = vmatprep.subr.bf16.mxu1 %v4093_v59  ;;  %v4189_v59 = vld [vmem:[%s5840_s1 + $0x5b4] ss:$8 sps:$4 sm:$0xff]  }
  0x81   : > { %2907 = vmatpush2.bf16.msra.mxu0 %v4088_v60  ;;  %v4184_v60 = vld [vmem:[%s5840_s1 + $0x4b0] ss:$8 sps:$4 sm:$0xff]  }
  0x82   : > { %2908 = vmatprep.subr.bf16.mxu0 %v4096_v61  ;;  %2950 = vmatpush2.bf16.msra.mxu1 %v4091_v62  ;;  %v4192_v61 = vld [vmem:[%s5840_s1 + $0x4a4] ss:$8 sps:$4 sm:$0xff]   ;;  %v4187_v62 = vld [vmem:[%s5840_s1 + $0x5b0] ss:$8 sps:$4 sm:$0xff]  }
  0x83   : > { %2951 = vmatprep.subr.bf16.mxu1 %v4099_v63  ;;  %v4195_v63 = vld [vmem:[%s5840_s1 + $0x5a4] ss:$8 sps:$4 sm:$0xff]  }
  0x85   : > { %2909 = vmatpush2.bf16.msra.mxu0 %v4094_v0  ;;  %v4190_v0 = vld [vmem:[%s5840_s1 + $0x4a0] ss:$8 sps:$4 sm:$0xff]  }
  0x86   : > { %2910 = vmatprep.subr.bf16.mxu0 %v4102_v1  ;;  %2952 = vmatpush2.bf16.msra.mxu1 %v4097_v2  ;;  %v4198_v1 = vld [vmem:[%s5840_s1 + $0x494] ss:$8 sps:$4 sm:$0xff]   ;;  %v4193_v2 = vld [vmem:[%s5840_s1 + $0x5a0] ss:$8 sps:$4 sm:$0xff]  }
  0x87   : > { %2953 = vmatprep.subr.bf16.mxu1 %v4105_v3  ;;  %v4201_v3 = vld [vmem:[%s5840_s1 + $0x594] ss:$8 sps:$4 sm:$0xff]  }
  0x89   : > { %2911 = vmatpush2.bf16.msra.mxu0 %v4100_v4  ;;  %v4196_v4 = vld [vmem:[%s5840_s1 + $0x490] ss:$8 sps:$4 sm:$0xff]  }
  0x8a   : > { %2966 = vmatprep.subr.bf16.mxu0 %v4111_v5  ;;  %2954 = vmatpush2.bf16.msra.mxu1 %v4103_v6  ;;  %v4204_v5 = vld [vmem:[%s5840_s1 + $0x484] ss:$8 sps:$4 sm:$0xff]   ;;  %v4199_v6 = vld [vmem:[%s5840_s1 + $0x590] ss:$8 sps:$4 sm:$0xff]  }
  0x8b   : > { %3009 = vmatprep.subr.bf16.mxu1 %v4117_v8  ;;  %v4207_v8 = vld [vmem:[%s5840_s1 + $0x584] ss:$8 sps:$4 sm:$0xff]  }
  0x8c   : > { %2913 = vmatmul.mubr.bf16.vlgmr.msra.gmra.mxu0 %v4106_v7  ;;  %v4202_v7 = vld [vmem:[%s5840_s1 + $0x480] ss:$8 sps:$4 sm:$0xff]  }
  0x8d   : > { %2967 = vmatpush1.bf16.msra.mxu0 %v4109_v9  ;;  %2956 = vmatmul.mubr.bf16.vlgmr.msra.gmra.mxu1 %v4112_v10  ;;  %v4205_v9 = vld [vmem:[%s5840_s1 + $0x580] ss:$8 sps:$4 sm:$0xff]   ;;  %v4213_v10 = vld [vmem:[%s5840_s1 + $0x674] ss:$8 sps:$4 sm:$0xff]  }
  0x8e   : > { %2968 = vmatprep.subr.bf16.mxu0 %v4120_v11  ;;  %3010 = vmatpush1.bf16.msra.mxu1 %v4115_v12  ;;  %v4208_v11 = vld [vmem:[%s4727_s10 + $0x20] ss:$100 sps:$4 sm:$0xff]   ;;  %v4211_v12 = vld [vmem:[%s5840_s1 + $0x670] ss:$8 sps:$4 sm:$0xff]  }
  0x8f   : > { %3011 = vmatprep.subr.bf16.mxu1 %v4123_v13  ;;  %2998 = vmatprep.mubr.bf16.mxu0 %v4210_v18  ;;  %v4214_v13 = vld [vmem:[%s4727_s10 + $0x28] ss:$100 sps:$4 sm:$0xff]   ;;  %v4318_v18 = vld [vmem:[%s4727_s10 + $0x3c] ss:$100 sps:$4 sm:$0xff]  }
  0x90   : > { %3041 = vmatprep.mubr.bf16.mxu1 %v4216_v22  ;;  %v4223_v22 = vld [vmem:[%s5840_s1 + $0x760] ss:$8 sps:$4 sm:$0xff]  }
  0x91   : > { %2969 = vmatpush1.bf16.msra.mxu0 %v4118_v14  ;;  %v4219_v14 = vld [vmem:[%s5840_s1 + $0x774] ss:$8 sps:$4 sm:$0xff]  }
  0x92   : > { %2970 = vmatprep.subr.bf16.mxu0 %v4126_v15  ;;  %3012 = vmatpush1.bf16.msra.mxu1 %v4121_v16  ;;  %v4312_v15 = vld [vmem:[%s4727_s10 + $0x34] ss:$100 sps:$4 sm:$0xff]   ;;  %v4222_v16 = vld [vmem:[%s5840_s1 + $0x664] ss:$8 sps:$4 sm:$0xff]  }
  0x93   : > { %3013 = vmatprep.subr.bf16.mxu1 %v4129_v17  ;;  %v4217_v17 = vld [vmem:[%s5840_s1 + $0x770] ss:$8 sps:$4 sm:$0xff]  }
  0x95   : > { %2971 = vmatpush1.bf16.msra.mxu0 %v4124_v19  ;;  %v4225_v19 = vld [vmem:[%s5840_s1 + $0x764] ss:$8 sps:$4 sm:$0xff]  }
  0x96   : > { %2972 = vmatprep.subr.bf16.mxu0 %v4132_v21  ;;  %3014 = vmatpush1.bf16.msra.mxu1 %v4127_v20  ;;  %v4220_v20 = vld [vmem:[%s5840_s1 + $0x660] ss:$8 sps:$4 sm:$0xff]   ;;  %v4228_v21 = vld [vmem:[%s5840_s1 + $0x654] ss:$8 sps:$4 sm:$0xff]  }
  0x97   : > { %3015 = vmatprep.subr.bf16.mxu1 %v4135_v23  ;;  %v4231_v23 = vld [vmem:[%s5840_s1 + $0x754] ss:$8 sps:$4 sm:$0xff]  }
  0x99   : > { %2973 = vmatpush1.bf16.msra.mxu0 %v4130_v24  ;;  %v4226_v24 = vld [vmem:[%s5840_s1 + $0x650] ss:$8 sps:$4 sm:$0xff]  }
  0x9a   : > { %2974 = vmatprep.subr.bf16.mxu0 %v4138_v25  ;;  %3016 = vmatpush1.bf16.msra.mxu1 %v4133_v26  ;;  %v4234_v25 = vld [vmem:[%s5840_s1 + $0x644] ss:$8 sps:$4 sm:$0xff]   ;;  %v4229_v26 = vld [vmem:[%s5840_s1 + $0x750] ss:$8 sps:$4 sm:$0xff]  }
  0x9b   : > { %3017 = vmatprep.subr.bf16.mxu1 %v4141_v27  ;;  %v4237_v27 = vld [vmem:[%s5840_s1 + $0x744] ss:$8 sps:$4 sm:$0xff]  }
  0x9d   : > { %2975 = vmatpush1.bf16.msra.mxu0 %v4136_v28  ;;  %v4232_v28 = vld [vmem:[%s5840_s1 + $0x640] ss:$8 sps:$4 sm:$0xff]  }
  0x9e   : > { %2976 = vmatprep.subr.bf16.mxu0 %v4144_v29  ;;  %3018 = vmatpush1.bf16.msra.mxu1 %v4139_v30  ;;  %v4240_v29 = vld [vmem:[%s5840_s1 + $0x634] ss:$8 sps:$4 sm:$0xff]   ;;  %v4235_v30 = vld [vmem:[%s5840_s1 + $0x740] ss:$8 sps:$4 sm:$0xff]  }
  0x9f   : > { %3019 = vmatprep.subr.bf16.mxu1 %v4147_v31  ;;  %v4243_v31 = vld [vmem:[%s5840_s1 + $0x734] ss:$8 sps:$4 sm:$0xff]  }
  0xa1   : > { %2977 = vmatpush1.bf16.msra.mxu0 %v4142_v32  ;;  %v4238_v32 = vld [vmem:[%s5840_s1 + $0x630] ss:$8 sps:$4 sm:$0xff]  }
  0xa2   : > { %2978 = vmatprep.subr.bf16.mxu0 %v4150_v33  ;;  %3020 = vmatpush1.bf16.msra.mxu1 %v4145_v34  ;;  %v4246_v33 = vld [vmem:[%s5840_s1 + $0x624] ss:$8 sps:$4 sm:$0xff]   ;;  %v4241_v34 = vld [vmem:[%s5840_s1 + $0x730] ss:$8 sps:$4 sm:$0xff]  }
  0xa3   : > { %3021 = vmatprep.subr.bf16.mxu1 %v4153_v35  ;;  %v4249_v35 = vld [vmem:[%s5840_s1 + $0x724] ss:$8 sps:$4 sm:$0xff]  }
  0xa5   : > { %2979 = vmatpush1.bf16.msra.mxu0 %v4148_v36  ;;  %v4244_v36 = vld [vmem:[%s5840_s1 + $0x620] ss:$8 sps:$4 sm:$0xff]  }
  0xa6   : > { %2980 = vmatprep.subr.bf16.mxu0 %v4156_v37  ;;  %3022 = vmatpush1.bf16.msra.mxu1 %v4151_v38  ;;  %v4252_v37 = vld [vmem:[%s5840_s1 + $0x614] ss:$8 sps:$4 sm:$0xff]   ;;  %v4247_v38 = vld [vmem:[%s5840_s1 + $0x720] ss:$8 sps:$4 sm:$0xff]  }
  0xa7   : > { %3023 = vmatprep.subr.bf16.mxu1 %v4159_v39  ;;  %v4255_v39 = vld [vmem:[%s5840_s1 + $0x714] ss:$8 sps:$4 sm:$0xff]  }
  0xa9   : > { %2981 = vmatpush1.bf16.msra.mxu0 %v4154_v40  ;;  %v4250_v40 = vld [vmem:[%s5840_s1 + $0x610] ss:$8 sps:$4 sm:$0xff]  }
  0xaa   : > { %2982 = vmatprep.subr.bf16.mxu0 %v4162_v41  ;;  %3024 = vmatpush1.bf16.msra.mxu1 %v4157_v42  ;;  %v4258_v41 = vld [vmem:[%s5840_s1 + $0x604] ss:$8 sps:$4 sm:$0xff]   ;;  %v4253_v42 = vld [vmem:[%s5840_s1 + $0x710] ss:$8 sps:$4 sm:$0xff]  }
  0xab   : > { %3025 = vmatprep.subr.bf16.mxu1 %v4165_v43  ;;  %v4261_v43 = vld [vmem:[%s5840_s1 + $0x704] ss:$8 sps:$4 sm:$0xff]  }
  0xad   : > { %2983 = vmatpush2.bf16.msra.mxu0 %v4160_v44  ;;  %v4256_v44 = vld [vmem:[%s5840_s1 + $0x600] ss:$8 sps:$4 sm:$0xff]  }
  0xae   : > { %2984 = vmatprep.subr.bf16.mxu0 %v4168_v45  ;;  %3026 = vmatpush2.bf16.msra.mxu1 %v4163_v46  ;;  %v4264_v45 = vld [vmem:[%s5840_s1 + $0x6f4] ss:$8 sps:$4 sm:$0xff]   ;;  %v4259_v46 = vld [vmem:[%s5840_s1 + $0x700] ss:$8 sps:$4 sm:$0xff]  }
  0xaf   : > { %3027 = vmatprep.subr.bf16.mxu1 %v4171_v47  ;;  %v4267_v47 = vld [vmem:[%s5840_s1 + $0x7f4] ss:$8 sps:$4 sm:$0xff]  }
  0xb1   : > { %2985 = vmatpush2.bf16.msra.mxu0 %v4166_v48  ;;  %v4262_v48 = vld [vmem:[%s5840_s1 + $0x6f0] ss:$8 sps:$4 sm:$0xff]  }
  0xb2   : > { %2986 = vmatprep.subr.bf16.mxu0 %v4174_v49  ;;  %3028 = vmatpush2.bf16.msra.mxu1 %v4169_v50  ;;  %v4270_v49 = vld [vmem:[%s5840_s1 + $0x6e4] ss:$8 sps:$4 sm:$0xff]   ;;  %v4265_v50 = vld [vmem:[%s5840_s1 + $0x7f0] ss:$8 sps:$4 sm:$0xff]  }
  0xb3   : > { %3029 = vmatprep.subr.bf16.mxu1 %v4177_v51  ;;  %v4273_v51 = vld [vmem:[%s5840_s1 + $0x7e4] ss:$8 sps:$4 sm:$0xff]  }
  0xb5   : > { %2987 = vmatpush2.bf16.msra.mxu0 %v4172_v52  ;;  %v4268_v52 = vld [vmem:[%s5840_s1 + $0x6e0] ss:$8 sps:$4 sm:$0xff]  }
  0xb6   : > { %2988 = vmatprep.subr.bf16.mxu0 %v4180_v53  ;;  %3030 = vmatpush2.bf16.msra.mxu1 %v4175_v54  ;;  %v4276_v53 = vld [vmem:[%s5840_s1 + $0x6d4] ss:$8 sps:$4 sm:$0xff]   ;;  %v4271_v54 = vld [vmem:[%s5840_s1 + $0x7e0] ss:$8 sps:$4 sm:$0xff]  }
  0xb7   : > { %3031 = vmatprep.subr.bf16.mxu1 %v4183_v55  ;;  %v4279_v55 = vld [vmem:[%s5840_s1 + $0x7d4] ss:$8 sps:$4 sm:$0xff]  }
  0xb9   : > { %2989 = vmatpush2.bf16.msra.mxu0 %v4178_v56  ;;  %v4274_v56 = vld [vmem:[%s5840_s1 + $0x6d0] ss:$8 sps:$4 sm:$0xff]  }
  0xba   : > { %2990 = vmatprep.subr.bf16.mxu0 %v4186_v57  ;;  %3032 = vmatpush2.bf16.msra.mxu1 %v4181_v58  ;;  %v4282_v57 = vld [vmem:[%s5840_s1 + $0x6c4] ss:$8 sps:$4 sm:$0xff]   ;;  %v4277_v58 = vld [vmem:[%s5840_s1 + $0x7d0] ss:$8 sps:$4 sm:$0xff]  }
  0xbb   : > { %3033 = vmatprep.subr.bf16.mxu1 %v4189_v59  ;;  %v4285_v59 = vld [vmem:[%s5840_s1 + $0x7c4] ss:$8 sps:$4 sm:$0xff]  }
  0xbd   : > { %2991 = vmatpush2.bf16.msra.mxu0 %v4184_v60  ;;  %v4280_v60 = vld [vmem:[%s5840_s1 + $0x6c0] ss:$8 sps:$4 sm:$0xff]  }
  0xbe   : > { %2992 = vmatprep.subr.bf16.mxu0 %v4192_v61  ;;  %3034 = vmatpush2.bf16.msra.mxu1 %v4187_v62  ;;  %v4288_v61 = vld [vmem:[%s5840_s1 + $0x6b4] ss:$8 sps:$4 sm:$0xff]   ;;  %v4283_v62 = vld [vmem:[%s5840_s1 + $0x7c0] ss:$8 sps:$4 sm:$0xff]  }
  0xbf   : > { %3035 = vmatprep.subr.bf16.mxu1 %v4195_v63  ;;  %v4291_v63 = vld [vmem:[%s5840_s1 + $0x7b4] ss:$8 sps:$4 sm:$0xff]  }
  0xc1   : > { %2993 = vmatpush2.bf16.msra.mxu0 %v4190_v0  ;;  %v4286_v0 = vld [vmem:[%s5840_s1 + $0x6b0] ss:$8 sps:$4 sm:$0xff]  }
  0xc2   : > { %2994 = vmatprep.subr.bf16.mxu0 %v4198_v1  ;;  %3036 = vmatpush2.bf16.msra.mxu1 %v4193_v2  ;;  %v4294_v1 = vld [vmem:[%s5840_s1 + $0x6a4] ss:$8 sps:$4 sm:$0xff]   ;;  %v4289_v2 = vld [vmem:[%s5840_s1 + $0x7b0] ss:$8 sps:$4 sm:$0xff]  }
  0xc3   : > { %3037 = vmatprep.subr.bf16.mxu1 %v4201_v3  ;;  %v4297_v3 = vld [vmem:[%s5840_s1 + $0x7a4] ss:$8 sps:$4 sm:$0xff]  }
  0xc5   : > { %2995 = vmatpush2.bf16.msra.mxu0 %v4196_v4  ;;  %v4292_v4 = vld [vmem:[%s5840_s1 + $0x6a0] ss:$8 sps:$4 sm:$0xff]  }
  0xc6   : > { %2996 = vmatprep.subr.bf16.mxu0 %v4204_v5  ;;  %3038 = vmatpush2.bf16.msra.mxu1 %v4199_v6  ;;  %v4300_v5 = vld [vmem:[%s5840_s1 + $0x694] ss:$8 sps:$4 sm:$0xff]   ;;  %v4295_v6 = vld [vmem:[%s5840_s1 + $0x7a0] ss:$8 sps:$4 sm:$0xff]  }
  0xc7   : > { %3039 = vmatprep.subr.bf16.mxu1 %v4207_v8  ;;  %v4298_v8 = vld [vmem:[%s5840_s1 + $0x690] ss:$8 sps:$4 sm:$0xff]  }
  0xc9   : > { %2997 = vmatpush2.bf16.msra.mxu0 %v4202_v7  ;;  %v4303_v7 = vld [vmem:[%s5840_s1 + $0x794] ss:$8 sps:$4 sm:$0xff]  }
  0xca   : > { %3052 = vmatprep.subr.bf16.mxu0 %v4213_v10  ;;  %3040 = vmatpush2.bf16.msra.mxu1 %v4205_v9  ;;  %v4306_v9 = vld [vmem:[%s5840_s1 + $0x684] ss:$8 sps:$4 sm:$0xff]   ;;  %v4301_v10 = vld [vmem:[%s5840_s1 + $0x790] ss:$8 sps:$4 sm:$0xff]  }
  0xcb   : > { %3095 = vmatprep.subr.bf16.mxu1 %v4219_v14  ;;  %v4315_v14 = vld [vmem:[%s5840_s1 + $0x874] ss:$8 sps:$4 sm:$0xff]  }
  0xcc   : > { %2999 = vmatmul.mubr.bf16.vlgmr.msra.gmra.mxu0 %v4208_v11  ;;  %v4304_v11 = vld [vmem:[%s5840_s1 + $0x680] ss:$8 sps:$4 sm:$0xff]  }
  0xcd   : > { %3053 = vmatpush1.bf16.msra.mxu0 %v4211_v12  ;;  %3084 = vmatprep.mubr.bf16.mxu0 %v4312_v15  ;;  %v4309_v12 = vld [vmem:[%s5840_s1 + $0x784] ss:$8 sps:$4 sm:$0xff]   ;;  %v4310_v15 = vld [vmem:[%s4727_s10 + $0x30] ss:$100 sps:$4 sm:$0xff]  }
  0xce   : > { %3042 = vmatmul.mubr.bf16.vlgmr.msra.gmra.mxu1 %v4214_v13  ;;  %3054 = vmatprep.subr.bf16.mxu0 %v4222_v16  ;;  %v4307_v13 = vld [vmem:[%s5840_s1 + $0x780] ss:$8 sps:$4 sm:$0xff]   ;;  %v4313_v16 = vld [vmem:[%s5840_s1 + $0x870] ss:$8 sps:$4 sm:$0xff]  }
  0xcf   : > { %3096 = vmatpush1.bf16.msra.mxu1 %v4217_v17  ;;  %3127 = vmatprep.mubr.bf16.mxu1 %v4318_v18  ;;  %v4316_v17 = vld [vmem:[%s4727_s10 + $0x38] ss:$100 sps:$4 sm:$0xff]  }
  0xd0   : > { %3097 = vmatprep.subr.bf16.mxu1 %v4225_v19  ;;  %v4321_v18 = vld [vmem:[%s5840_s1 + $0x974] ss:$8 sps:$4 sm:$0xff]   ;;  %v4414_v19 = vld [vmem:[%s4727_s10 + $0x44] ss:$100 sps:$4 sm:$0xff]  }
  0xd1   : > { %3055 = vmatpush1.bf16.msra.mxu0 %v4220_v20  ;;  %v4324_v20 = vld [vmem:[%s5840_s1 + $0x864] ss:$8 sps:$4 sm:$0xff]  }
  0xd2   : > { %3056 = vmatprep.subr.bf16.mxu0 %v4228_v21  ;;  %v4319_v21 = vld [vmem:[%s5840_s1 + $0x970] ss:$8 sps:$4 sm:$0xff]  }
  0xd3   : > { %3098 = vmatpush1.bf16.msra.mxu1 %v4223_v22  ;;  %v4420_v22 = vld [vmem:[%s4727_s10 + $0x4c] ss:$100 sps:$4 sm:$0xff]  }
  0xd4   : > { %3099 = vmatprep.subr.bf16.mxu1 %v4231_v23  ;;  %v4327_v23 = vld [vmem:[%s5840_s1 + $0x964] ss:$8 sps:$4 sm:$0xff]  }
  0xd5   : > { %3057 = vmatpush1.bf16.msra.mxu0 %v4226_v24  ;;  %v4322_v24 = vld [vmem:[%s5840_s1 + $0x860] ss:$8 sps:$4 sm:$0xff]  }
  0xd6   : > { %3058 = vmatprep.subr.bf16.mxu0 %v4234_v25  ;;  %v4330_v25 = vld [vmem:[%s5840_s1 + $0x854] ss:$8 sps:$4 sm:$0xff]  }
  0xd7   : > { %3100 = vmatpush1.bf16.msra.mxu1 %v4229_v26  ;;  %v4325_v26 = vld [vmem:[%s5840_s1 + $0x960] ss:$8 sps:$4 sm:$0xff]  }
  0xd8   : > { %3101 = vmatprep.subr.bf16.mxu1 %v4237_v27  ;;  %v4333_v27 = vld [vmem:[%s5840_s1 + $0x954] ss:$8 sps:$4 sm:$0xff]  }
  0xd9   : > { %3059 = vmatpush1.bf16.msra.mxu0 %v4232_v28  ;;  %v4328_v28 = vld [vmem:[%s5840_s1 + $0x850] ss:$8 sps:$4 sm:$0xff]  }
  0xda   : > { %3060 = vmatprep.subr.bf16.mxu0 %v4240_v29  ;;  %v4336_v29 = vld [vmem:[%s5840_s1 + $0x844] ss:$8 sps:$4 sm:$0xff]  }
  0xdb   : > { %3102 = vmatpush1.bf16.msra.mxu1 %v4235_v30  ;;  %v4331_v30 = vld [vmem:[%s5840_s1 + $0x950] ss:$8 sps:$4 sm:$0xff]  }
  0xdc   : > { %3103 = vmatprep.subr.bf16.mxu1 %v4243_v31  ;;  %v4339_v31 = vld [vmem:[%s5840_s1 + $0x944] ss:$8 sps:$4 sm:$0xff]  }
  0xdd   : > { %3061 = vmatpush1.bf16.msra.mxu0 %v4238_v32  ;;  %v4334_v32 = vld [vmem:[%s5840_s1 + $0x840] ss:$8 sps:$4 sm:$0xff]  }
  0xde   : > { %3062 = vmatprep.subr.bf16.mxu0 %v4246_v33  ;;  %v4342_v33 = vld [vmem:[%s5840_s1 + $0x834] ss:$8 sps:$4 sm:$0xff]  }
  0xdf   : > { %3104 = vmatpush1.bf16.msra.mxu1 %v4241_v34  ;;  %v4337_v34 = vld [vmem:[%s5840_s1 + $0x940] ss:$8 sps:$4 sm:$0xff]  }
  0xe0   : > { %3105 = vmatprep.subr.bf16.mxu1 %v4249_v35  ;;  %v4345_v35 = vld [vmem:[%s5840_s1 + $0x934] ss:$8 sps:$4 sm:$0xff]  }
  0xe1   : > { %3063 = vmatpush1.bf16.msra.mxu0 %v4244_v36  ;;  %v4340_v36 = vld [vmem:[%s5840_s1 + $0x830] ss:$8 sps:$4 sm:$0xff]  }
  0xe2   : > { %3064 = vmatprep.subr.bf16.mxu0 %v4252_v37  ;;  %v4348_v37 = vld [vmem:[%s5840_s1 + $0x824] ss:$8 sps:$4 sm:$0xff]  }
  0xe3   : > { %3106 = vmatpush1.bf16.msra.mxu1 %v4247_v38  ;;  %v4343_v38 = vld [vmem:[%s5840_s1 + $0x930] ss:$8 sps:$4 sm:$0xff]  }
  0xe4   : > { %3107 = vmatprep.subr.bf16.mxu1 %v4255_v39  ;;  %v4351_v39 = vld [vmem:[%s5840_s1 + $0x924] ss:$8 sps:$4 sm:$0xff]  }
  0xe5   : > { %3065 = vmatpush1.bf16.msra.mxu0 %v4250_v40  ;;  %v4346_v40 = vld [vmem:[%s5840_s1 + $0x820] ss:$8 sps:$4 sm:$0xff]  }
  0xe6   : > { %3066 = vmatprep.subr.bf16.mxu0 %v4258_v41  ;;  %v4354_v41 = vld [vmem:[%s5840_s1 + $0x814] ss:$8 sps:$4 sm:$0xff]  }
  0xe7   : > { %3108 = vmatpush1.bf16.msra.mxu1 %v4253_v42  ;;  %v4349_v42 = vld [vmem:[%s5840_s1 + $0x920] ss:$8 sps:$4 sm:$0xff]  }
  0xe8   : > { %3109 = vmatprep.subr.bf16.mxu1 %v4261_v43  ;;  %v4357_v43 = vld [vmem:[%s5840_s1 + $0x914] ss:$8 sps:$4 sm:$0xff]  }
  0xe9   : > { %3067 = vmatpush1.bf16.msra.mxu0 %v4256_v44  ;;  %v4352_v44 = vld [vmem:[%s5840_s1 + $0x810] ss:$8 sps:$4 sm:$0xff]  }
  0xea   : > { %3068 = vmatprep.subr.bf16.mxu0 %v4264_v45  ;;  %v4360_v45 = vld [vmem:[%s5840_s1 + $0x804] ss:$8 sps:$4 sm:$0xff]  }
  0xeb   : > { %3110 = vmatpush1.bf16.msra.mxu1 %v4259_v46  ;;  %v4355_v46 = vld [vmem:[%s5840_s1 + $0x910] ss:$8 sps:$4 sm:$0xff]  }
  0xec   : > { %3111 = vmatprep.subr.bf16.mxu1 %v4267_v47  ;;  %v4363_v47 = vld [vmem:[%s5840_s1 + $0x904] ss:$8 sps:$4 sm:$0xff]  }
  0xed   : > { %3069 = vmatpush2.bf16.msra.mxu0 %v4262_v48  ;;  %v4358_v48 = vld [vmem:[%s5840_s1 + $0x800] ss:$8 sps:$4 sm:$0xff]  }
  0xee   : > { %3070 = vmatprep.subr.bf16.mxu0 %v4270_v49  ;;  %v4366_v49 = vld [vmem:[%s5840_s1 + $0x8f4] ss:$8 sps:$4 sm:$0xff]  }
  0xef   : > { %3112 = vmatpush2.bf16.msra.mxu1 %v4265_v50  ;;  %v4361_v50 = vld [vmem:[%s5840_s1 + $0x900] ss:$8 sps:$4 sm:$0xff]  }
  0xf0   : > { %3113 = vmatprep.subr.bf16.mxu1 %v4273_v51  ;;  %v4369_v51 = vld [vmem:[%s5840_s1 + $0x9f4] ss:$8 sps:$4 sm:$0xff]  }
  0xf1   : > { %3071 = vmatpush2.bf16.msra.mxu0 %v4268_v52  ;;  %v4364_v52 = vld [vmem:[%s5840_s1 + $0x8f0] ss:$8 sps:$4 sm:$0xff]  }
  0xf2   : > { %3072 = vmatprep.subr.bf16.mxu0 %v4276_v53  ;;  %v4372_v53 = vld [vmem:[%s5840_s1 + $0x8e4] ss:$8 sps:$4 sm:$0xff]  }
  0xf3   : > { %3114 = vmatpush2.bf16.msra.mxu1 %v4271_v54  ;;  %v4367_v54 = vld [vmem:[%s5840_s1 + $0x9f0] ss:$8 sps:$4 sm:$0xff]  }
  0xf4   : > { %3115 = vmatprep.subr.bf16.mxu1 %v4279_v55  ;;  %v4375_v55 = vld [vmem:[%s5840_s1 + $0x9e4] ss:$8 sps:$4 sm:$0xff]  }
  0xf5   : > { %3073 = vmatpush2.bf16.msra.mxu0 %v4274_v56  ;;  %v4370_v56 = vld [vmem:[%s5840_s1 + $0x8e0] ss:$8 sps:$4 sm:$0xff]  }
  0xf6   : > { %3074 = vmatprep.subr.bf16.mxu0 %v4282_v57  ;;  %v4378_v57 = vld [vmem:[%s5840_s1 + $0x8d4] ss:$8 sps:$4 sm:$0xff]  }
  0xf7   : > { %3116 = vmatpush2.bf16.msra.mxu1 %v4277_v58  ;;  %v4373_v58 = vld [vmem:[%s5840_s1 + $0x9e0] ss:$8 sps:$4 sm:$0xff]  }
  0xf8   : > { %3117 = vmatprep.subr.bf16.mxu1 %v4285_v59  ;;  %v4381_v59 = vld [vmem:[%s5840_s1 + $0x9d4] ss:$8 sps:$4 sm:$0xff]  }
  0xf9   : > { %3075 = vmatpush2.bf16.msra.mxu0 %v4280_v60  ;;  %v4376_v60 = vld [vmem:[%s5840_s1 + $0x8d0] ss:$8 sps:$4 sm:$0xff]  }
  0xfa   : > { %3076 = vmatprep.subr.bf16.mxu0 %v4288_v61  ;;  %v4384_v61 = vld [vmem:[%s5840_s1 + $0x8c4] ss:$8 sps:$4 sm:$0xff]  }
  0xfb   : > { %3118 = vmatpush2.bf16.msra.mxu1 %v4283_v62  ;;  %v4379_v62 = vld [vmem:[%s5840_s1 + $0x9d0] ss:$8 sps:$4 sm:$0xff]  }
  0xfc   : > { %3119 = vmatprep.subr.bf16.mxu1 %v4291_v63  ;;  %v4387_v63 = vld [vmem:[%s5840_s1 + $0x9c4] ss:$8 sps:$4 sm:$0xff]  }
  0xfd   : > { %3077 = vmatpush2.bf16.msra.mxu0 %v4286_v0  ;;  %v4382_v0 = vld [vmem:[%s5840_s1 + $0x8c0] ss:$8 sps:$4 sm:$0xff]  }
  0xfe   : > { %3078 = vmatprep.subr.bf16.mxu0 %v4294_v1  ;;  %v4390_v1 = vld [vmem:[%s5840_s1 + $0x8b4] ss:$8 sps:$4 sm:$0xff]  }
  0xff   : > { %3120 = vmatpush2.bf16.msra.mxu1 %v4289_v2  ;;  %v4385_v2 = vld [vmem:[%s5840_s1 + $0x9c0] ss:$8 sps:$4 sm:$0xff]  }
 0x100   : > { %3121 = vmatprep.subr.bf16.mxu1 %v4297_v3  ;;  %v4393_v3 = vld [vmem:[%s5840_s1 + $0x9b4] ss:$8 sps:$4 sm:$0xff]  }
 0x101   : > { %3079 = vmatpush2.bf16.msra.mxu0 %v4292_v4  ;;  %v4388_v4 = vld [vmem:[%s5840_s1 + $0x8b0] ss:$8 sps:$4 sm:$0xff]  }
 0x102   : > { %3080 = vmatprep.subr.bf16.mxu0 %v4300_v5  ;;  %v4396_v5 = vld [vmem:[%s5840_s1 + $0x8a4] ss:$8 sps:$4 sm:$0xff]  }
 0x103   : > { %3122 = vmatpush2.bf16.msra.mxu1 %v4295_v6  ;;  %v4391_v6 = vld [vmem:[%s5840_s1 + $0x9b0] ss:$8 sps:$4 sm:$0xff]  }
 0x104   : > { %3123 = vmatprep.subr.bf16.mxu1 %v4303_v7  ;;  %v4399_v7 = vld [vmem:[%s5840_s1 + $0x9a4] ss:$8 sps:$4 sm:$0xff]  }
 0x105   : > { %3081 = vmatpush2.bf16.msra.mxu0 %v4298_v8  ;;  %v4394_v8 = vld [vmem:[%s5840_s1 + $0x8a0] ss:$8 sps:$4 sm:$0xff]  }
 0x106   : > { %3082 = vmatprep.subr.bf16.mxu0 %v4306_v9  ;;  %v4402_v9 = vld [vmem:[%s5840_s1 + $0x894] ss:$8 sps:$4 sm:$0xff]  }
 0x107   : > { %3124 = vmatpush2.bf16.msra.mxu1 %v4301_v10  ;;  %v4397_v10 = vld [vmem:[%s5840_s1 + $0x9a0] ss:$8 sps:$4 sm:$0xff]  }
 0x108   : > { %3125 = vmatprep.subr.bf16.mxu1 %v4309_v12  ;;  %v4400_v12 = vld [vmem:[%s5840_s1 + $0x890] ss:$8 sps:$4 sm:$0xff]  }
 0x109   : > { %3083 = vmatpush2.bf16.msra.mxu0 %v4304_v11  ;;  %v4405_v11 = vld [vmem:[%s5840_s1 + $0x994] ss:$8 sps:$4 sm:$0xff]  }
 0x10a   : > { %3138 = vmatprep.subr.bf16.mxu0 %v4315_v14  ;;  %v4403_v14 = vld [vmem:[%s5840_s1 + $0x990] ss:$8 sps:$4 sm:$0xff]  }
 0x10b   : > { %3126 = vmatpush2.bf16.msra.mxu1 %v4307_v13  ;;  %v4408_v13 = vld [vmem:[%s5840_s1 + $0x884] ss:$8 sps:$4 sm:$0xff]  }
 0x10c   : > { %3085 = vmatmul.mubr.bf16.vlgmr.msra.gmra.mxu0 %v4310_v15  ;;  %3181 = vmatprep.subr.bf16.mxu1 %v4321_v18  ;;  %v4411_v15 = vld [vmem:[%s5840_s1 + $0x984] ss:$8 sps:$4 sm:$0xff]   ;;  %v4409_v18 = vld [vmem:[%s5840_s1 + $0x980] ss:$8 sps:$4 sm:$0xff]  }
 0x10d   : > { %3139 = vmatpush1.bf16.msra.mxu0 %v4313_v16  ;;  %3170 = vmatprep.mubr.bf16.mxu0 %v4414_v19  ;;  %v4406_v16 = vld [vmem:[%s5840_s1 + $0x880] ss:$8 sps:$4 sm:$0xff]  }
 0x10e   : > { %3128 = vmatmul.mubr.bf16.vlgmr.msra.gmra.mxu1 %v4316_v17  ;;  %3140 = vmatprep.subr.bf16.mxu0 %v4324_v20  ;;  %v4417_v17 = vld [vmem:[%s5840_s1 + $0xa74] ss:$8 sps:$4 sm:$0xff]   ;;  %v4412_v19 = vld [vmem:[%s4727_s10 + $0x40] ss:$100 sps:$4 sm:$0xff]  }
 0x10f   : > { %3182 = vmatpush1.bf16.msra.mxu1 %v4319_v21  ;;  %3213 = vmatprep.mubr.bf16.mxu1 %v4420_v22  ;;  %v4423_v20 = vld [vmem:[%s5840_s1 + $0xb74] ss:$8 sps:$4 sm:$0xff]   ;;  %v4415_v21 = vld [vmem:[%s5840_s1 + $0xa70] ss:$8 sps:$4 sm:$0xff]  }
 0x110   : > { %3183 = vmatprep.subr.bf16.mxu1 %v4327_v23  ;;  %v4516_v22 = vld [vmem:[%s4727_s10 + $0x54] ss:$100 sps:$4 sm:$0xff]   ;;  %v4418_v23 = vld [vmem:[%s4727_s10 + $0x48] ss:$100 sps:$4 sm:$0xff]  }
 0x111   : > { %3141 = vmatpush1.bf16.msra.mxu0 %v4322_v24  ;;  %v4426_v24 = vld [vmem:[%s5840_s1 + $0xa64] ss:$8 sps:$4 sm:$0xff]  }
 0x112   : > { %3142 = vmatprep.subr.bf16.mxu0 %v4330_v25  ;;  %v4421_v25 = vld [vmem:[%s5840_s1 + $0xb70] ss:$8 sps:$4 sm:$0xff]  }
 0x113   : > { %3184 = vmatpush1.bf16.msra.mxu1 %v4325_v26  ;;  %v4522_v26 = vld [vmem:[%s4727_s10 + $0x5c] ss:$100 sps:$4 sm:$0xff]  }
 0x114   : > { %3185 = vmatprep.subr.bf16.mxu1 %v4333_v27  ;;  %v4429_v27 = vld [vmem:[%s5840_s1 + $0xb64] ss:$8 sps:$4 sm:$0xff]  }
 0x115   : > { %3143 = vmatpush1.bf16.msra.mxu0 %v4328_v28  ;;  %v4424_v28 = vld [vmem:[%s5840_s1 + $0xa60] ss:$8 sps:$4 sm:$0xff]  }
 0x116   : > { %3144 = vmatprep.subr.bf16.mxu0 %v4336_v29  ;;  %v4432_v29 = vld [vmem:[%s5840_s1 + $0xa54] ss:$8 sps:$4 sm:$0xff]  }
 0x117   : > { %3186 = vmatpush1.bf16.msra.mxu1 %v4331_v30  ;;  %v4427_v30 = vld [vmem:[%s5840_s1 + $0xb60] ss:$8 sps:$4 sm:$0xff]  }
 0x118   : > { %3187 = vmatprep.subr.bf16.mxu1 %v4339_v31  ;;  %v4435_v31 = vld [vmem:[%s5840_s1 + $0xb54] ss:$8 sps:$4 sm:$0xff]  }
 0x119   : > { %3145 = vmatpush1.bf16.msra.mxu0 %v4334_v32  ;;  %v4430_v32 = vld [vmem:[%s5840_s1 + $0xa50] ss:$8 sps:$4 sm:$0xff]  }
 0x11a   : > { %3146 = vmatprep.subr.bf16.mxu0 %v4342_v33  ;;  %v4438_v33 = vld [vmem:[%s5840_s1 + $0xa44] ss:$8 sps:$4 sm:$0xff]  }
 0x11b   : > { %3188 = vmatpush1.bf16.msra.mxu1 %v4337_v34  ;;  %v4433_v34 = vld [vmem:[%s5840_s1 + $0xb50] ss:$8 sps:$4 sm:$0xff]  }
 0x11c   : > { %3189 = vmatprep.subr.bf16.mxu1 %v4345_v35  ;;  %v4441_v35 = vld [vmem:[%s5840_s1 + $0xb44] ss:$8 sps:$4 sm:$0xff]  }
 0x11d   : > { %3147 = vmatpush1.bf16.msra.mxu0 %v4340_v36  ;;  %v4436_v36 = vld [vmem:[%s5840_s1 + $0xa40] ss:$8 sps:$4 sm:$0xff]  }
 0x11e   : > { %3148 = vmatprep.subr.bf16.mxu0 %v4348_v37  ;;  %v4444_v37 = vld [vmem:[%s5840_s1 + $0xa34] ss:$8 sps:$4 sm:$0xff]  }
 0x11f   : > { %3190 = vmatpush1.bf16.msra.mxu1 %v4343_v38  ;;  %v4439_v38 = vld [vmem:[%s5840_s1 + $0xb40] ss:$8 sps:$4 sm:$0xff]  }
 0x120   : > { %3191 = vmatprep.subr.bf16.mxu1 %v4351_v39  ;;  %v4447_v39 = vld [vmem:[%s5840_s1 + $0xb34] ss:$8 sps:$4 sm:$0xff]  }
 0x121   : > { %3149 = vmatpush1.bf16.msra.mxu0 %v4346_v40  ;;  %v4442_v40 = vld [vmem:[%s5840_s1 + $0xa30] ss:$8 sps:$4 sm:$0xff]  }
 0x122   : > { %3150 = vmatprep.subr.bf16.mxu0 %v4354_v41  ;;  %v4450_v41 = vld [vmem:[%s5840_s1 + $0xa24] ss:$8 sps:$4 sm:$0xff]  }
 0x123   : > { %3192 = vmatpush1.bf16.msra.mxu1 %v4349_v42  ;;  %v4445_v42 = vld [vmem:[%s5840_s1 + $0xb30] ss:$8 sps:$4 sm:$0xff]  }
 0x124   : > { %3193 = vmatprep.subr.bf16.mxu1 %v4357_v43  ;;  %v4453_v43 = vld [vmem:[%s5840_s1 + $0xb24] ss:$8 sps:$4 sm:$0xff]  }
 0x125   : > { %3151 = vmatpush1.bf16.msra.mxu0 %v4352_v44  ;;  %v4448_v44 = vld [vmem:[%s5840_s1 + $0xa20] ss:$8 sps:$4 sm:$0xff]  }
 0x126   : > { %3152 = vmatprep.subr.bf16.mxu0 %v4360_v45  ;;  %v4456_v45 = vld [vmem:[%s5840_s1 + $0xa14] ss:$8 sps:$4 sm:$0xff]  }
 0x127   : > { %3194 = vmatpush1.bf16.msra.mxu1 %v4355_v46  ;;  %v4451_v46 = vld [vmem:[%s5840_s1 + $0xb20] ss:$8 sps:$4 sm:$0xff]  }
 0x128   : > { %3195 = vmatprep.subr.bf16.mxu1 %v4363_v47  ;;  %v4459_v47 = vld [vmem:[%s5840_s1 + $0xb14] ss:$8 sps:$4 sm:$0xff]  }
 0x129   : > { %3153 = vmatpush1.bf16.msra.mxu0 %v4358_v48  ;;  %v4454_v48 = vld [vmem:[%s5840_s1 + $0xa10] ss:$8 sps:$4 sm:$0xff]  }
 0x12a   : > { %3154 = vmatprep.subr.bf16.mxu0 %v4366_v49  ;;  %v4462_v49 = vld [vmem:[%s5840_s1 + $0xa04] ss:$8 sps:$4 sm:$0xff]  }
 0x12b   : > { %3196 = vmatpush1.bf16.msra.mxu1 %v4361_v50  ;;  %v4457_v50 = vld [vmem:[%s5840_s1 + $0xb10] ss:$8 sps:$4 sm:$0xff]  }
 0x12c   : > { %3197 = vmatprep.subr.bf16.mxu1 %v4369_v51  ;;  %v4465_v51 = vld [vmem:[%s5840_s1 + $0xb04] ss:$8 sps:$4 sm:$0xff]  }
 0x12d   : > { %3155 = vmatpush2.bf16.msra.mxu0 %v4364_v52  ;;  %v4460_v52 = vld [vmem:[%s5840_s1 + $0xa00] ss:$8 sps:$4 sm:$0xff]  }
 0x12e   : > { %3156 = vmatprep.subr.bf16.mxu0 %v4372_v53  ;;  %v4468_v53 = vld [vmem:[%s5840_s1 + $0xaf4] ss:$8 sps:$4 sm:$0xff]  }
 0x12f   : > { %3198 = vmatpush2.bf16.msra.mxu1 %v4367_v54  ;;  %v4463_v54 = vld [vmem:[%s5840_s1 + $0xb00] ss:$8 sps:$4 sm:$0xff]  }
 0x130   : > { %3199 = vmatprep.subr.bf16.mxu1 %v4375_v55  ;;  %v4471_v55 = vld [vmem:[%s5840_s1 + $0xbf4] ss:$8 sps:$4 sm:$0xff]  }
 0x131   : > { %3157 = vmatpush2.bf16.msra.mxu0 %v4370_v56  ;;  %v4466_v56 = vld [vmem:[%s5840_s1 + $0xaf0] ss:$8 sps:$4 sm:$0xff]  }
 0x132   : > { %3158 = vmatprep.subr.bf16.mxu0 %v4378_v57  ;;  %v4474_v57 = vld [vmem:[%s5840_s1 + $0xae4] ss:$8 sps:$4 sm:$0xff]  }
 0x133   : > { %3200 = vmatpush2.bf16.msra.mxu1 %v4373_v58  ;;  %v4469_v58 = vld [vmem:[%s5840_s1 + $0xbf0] ss:$8 sps:$4 sm:$0xff]  }
 0x134   : > { %3201 = vmatprep.subr.bf16.mxu1 %v4381_v59  ;;  %v4477_v59 = vld [vmem:[%s5840_s1 + $0xbe4] ss:$8 sps:$4 sm:$0xff]  }
 0x135   : > { %3159 = vmatpush2.bf16.msra.mxu0 %v4376_v60  ;;  %v4472_v60 = vld [vmem:[%s5840_s1 + $0xae0] ss:$8 sps:$4 sm:$0xff]  }
 0x136   : > { %3160 = vmatprep.subr.bf16.mxu0 %v4384_v61  ;;  %v4480_v61 = vld [vmem:[%s5840_s1 + $0xad4] ss:$8 sps:$4 sm:$0xff]  }
 0x137   : > { %3202 = vmatpush2.bf16.msra.mxu1 %v4379_v62  ;;  %v4475_v62 = vld [vmem:[%s5840_s1 + $0xbe0] ss:$8 sps:$4 sm:$0xff]  }
 0x138   : > { %3203 = vmatprep.subr.bf16.mxu1 %v4387_v63  ;;  %v4483_v63 = vld [vmem:[%s5840_s1 + $0xbd4] ss:$8 sps:$4 sm:$0xff]  }
 0x139   : > { %3161 = vmatpush2.bf16.msra.mxu0 %v4382_v0  ;;  %v4478_v0 = vld [vmem:[%s5840_s1 + $0xad0] ss:$8 sps:$4 sm:$0xff]  }
 0x13a   : > { %3162 = vmatprep.subr.bf16.mxu0 %v4390_v1  ;;  %v4486_v1 = vld [vmem:[%s5840_s1 + $0xac4] ss:$8 sps:$4 sm:$0xff]  }
 0x13b   : > { %3204 = vmatpush2.bf16.msra.mxu1 %v4385_v2  ;;  %v4481_v2 = vld [vmem:[%s5840_s1 + $0xbd0] ss:$8 sps:$4 sm:$0xff]  }
 0x13c   : > { %3205 = vmatprep.subr.bf16.mxu1 %v4393_v3  ;;  %v4489_v3 = vld [vmem:[%s5840_s1 + $0xbc4] ss:$8 sps:$4 sm:$0xff]  }
 0x13d   : > { %3163 = vmatpush2.bf16.msra.mxu0 %v4388_v4  ;;  %v4484_v4 = vld [vmem:[%s5840_s1 + $0xac0] ss:$8 sps:$4 sm:$0xff]  }
 0x13e   : > { %3164 = vmatprep.subr.bf16.mxu0 %v4396_v5  ;;  %v4492_v5 = vld [vmem:[%s5840_s1 + $0xab4] ss:$8 sps:$4 sm:$0xff]  }
 0x13f   : > { %3206 = vmatpush2.bf16.msra.mxu1 %v4391_v6  ;;  %v4487_v6 = vld [vmem:[%s5840_s1 + $0xbc0] ss:$8 sps:$4 sm:$0xff]  }
 0x140   : > { %3207 = vmatprep.subr.bf16.mxu1 %v4399_v7  ;;  %v4495_v7 = vld [vmem:[%s5840_s1 + $0xbb4] ss:$8 sps:$4 sm:$0xff]  }
 0x141   : > { %3165 = vmatpush2.bf16.msra.mxu0 %v4394_v8  ;;  %v4490_v8 = vld [vmem:[%s5840_s1 + $0xab0] ss:$8 sps:$4 sm:$0xff]  }
 0x142   : > { %3166 = vmatprep.subr.bf16.mxu0 %v4402_v9  ;;  %v4498_v9 = vld [vmem:[%s5840_s1 + $0xaa4] ss:$8 sps:$4 sm:$0xff]  }
 0x143   : > { %3208 = vmatpush2.bf16.msra.mxu1 %v4397_v10  ;;  %v4493_v10 = vld [vmem:[%s5840_s1 + $0xbb0] ss:$8 sps:$4 sm:$0xff]  }
 0x144   : > { %3209 = vmatprep.subr.bf16.mxu1 %v4405_v11  ;;  %v4501_v11 = vld [vmem:[%s5840_s1 + $0xba4] ss:$8 sps:$4 sm:$0xff]  }
 0x145   : > { %3167 = vmatpush2.bf16.msra.mxu0 %v4400_v12  ;;  %v4496_v12 = vld [vmem:[%s5840_s1 + $0xaa0] ss:$8 sps:$4 sm:$0xff]  }
 0x146   : > { %3168 = vmatprep.subr.bf16.mxu0 %v4408_v13  ;;  %v4504_v13 = vld [vmem:[%s5840_s1 + $0xa94] ss:$8 sps:$4 sm:$0xff]  }
 0x147   : > { %3210 = vmatpush2.bf16.msra.mxu1 %v4403_v14  ;;  %v4499_v14 = vld [vmem:[%s5840_s1 + $0xba0] ss:$8 sps:$4 sm:$0xff]  }
 0x148   : > { %3211 = vmatprep.subr.bf16.mxu1 %v4411_v15  ;;  %v4507_v15 = vld [vmem:[%s5840_s1 + $0xb94] ss:$8 sps:$4 sm:$0xff]  }
 0x149   : > { %3169 = vmatpush2.bf16.msra.mxu0 %v4406_v16  ;;  %v4502_v16 = vld [vmem:[%s5840_s1 + $0xa90] ss:$8 sps:$4 sm:$0xff]  }
 0x14a   : > { %3224 = vmatprep.subr.bf16.mxu0 %v4417_v17  ;;  %v4510_v17 = vld [vmem:[%s5840_s1 + $0xa84] ss:$8 sps:$4 sm:$0xff]  }
 0x14b   : > { %3212 = vmatpush2.bf16.msra.mxu1 %v4409_v18  ;;  %v4505_v18 = vld [vmem:[%s5840_s1 + $0xb90] ss:$8 sps:$4 sm:$0xff]  }
 0x14c   : > { %3171 = vmatmul.mubr.bf16.vlgmr.msra.gmra.mxu0 %v4412_v19  ;;  %3267 = vmatprep.subr.bf16.mxu1 %v4423_v20  ;;  %v4513_v19 = vld [vmem:[%s5840_s1 + $0xb84] ss:$8 sps:$4 sm:$0xff]   ;;  %v4508_v20 = vld [vmem:[%s5840_s1 + $0xa80] ss:$8 sps:$4 sm:$0xff]  }
 0x14d   : > { %3225 = vmatpush1.bf16.msra.mxu0 %v4415_v21  ;;  %3256 = vmatprep.mubr.bf16.mxu0 %v4516_v22  ;;  %v4519_v21 = vld [vmem:[%s5840_s1 + $0xc74] ss:$8 sps:$4 sm:$0xff]   ;;  %v4511_v22 = vld [vmem:[%s5840_s1 + $0xb80] ss:$8 sps:$4 sm:$0xff]  }
 0x14e   : > { %3214 = vmatmul.mubr.bf16.vlgmr.msra.gmra.mxu1 %v4418_v23  ;;  %3226 = vmatprep.subr.bf16.mxu0 %v4426_v24  ;;  %v4514_v23 = vld [vmem:[%s4727_s10 + $0x50] ss:$100 sps:$4 sm:$0xff]  }
 0x14f   : > { %3268 = vmatpush1.bf16.msra.mxu1 %v4421_v25  ;;  %3299 = vmatprep.mubr.bf16.mxu1 %v4522_v26  ;;  %v4517_v24 = vld [vmem:[%s5840_s1 + $0xc70] ss:$8 sps:$4 sm:$0xff]   ;;  %v4525_v26 = vld [vmem:[%s5840_s1 + $0xc64] ss:$8 sps:$4 sm:$0xff]  }
 0x150   : > { %3269 = vmatprep.subr.bf16.mxu1 %v4429_v27  ;;  %v4520_v25 = vld [vmem:[%s4727_s10 + $0x58] ss:$100 sps:$4 sm:$0xff]   ;;  %v4523_v27 = vld [vmem:[%s5840_s1 + $0xc60] ss:$8 sps:$4 sm:$0xff]  }
 0x151   : > { %3227 = vmatpush1.bf16.msra.mxu0 %v4424_v28  ;;  %v4553_v28 = vmov 0  }
 0x152   : > { %3228 = vmatprep.subr.bf16.mxu0 %v4432_v29  ;;  %v4528_v29 = vld [vmem:[%s5840_s1 + $0xc54] ss:$8 sps:$4 sm:$0xff]  }
 0x153   : > { %3270 = vmatpush1.bf16.msra.mxu1 %v4427_v30  ;;  %v4526_v30 = vld [vmem:[%s5840_s1 + $0xc50] ss:$8 sps:$4 sm:$0xff]  }
 0x154   : > { %3271 = vmatprep.subr.bf16.mxu1 %v4435_v31  ;;  %v4531_v31 = vld [vmem:[%s5840_s1 + $0xc44] ss:$8 sps:$4 sm:$0xff]  }
 0x155   : > { %3229 = vmatpush1.bf16.msra.mxu0 %v4430_v32  ;;  %v4529_v32 = vld [vmem:[%s5840_s1 + $0xc40] ss:$8 sps:$4 sm:$0xff]  }
 0x156   : > { %3230 = vmatprep.subr.bf16.mxu0 %v4438_v33  ;;  %v4534_v33 = vld [vmem:[%s5840_s1 + $0xc34] ss:$8 sps:$4 sm:$0xff]  }
 0x157   : > { %3272 = vmatpush1.bf16.msra.mxu1 %v4433_v34  ;;  %v4532_v34 = vld [vmem:[%s5840_s1 + $0xc30] ss:$8 sps:$4 sm:$0xff]  }
 0x158   : > { %3273 = vmatprep.subr.bf16.mxu1 %v4441_v35  ;;  %v4537_v35 = vld [vmem:[%s5840_s1 + $0xc24] ss:$8 sps:$4 sm:$0xff]  }
 0x159   : > { %3231 = vmatpush1.bf16.msra.mxu0 %v4436_v36  ;;  %v4535_v36 = vld [vmem:[%s5840_s1 + $0xc20] ss:$8 sps:$4 sm:$0xff]  }
 0x15a   : > { %3232 = vmatprep.subr.bf16.mxu0 %v4444_v37  ;;  %v4540_v37 = vld [vmem:[%s5840_s1 + $0xc14] ss:$8 sps:$4 sm:$0xff]  }
 0x15b   : > { %3274 = vmatpush1.bf16.msra.mxu1 %v4439_v38  ;;  %v4538_v38 = vld [vmem:[%s5840_s1 + $0xc10] ss:$8 sps:$4 sm:$0xff]  }
 0x15c   : > { %3275 = vmatprep.subr.bf16.mxu1 %v4447_v39  ;;  %v4543_v39 = vld [vmem:[%s5840_s1 + $0xc04] ss:$8 sps:$4 sm:$0xff]  }
 0x15d   : > { %3233 = vmatpush1.bf16.msra.mxu0 %v4442_v40  ;;  %v4541_v40 = vld [vmem:[%s5840_s1 + $0xc00] ss:$8 sps:$4 sm:$0xff]  }
 0x15e   : > { %3234 = vmatprep.subr.bf16.mxu0 %v4450_v41  ;;  %v4544_v41 = vld [vmem:[%s4727_s10 + $0x60] ss:$100 sps:$4 sm:$0xff]  }
 0x15f   : > { %3276 = vmatpush1.bf16.msra.mxu1 %v4445_v42  ;;  %v2828_v42 = vpop.f32.mrf.mxu0 }
 0x160   : > { %3277 = vmatprep.subr.bf16.mxu1 %v4453_v43 }
 0x161   : > { %3235 = vmatpush1.bf16.msra.mxu0 %v4448_v44  ;;  %v2830_v43 = vpop.f32.mrf.mxu0  ;;  %v2871_v44 = vpop.f32.mrf.mxu1 }
 0x162   : > { %3236 = vmatprep.subr.bf16.mxu0 %v4456_v45 }
 0x163   : > { %3278 = vmatpush1.bf16.msra.mxu1 %v4451_v46  ;;  %v2832_v45 = vpop.f32.mrf.mxu0  ;;  %v2873_v46 = vpop.f32.mrf.mxu1 }
 0x164   : > { %3279 = vmatprep.subr.bf16.mxu1 %v4459_v47 }
 0x165   : > { %3237 = vmatpush1.bf16.msra.mxu0 %v4454_v48  ;;  %v2834_v47 = vpop.f32.mrf.mxu0  ;;  %v2875_v48 = vpop.f32.mrf.mxu1 }
 0x166   : > { %3238 = vmatprep.subr.bf16.mxu0 %v4462_v49 }
 0x167   : > { %3280 = vmatpush1.bf16.msra.mxu1 %v4457_v50  ;;  %v2914_v49 = vpop.f32.mrf.mxu0  ;;  %v2877_v50 = vpop.f32.mrf.mxu1 }
 0x168   : > { %3281 = vmatprep.subr.bf16.mxu1 %v4465_v51 }
 0x169   : > { %3239 = vmatpush1.bf16.msra.mxu0 %v4460_v52  ;;  %v2916_v51 = vpop.f32.mrf.mxu0  ;;  %v2957_v52 = vpop.f32.mrf.mxu1 }
 0x16a   : > { %3240 = vmatprep.subr.bf16.mxu0 %v4468_v53 }
 0x16b   : > { %3282 = vmatpush1.bf16.msra.mxu1 %v4463_v54  ;;  %v2918_v53 = vpop.f32.mrf.mxu0  ;;  %v2959_v54 = vpop.f32.mrf.mxu1 }
 0x16c   : > { %3283 = vmatprep.subr.bf16.mxu1 %v4471_v55 }
 0x16d   : > { %3241 = vmatpush2.bf16.msra.mxu0 %v4466_v56  ;;  %v2920_v55 = vpop.f32.mrf.mxu0  ;;  %v2961_v56 = vpop.f32.mrf.mxu1 }
 0x16e   : > { %3242 = vmatprep.subr.bf16.mxu0 %v4474_v57 }
 0x16f   : > { %3284 = vmatpush2.bf16.msra.mxu1 %v4469_v58  ;;  %v2963_v58 = vpop.f32.mrf.mxu1 }
 0x170   : > { %3285 = vmatprep.subr.bf16.mxu1 %v4477_v59 }
 0x171   : > { %3243 = vmatpush2.bf16.msra.mxu0 %v4472_v60 }
 0x172   : > { %3244 = vmatprep.subr.bf16.mxu0 %v4480_v61  ;;  %v658_v61 = vlaneseq }
 0x173   : > { %3286 = vmatpush2.bf16.msra.mxu1 %v4475_v62 }
 0x174   : > { %3287 = vmatprep.subr.bf16.mxu1 %v4483_v63 }
 0x175   : > { %3245 = vmatpush2.bf16.msra.mxu0 %v4478_v0  ;;  %v659_v0 = vshrl.u32 %v658_v61, 7 }
 0x176   : > { %3246 = vmatprep.subr.bf16.mxu0 %v4486_v1 }
 0x177   : > { %3288 = vmatpush2.bf16.msra.mxu1 %v4481_v2 }
 0x178   : > { %3289 = vmatprep.subr.bf16.mxu1 %v4489_v3  ;;  %v660_v3 = vsub.s32 0, %v659_v0 }
 0x179   : > { %3247 = vmatpush2.bf16.msra.mxu0 %v4484_v4  ;;  %v656_v4 = vld [vmem:[%s5841_s2] sm:$0x3] }
 0x17a   : > { %3248 = vmatprep.subr.bf16.mxu0 %v4492_v5 }
 0x17b   : > { %3290 = vmatpush2.bf16.msra.mxu1 %v4487_v6  ;;  %v664_v6 = vsub.s32 1, %v659_v0 }
 0x17c   : > { %3291 = vmatprep.subr.bf16.mxu1 %v4495_v7 }
 0x17d   : > { %3249 = vmatpush2.bf16.msra.mxu0 %v4490_v8  ;;  %v661_v8 = vrot.slane %v656_v4, %v660_v3 }
 0x17e   : > { %3250 = vmatprep.subr.bf16.mxu0 %v4498_v9 }
 0x17f   : > { %3292 = vmatpush2.bf16.msra.mxu1 %v4493_v10 }
 0x180   : > { %3293 = vmatprep.subr.bf16.mxu1 %v4501_v11  ;;  %v665_v11 = vrot.slane %v656_v4, %v664_v6 }
 0x181   : > { %3251 = vmatpush2.bf16.msra.mxu0 %v4496_v12  ;;  %v2829_v12 = vadd.f32 %v2828_v42, %v661_v8 }
 0x182   : > { %3252 = vmatprep.subr.bf16.mxu0 %v4504_v13 }
 0x183   : > { %3294 = vmatpush2.bf16.msra.mxu1 %v4499_v14 }
 0x184   : > { %3295 = vmatprep.subr.bf16.mxu1 %v4507_v15  ;;  %v2831_v15 = vadd.f32 %v2830_v43, %v665_v11 }
 0x185   : > { %3253 = vmatpush2.bf16.msra.mxu0 %v4502_v16  ;;  %v2872_v16 = vadd.f32 %v2871_v44, %v2829_v12 }
 0x186   : > { %3254 = vmatprep.subr.bf16.mxu0 %v4510_v17  ;;  %v2833_v17 = vadd.f32 %v2832_v45, %v661_v8 }
 0x187   : > { %3296 = vmatpush2.bf16.msra.mxu1 %v4505_v18 }
 0x188   : > { %3297 = vmatprep.subr.bf16.mxu1 %v4513_v19 }
 0x189   : > { %3255 = vmatpush2.bf16.msra.mxu0 %v4508_v20  ;;  %v2874_v20 = vadd.f32 %v2873_v46, %v2831_v15 }
 0x18a   : > { %3310 = vmatprep.subr.bf16.mxu0 %v4519_v21  ;;  %v2835_v21 = vadd.f32 %v2834_v47, %v665_v11 }
 0x18b   : > { %3298 = vmatpush2.bf16.msra.mxu1 %v4511_v22  ;;  %v2915_v22 = vadd.f32 %v2914_v49, %v2872_v16 }
 0x18c   : > { %3257 = vmatmul.mubr.bf16.vlgmr.msra.gmra.mxu0 %v4514_v23  ;;  %v3000_v57 = vpop.f32.mrf.mxu0 }
 0x18d   : > { %3311 = vmatpush1.bf16.msra.mxu0 %v4517_v24  ;;  %3342 = vmatprep.mubr.bf16.mxu0 %v4553_v28  ;;  %v2876_v24 = vadd.f32 %v2875_v48, %v2833_v17  ;;  %v2958_v28 = vadd.f32 %v2957_v52, %v2915_v22 }
 0x18e   : > { %3300 = vmatmul.mubr.bf16.vlgmr.msra.gmra.mxu1 %v4520_v25  ;;  %3312 = vmatprep.subr.bf16.mxu0 %v4525_v26  ;;  %v3002_v59 = vpop.f32.mrf.mxu0  ;;  %v3043_v60 = vpop.f32.mrf.mxu1  ;;  %v2917_v25 = vadd.f32 %v2916_v51, %v2874_v20 }
 0x190   : > { %v3004_v62 = vpop.f32.mrf.mxu0  ;;  %v3045_v63 = vpop.f32.mrf.mxu1 }
 0x191   : > { %3313 = vmatpush1.bf16.msra.mxu0 %v4523_v27  ;;  %v2878_v27 = vadd.f32 %v2877_v50, %v2835_v21 }
 0x192   : > { %3314 = vmatprep.subr.bf16.mxu0 %v4528_v29  ;;  %v3006_v1 = vpop.f32.mrf.mxu0  ;;  %v3047_v2 = vpop.f32.mrf.mxu1  ;;  %v2919_v29 = vadd.f32 %v2918_v53, %v2876_v24 }
 0x194   : > { %v3049_v7 = vpop.f32.mrf.mxu1 }
 0x195   : > { %3315 = vmatpush1.bf16.msra.mxu0 %v4526_v30 }
 0x196   : > { %3316 = vmatprep.subr.bf16.mxu0 %v4531_v31 }
 0x199   : > { %3317 = vmatpush1.bf16.msra.mxu0 %v4529_v32  ;;  %v2960_v32 = vadd.f32 %v2959_v54, %v2917_v25 }
 0x19a   : > { %3318 = vmatprep.subr.bf16.mxu0 %v4534_v33  ;;  %v2921_v33 = vadd.f32 %v2920_v55, %v2878_v27 }
 0x19d   : > { %3319 = vmatpush1.bf16.msra.mxu0 %v4532_v34  ;;  %v3001_v34 = vadd.f32 %v3000_v57, %v2958_v28 }
 0x19e   : > { %3320 = vmatprep.subr.bf16.mxu0 %v4537_v35  ;;  %v2962_v35 = vadd.f32 %v2961_v56, %v2919_v29 }
 0x1a1   : > { %3321 = vmatpush1.bf16.msra.mxu0 %v4535_v36  ;;  %v3003_v36 = vadd.f32 %v3002_v59, %v2960_v32 }
 0x1a2   : > { %3322 = vmatprep.subr.bf16.mxu0 %v4540_v37 }
 0x1a3   : > { %v3046_v42 = vadd.f32 %v3045_v63, %v3003_v36 }
 0x1a5   : > { %3323 = vmatpush1.bf16.msra.mxu0 %v4538_v38 }
 0x1a6   : > { %3324 = vmatprep.subr.bf16.mxu0 %v4543_v39  ;;  %v2964_v39 = vadd.f32 %v2963_v58, %v2921_v33 }
 0x1a8   : > { %v3007_v43 = vadd.f32 %v3006_v1, %v2964_v39  ;;  %v3372_v39 = vld [vmem:[%s221_s14 + $0x8] sm:$0xff] }
 0x1a9   : > { %3325 = vmatpush1.bf16.msra.mxu0 %v4541_v40  ;;  %v3044_v40 = vadd.f32 %v3043_v60, %v3001_v34 }
 0x1aa   : > { %v3050_v50 = vadd.f32 %v3049_v7, %v3007_v43 }
 0x1ac   : > { %3343 = vmatmul.mubr.bf16.vlgmr.msra.gmra.mxu0 %v4544_v41  ;;  %v3005_v41 = vadd.f32 %v3004_v62, %v2962_v35 }
 0x1ae   : > { %v3048_v47 = vadd.f32 %v3047_v2, %v3005_v41 }
 0x1cc   : > { %v3086_v5 = vpop.f32.mrf.mxu0 }
 0x1cd   : > { %v3087_v44 = vadd.f32 %v3086_v5, %v3044_v40 }
 0x1ce   : > { %v3088_v9 = vpop.f32.mrf.mxu0  ;;  %v3129_v10 = vpop.f32.mrf.mxu1 }
 0x1cf   : > { %v3089_v48 = vadd.f32 %v3088_v9, %v3046_v42  ;;  %v3130_v51 = vadd.f32 %v3129_v10, %v3087_v44  ;;  %v3376_v42 = vunpack.c.h.bf16 %v3372_v39 }
 0x1d0   : > { %v3090_v13 = vpop.f32.mrf.mxu0  ;;  %v3131_v14 = vpop.f32.mrf.mxu1 }
 0x1d1   : > { %v3091_v52 = vadd.f32 %v3090_v13, %v3048_v47  ;;  %v3132_v54 = vadd.f32 %v3131_v14, %v3089_v48 }
 0x1d2   : > { %v3092_v18 = vpop.f32.mrf.mxu0  ;;  %v3133_v19 = vpop.f32.mrf.mxu1 }
 0x1d3   : > { %v3093_v55 = vadd.f32 %v3092_v18, %v3050_v50  ;;  %v3134_v58 = vadd.f32 %v3133_v19, %v3091_v52 }
 0x1d4   : > { %v3135_v26 = vpop.f32.mrf.mxu1 }
 0x1d5   : > { %v3136_v61 = vadd.f32 %v3135_v26, %v3093_v55 }
 0x20c   : > { %v3172_v23 = vpop.f32.mrf.mxu0 }
 0x20d   : > { %v3173_v56 = vadd.f32 %v3172_v23, %v3130_v51 }
 0x20e   : > { %v3174_v30 = vpop.f32.mrf.mxu0  ;;  %v3215_v31 = vpop.f32.mrf.mxu1 }
 0x20f   : > { %v3175_v60 = vadd.f32 %v3174_v30, %v3132_v54  ;;  %v3216_v62 = vadd.f32 %v3215_v31, %v3173_v56  ;;  %v3371_v31 = vld [vmem:[%s221_s14] sm:$0xff] }
 0x210   : > { %v3176_v37 = vpop.f32.mrf.mxu0  ;;  %v3217_v38 = vpop.f32.mrf.mxu1 }
 0x211   : > { %v3177_v63 = vadd.f32 %v3176_v37, %v3134_v58  ;;  %v3218_v3 = vadd.f32 %v3217_v38, %v3175_v60  ;;  %v3373_v37 = vunpack.c.l.bf16 %v3371_v31  ;;  %v3374_v38 = vunpack.c.h.bf16 %v3371_v31 }
 0x212   : > { %v3178_v45 = vpop.f32.mrf.mxu0  ;;  %v3219_v46 = vpop.f32.mrf.mxu1 }
 0x213   : > { %v3179_v2 = vadd.f32 %v3178_v45, %v3136_v61  ;;  %v3220_v5 = vadd.f32 %v3219_v46, %v3177_v63  ;;  %v3375_v46 = vunpack.c.l.bf16 %v3372_v39 }
 0x214   : > { %v3221_v53 = vpop.f32.mrf.mxu1 }
 0x215   : > { %v3222_v9 = vadd.f32 %v3221_v53, %v3179_v2 }
 0x24c   : > { %v3258_v49 = vpop.f32.mrf.mxu0 }
 0x24d   : > { %v3259_v4 = vadd.f32 %v3258_v49, %v3216_v62 }
 0x24e   : > { %v3260_v57 = vpop.f32.mrf.mxu0  ;;  %v3301_v59 = vpop.f32.mrf.mxu1 }
 0x24f   : > { %v3261_v6 = vadd.f32 %v3260_v57, %v3218_v3  ;;  %v3302_v10 = vadd.f32 %v3301_v59, %v3259_v4 }
 0x250   : > { %v3262_v0 = vpop.f32.mrf.mxu0  ;;  %v3303_v1 = vpop.f32.mrf.mxu1 }
 0x251   : > { %v3263_v11 = vadd.f32 %v3262_v0, %v3220_v5  ;;  %v3304_v13 = vadd.f32 %v3303_v1, %v3261_v6 }
 0x252   : > { %v3264_v7 = vpop.f32.mrf.mxu0  ;;  %v3305_v8 = vpop.f32.mrf.mxu1 }
 0x253   : > { %v3265_v14 = vadd.f32 %v3264_v7, %v3222_v9  ;;  %v3306_v18 = vadd.f32 %v3305_v8, %v3263_v11 }
 0x254   : > { %v3307_v16 = vpop.f32.mrf.mxu1 }
 0x255   : > { %v3308_v21 = vadd.f32 %v3307_v16, %v3265_v14 }
 0x26c   : > { %v3344_v12 = vpop.f32.mrf.mxu0 }
 0x26d   : > { %v3345_v15 = vadd.f32 %v3344_v12, %v3302_v10 }
 0x26e   : > { %v3346_v17 = vpop.f32.mrf.mxu0 }
 0x26f   : > { %v3347_v19 = vadd.f32 %v3346_v17, %v3304_v13  ;;  %v3357_v22 = vmul.f32 0.01, %v3345_v15  ;;  %vm3353_vm0 = vcmp.gt.f32.partialorder %v3345_v15, 0.0 }
 0x270   : > { %v3348_v20 = vpop.f32.mrf.mxu0 }
 0x271   : > { %v3349_v23 = vadd.f32 %v3348_v20, %v3306_v18  ;;  %v3358_v25 = vmul.f32 0.01, %v3347_v19  ;;  %vm3354_vm2 = vcmp.gt.f32.partialorder %v3347_v19, 0.0  ;;  %v3361_v28 = vsel %vm3353_vm0, %v3345_v15, %v3357_v22 }
 0x272   : > { %v3350_v24 = vpop.f32.mrf.mxu0 }
 0x273   : > { %vm3355_vm1 = vcmp.gt.f32.partialorder %v3349_v23, 0.0  ;;  %v3359_v26 = vmul.f32 0.01, %v3349_v23  ;;  %v3351_v27 = vadd.f32 %v3350_v24, %v3308_v21  ;;  %v3362_v33 = vsel %vm3354_vm2, %v3347_v19, %v3358_v25 }
 0x275   : > { %v3363_v29 = vsel %vm3355_vm1, %v3349_v23, %v3359_v26  ;;  %vm3356_vm3 = vcmp.gt.f32.partialorder %v3351_v27, 0.0  ;;  %v3360_v30 = vmul.f32 0.01, %v3351_v27 }
 0x276   : > { %v3365_v32 = vpack.c.bf16 %v3363_v29, %v3361_v28 }
 0x277   : > { %v3364_v34 = vsel %vm3356_vm3, %v3351_v27, %v3360_v30 }
 0x278   : > { %v3366_v35 = vpack.c.bf16 %v3364_v34, %v3362_v33  ;;  %v3367_v36 = vunpack.c.l.bf16 %v3365_v32  ;;  %v3369_v45 = vunpack.c.h.bf16 %v3365_v32 }
 0x27a   : > { %v3368_v40 = vunpack.c.l.bf16 %v3366_v35  ;;  %v3370_v41 = vunpack.c.h.bf16 %v3366_v35  ;;  %v3377_v43 = vmul.f32 %v3373_v37, %v3367_v36  ;;  %v3379_v49 = vmul.f32 %v3375_v46, %v3369_v45 }
 0x27c   : > { %v3378_v44 = vmul.f32 %v3374_v38, %v3368_v40  ;;  %v3380_v48 = vmul.f32 %v3376_v42, %v3370_v41 }
 0x27e   : > { %v3381_v47 = vadd.f32 %v3378_v44, %v3377_v43  ;;  %v3384_v50 = vadd.f32 %v3380_v48, %v3379_v49 }
 0x280   : > { %3382 = vadd.xlane.f32.xlu0 %v3381_v47 }
 0x284   : > { %3385 = vadd.xlane.f32.xlu0 %v3384_v50 }
 0x309   : > { %v3383_v51 = vpop.xlane.xlu0 %3382 }
 0x30a   : > { %3388 = vst.msk [vmem:[%s227_s19] sm:$0xff] %vm3387_vm4, %v3383_v51 }
 0x30d   : > { %v3386_v52 = vpop.xlane.xlu0 %3385 }
 0x30e   : > { %3389 = vst.msk [vmem:[%s227_s19 + $0x8] sm:$0xff] %vm3387_vm4, %v3386_v52 }
 0x30f PF: > { %s14_s15 = sadd.s32 1, %s4551_s15  }
 0x310   : > { %p11_p4 = scmp.ge.s32.totalorder %s14_s15, 4  }
 0x312   :  { %13 = sbr.rel (!%p11_p4) target bundleno = 1 (0x1), region = 69 }

</bundles_post_ra>
